<compile_context>
chip_gen: v7x
topology: tpu7x:2x2x1
jax: 0.10.0
libtpu: 0.0.40
codegen_flags: <defaults>
</compile_context>

<pallas_src>
import functools

import jax
import jax.numpy as jnp
from jax.experimental import pallas as pl
from jax.experimental.pallas import tpu as pltpu

BN_EPS = 1e-5
C_PAD = 128                     # lane-dense channel padding for activations / weights
K1_PAD = 256                    # conv1 im2col contraction dim (7*7*3=147 -> 256)
NUM_CLASSES = 10
VMEM_LIMIT = 48 * 1024 * 1024   # < v7x 64 MiB physical; plenty on v5e/v6e (128 MiB)


def _full_spec(shape):
    nd = len(shape)
    return pl.BlockSpec(shape, lambda *_: (0,) * nd)


def _pick_bblk(n, rows_per_image, target=256):
    """Largest divisor of n with bblk*rows_per_image <= target (MXU M rows)."""
    b = max(1, min(n, target // max(rows_per_image, 1)))
    while n % b:
        b -= 1
    return b


# --------------------------------------------------------------------------
# conv1: one-shot im2col GEMM (K = kh*kw*cin) fused with BN1 batch-statistics.
# --------------------------------------------------------------------------

def _conv1_bn_kernel(p_ref, w_ref, y_ref, mean_ref, m2_ref, *, bblk, oh, ow):
    kp = p_ref.shape[-1]
    cp = w_ref.shape[-1]
    m = bblk * oh * ow
    a = p_ref[...].reshape(m, kp)                              # bf16 patches, M x K
    acc = jnp.dot(a, w_ref[...], preferred_element_type=jnp.float32)   # one MXU pass
    # Fused BN1 per-image statistics (mean + centered sum-of-squares, f32).
    acc3 = acc.reshape(bblk, oh * ow, cp)
    mean = jnp.mean(acc3, axis=1)                              # [bblk, cp]
    d = acc3 - mean[:, None, :]
    mean_ref[...] = mean.reshape(bblk, 1, cp)
    m2_ref[...] = jnp.sum(d * d, axis=1).reshape(bblk, 1, cp)
    y_ref[...] = acc.reshape(bblk, oh, ow, cp).astype(jnp.bfloat16)    # single store


def _im2col(x, kh, kw, stride, pad, k_pad):
    """NHWC f32 -> bf16 patches [N, OH*OW, k_pad] (cheap: cin=3, tiny input)."""
    n, h, w, c = x.shape
    oh = (h + 2 * pad - kh) // stride + 1
    ow = (w + 2 * pad - kw) // stride + 1
    xp = jnp.pad(x, ((0, 0), (pad, pad), (pad, pad), (0, 0)))
    cols = []
    for i in range(kh):
        for j in range(kw):
            cols.append(xp[:, i:i + stride * (oh - 1) + 1:stride,
                           j:j + stride * (ow - 1) + 1:stride, :])     # [N,OH,OW,C]
    p = jnp.concatenate(cols, axis=-1).reshape(n, oh * ow, kh * kw * c)
    p = jnp.pad(p, ((0, 0), (0, 0), (0, k_pad - kh * kw * c))).astype(jnp.bfloat16)
    return p, oh, ow


def conv1_bn(patches, w1, oh, ow):
    n, ohow, kp = patches.shape
    cp = w1.shape[-1]
    bblk = _pick_bblk(n, ohow)
    kernel = functools.partial(_conv1_bn_kernel, bblk=bblk, oh=oh, ow=ow)
    return pl.pallas_call(
        kernel,
        grid=(n // bblk,),
        in_specs=[
            pl.BlockSpec((bblk, ohow, kp), lambda b: (b, 0, 0)),
            pl.BlockSpec((kp, cp), lambda b: (0, 0)),          # weights fully resident
        ],
        out_specs=(
            pl.BlockSpec((bblk, oh, ow, cp), lambda b: (b, 0, 0, 0)),
            pl.BlockSpec((bblk, 1, cp), lambda b: (b, 0, 0)),
            pl.BlockSpec((bblk, 1, cp), lambda b: (b, 0, 0)),
        ),
        out_shape=(
            jax.ShapeDtypeStruct((n, oh, ow, cp), jnp.bfloat16),
            jax.ShapeDtypeStruct((n, 1, cp), jnp.float32),
            jax.ShapeDtypeStruct((n, 1, cp), jnp.float32),
        ),
        compiler_params=pltpu.CompilerParams(
            dimension_semantics=("parallel",), vmem_limit_bytes=VMEM_LIMIT),
    )(patches, w1)


# --------------------------------------------------------------------------
# conv2 / conv3 (3x3, stride 1, pad 1): previous BN scale/shift + ReLU + zero-pad
# fused in the prologue; implicit GEMM tap loop with a local f32 accumulator;
# fused BN batch-statistics in the epilogue.  conv3 skips the activation write.
# --------------------------------------------------------------------------

def _conv3x3_bn_kernel(x_ref, scale_ref, shift_ref, w_ref, *refs,
                       bblk, h, w, write_y):
    if write_y:
        y_ref, mean_ref, m2_ref, xs_ref = refs
    else:
        y_ref = None
        mean_ref, m2_ref, xs_ref = refs
    cp = x_ref.shape[-1]

    # Prologue: BN(prev) + ReLU + zero pad, one pass over the resident block -> bf16.
    xs_ref[...] = jnp.zeros_like(xs_ref)
    xn = x_ref[...].astype(jnp.float32) * scale_ref[0] + shift_ref[0]
    xs_ref[:, 1:h + 1, 1:w + 1, :] = jnp.maximum(xn, 0.0).astype(jnp.bfloat16)

    # 3x3 implicit GEMM: 9 taps, M = bblk*h*w, local f32 accumulator (written once).
    m = bblk * h * w
    acc = jnp.zeros((m, cp), jnp.float32)
    for t in range(9):
        i, j = divmod(t, 3)
        a = xs_ref[:, i:i + h, j:j + w, :].reshape(m, cp)      # bf16 shifted window
        acc = acc + jnp.dot(a, w_ref[t], preferred_element_type=jnp.float32)

    # Epilogue: per-image BN statistics (mean + centered SS, f32).
    acc3 = acc.reshape(bblk, h * w, cp)
    mean = jnp.mean(acc3, axis=1)
    d = acc3 - mean[:, None, :]
    mean_ref[...] = mean.reshape(bblk, 1, cp)
    m2_ref[...] = jnp.sum(d * d, axis=1).reshape(bblk, 1, cp)
    if write_y:
        y_ref[...] = acc.reshape(bblk, h, w, cp).astype(jnp.bfloat16)


def conv3x3_bn(x, scale, shift, w, write_y):
    n, h, wd, cp = x.shape
    bblk = _pick_bblk(n, h * wd)
    kernel = functools.partial(_conv3x3_bn_kernel, bblk=bblk, h=h, w=wd,
                               write_y=write_y)
    out_specs, out_shape = [], []
    if write_y:
        out_specs.append(pl.BlockSpec((bblk, h, wd, cp), lambda b: (b, 0, 0, 0)))
        out_shape.append(jax.ShapeDtypeStruct((n, h, wd, cp), jnp.bfloat16))
    out_specs += [pl.BlockSpec((bblk, 1, cp), lambda b: (b, 0, 0))] * 2
    out_shape += [jax.ShapeDtypeStruct((n, 1, cp), jnp.float32)] * 2
    return pl.pallas_call(
        kernel,
        grid=(n // bblk,),
        in_specs=[
            pl.BlockSpec((bblk, h, wd, cp), lambda b: (b, 0, 0, 0)),   # bf16 activations
            pl.BlockSpec((1, cp), lambda b: (0, 0)),                   # BN scale (f32)
            pl.BlockSpec((1, cp), lambda b: (0, 0)),                   # BN shift (f32)
            pl.BlockSpec((9, cp, cp), lambda b: (0, 0, 0)),            # all taps resident
        ],
        out_specs=tuple(out_specs),
        out_shape=tuple(out_shape),
        scratch_shapes=[pltpu.VMEM((bblk, h + 2, wd + 2, cp), jnp.bfloat16)],
        compiler_params=pltpu.CompilerParams(
            dimension_semantics=("parallel",), vmem_limit_bytes=VMEM_LIMIT),
    )(x, scale, shift, w)


# --------------------------------------------------------------------------
# BN batch combine (tiny [N,1,Cp] reduction -> per-channel scale/shift), plain JAX.
# --------------------------------------------------------------------------

def bn_scale_shift(mean_n, m2_n, m_per_image):
    n = mean_n.shape[0]
    mu = jnp.mean(mean_n, axis=0)                                # [1, Cp]
    dm = mean_n - mu[None]
    var = jnp.sum(m2_n + m_per_image * dm * dm, axis=0) / (n * m_per_image)
    scale = jax.lax.rsqrt(var + BN_EPS)                          # gamma = 1
    shift = -mu * scale                                          # beta  = 0
    return scale, shift                                          # [1, Cp] f32 each


# --------------------------------------------------------------------------
# Head: bn3 combine + global average pool + FC, fused.
# avgpool(bn3(y3)) == (per-image-mean(y3) - batch_mean) * scale, so only the
# per-image stats from conv3 are needed (no full activation).
# --------------------------------------------------------------------------

def _head_kernel(mean_ref, m2_ref, wfc_ref, bfc_ref, o_ref, *, m_per_image):
    mean_n = mean_ref[...][:, 0, :]                              # [N, Cp] f32
    m2_n = m2_ref[...][:, 0, :]
    n = mean_n.shape[0]
    mu = jnp.mean(mean_n, axis=0, keepdims=True)
    dm = mean_n - mu
    var = jnp.sum(m2_n + m_per_image * dm * dm, axis=0, keepdims=True) / (n * m_per_image)
    scale = jax.lax.rsqrt(var + BN_EPS)                          # EUP rsqrt
    feat = (mean_n - mu) * scale                                 # == avgpool(bn3(y3))
    o_ref[...] = jnp.dot(feat.astype(jnp.bfloat16), wfc_ref[...],
                         preferred_element_type=jnp.float32) + bfc_ref[...]


def head(mean3, m23, wfc, bfc, m_per_image):
    n = mean3.shape[0]
    cp, ncp = wfc.shape
    kernel = functools.partial(_head_kernel, m_per_image=m_per_image)
    return pl.pallas_call(
        kernel,
        in_specs=[_full_spec((n, 1, cp)), _full_spec((n, 1, cp)),
                  _full_spec((cp, ncp)), _full_spec((1, ncp))],
        out_specs=_full_spec((n, ncp)),
        out_shape=jax.ShapeDtypeStruct((n, ncp), jnp.float32),
        compiler_params=pltpu.CompilerParams(vmem_limit_bytes=VMEM_LIMIT),
    )(mean3, m23, wfc, bfc)


# --------------------------------------------------------------------------
# Parameters (PyTorch-matching init) and forward pass.
# --------------------------------------------------------------------------

def init_params(key, num_classes=NUM_CLASSES):
    ks = jax.random.split(key, 5)

    # conv1: kaiming_normal_(fan_out, relu) -> std = sqrt(2/(cout*kh*kw));
    # laid out [kh*kw*cin, cout] to match the im2col patch ordering, K padded to 256.
    std1 = (2.0 / (64 * 7 * 7)) ** 0.5
    w1 = std1 * jax.random.normal(ks[0], (7, 7, 3, 64), jnp.float32)
    w1 = w1.reshape(7 * 7 * 3, 64)
    w1 = jnp.pad(w1, ((0, K1_PAD - 7 * 7 * 3), (0, C_PAD - 64))).astype(jnp.bfloat16)

    def conv3x3_w(k, cin, cout):
        std = (2.0 / (cout * 3 * 3)) ** 0.5
        w = std * jax.random.normal(k, (9, cin, cout), jnp.float32)
        w = jnp.pad(w, ((0, 0), (0, C_PAD - cin), (0, C_PAD - cout)))
        return w.astype(jnp.bfloat16)

    w2 = conv3x3_w(ks[1], 64, 32)                      # conv2: 64 -> 32
    w3 = conv3x3_w(ks[2], 32, 32)                      # conv3: 32 -> 32

    bound = 1.0 / (32.0 ** 0.5)                        # torch Linear default init
    wfc = jax.random.uniform(ks[3], (32, num_classes), jnp.float32, -bound, bound)
    wfc = jnp.pad(wfc, ((0, C_PAD - 32), (0, C_PAD - num_classes))).astype(jnp.bfloat16)
    bfc = jax.random.uniform(ks[4], (1, num_classes), jnp.float32, -bound, bound)
    bfc = jnp.pad(bfc, ((0, 0), (0, C_PAD - num_classes)))
    return dict(w1=w1, w2=w2, w3=w3, wfc=wfc, bfc=bfc)


@jax.jit
def cnn_forward(params, x_nchw):
    x = jnp.transpose(x_nchw, (0, 2, 3, 1)).astype(jnp.float32)   # NCHW -> NHWC

    # conv1 (7x7 s2 p3) as one-shot im2col GEMM + fused BN1 stats.
    patches, oh, ow = _im2col(x, 7, 7, 2, 3, K1_PAD)
    y1, mean1, m21 = conv1_bn(patches, params["w1"], oh, ow)
    s1, b1 = bn_scale_shift(mean1, m21, float(oh * ow))

    # conv2 (3x3 s1 p1): BN1+ReLU fused into the prologue, BN2 stats in the epilogue.
    y2, mean2, m22 = conv3x3_bn(y1, s1, b1, params["w2"], write_y=True)
    s2, b2 = bn_scale_shift(mean2, m22, float(oh * ow))

    # conv3: same, but only per-image stats are needed downstream (no activation write).
    mean3, m23 = conv3x3_bn(y2, s2, b2, params["w3"], write_y=False)

    # Head: BN3 combine + avgpool + FC fused; slice off the lane padding.
    logits = head(mean3, m23, params["wfc"], params["bfc"], float(oh * ow))
    return logits[:, :NUM_CLASSES]


if __name__ == "__main__":
    key = jax.random.PRNGKey(0)
    kp, kx = jax.random.split(key)
    params = init_params(kp, num_classes=NUM_CLASSES)
    x = jax.random.normal(kx, (2, 3, 16, 16), jnp.float32)        # NCHW like PyTorch
    logits = cnn_forward(params, x)
    jax.block_until_ready(logits)
    assert logits.shape == (2, NUM_CLASSES) and logits.dtype == jnp.float32
    print("KERNEL_OK")
</pallas_src>

<mosaic_0001>
module attributes {stable_mosaic.version = 11 : i64} {
  func.func @_conv1_bn_kernel(%arg0: i32, %arg1: memref<2x64x256xbf16, #tpu.memory_space<vmem>>, %arg2: memref<256x128xbf16, #tpu.memory_space<vmem>>, %arg3: memref<2x8x8x128xbf16, #tpu.memory_space<vmem>>, %arg4: memref<2x1x128xf32, #tpu.memory_space<vmem>>, %arg5: memref<2x1x128xf32, #tpu.memory_space<vmem>>) attributes {dimension_semantics = [#tpu.dimension_semantics<parallel>], iteration_bounds = array<i64: 1>, scalar_prefetch = 0 : i64, scratch_operands = 0 : i64, tpu.core_type = #tpu.core_type<tc>, window_params = [{transform_indices = @transform_0, window_bounds = array<i64: 2, 64, 256>}, {pipeline_mode = #tpu.pipeline_mode<synchronous>, transform_indices = @transform_1, window_bounds = array<i64: 256, 128>}, {transform_indices = @transform_2, window_bounds = array<i64: 2, 8, 8, 128>}, {transform_indices = @transform_3, window_bounds = array<i64: 2, 1, 128>}, {transform_indices = @transform_4, window_bounds = array<i64: 2, 1, 128>}]} {
    %c0 = arith.constant 0 : index
    %c0_0 = arith.constant 0 : index
    %c0_1 = arith.constant 0 : index
    %0 = vector.load %arg1[%c0, %c0_0, %c0_1] : memref<2x64x256xbf16, #tpu.memory_space<vmem>>, vector<2x64x256xbf16>
    %1 = vector.shape_cast %0 : vector<2x64x256xbf16> to vector<128x256xbf16>
    %c0_2 = arith.constant 0 : index
    %c0_3 = arith.constant 0 : index
    %2 = vector.load %arg2[%c0_2, %c0_3] : memref<256x128xbf16, #tpu.memory_space<vmem>>, vector<256x128xbf16>
    %cst = arith.constant dense<0.000000e+00> : vector<128x128xf32>
    %3 = tpu.matmul %1, %2, %cst {dimension_numbers = #tpu.dot_dimension_numbers<[1], [0], [0], [1], [0, 0, 1, 1], [], []>} : vector<128x256xbf16>, vector<256x128xbf16>, vector<128x128xf32> -> vector<128x128xf32>
    %4 = vector.shape_cast %3 : vector<128x128xf32> to vector<2x64x128xf32>
    %cst_4 = arith.constant dense<0.000000e+00> : vector<2x128xf32>
    %5 = vector.multi_reduction <add>, %4, %cst_4 [1] : vector<2x64x128xf32> to vector<2x128xf32>
    %cst_5 = arith.constant 6.400000e+01 : f32
    %6 = vector.broadcast %cst_5 : f32 to vector<2x128xf32>
    %7 = arith.divf %5, %6 : vector<2x128xf32>
    %8 = vector.shape_cast %7 : vector<2x128xf32> to vector<2x1x128xf32>
    %9 = vector.broadcast %8 : vector<2x1x128xf32> to vector<2x64x128xf32>
    %10 = arith.subf %4, %9 : vector<2x64x128xf32>
    %11 = vector.shape_cast %7 : vector<2x128xf32> to vector<2x1x128xf32>
    %c0_6 = arith.constant 0 : index
    %c0_7 = arith.constant 0 : index
    %c0_8 = arith.constant 0 : index
    %12 = vector.load %arg4[%c0_6, %c0_7, %c0_8] : memref<2x1x128xf32, #tpu.memory_space<vmem>>, vector<2x1x128xf32>
    tpu.vector_store %arg4[%c0_6, %c0_7, %c0_8], %11 {strides = array<i32>} : memref<2x1x128xf32, #tpu.memory_space<vmem>>, vector<2x1x128xf32>,
    %13 = arith.mulf %10, %10 : vector<2x64x128xf32>
    %cst_9 = arith.constant dense<0.000000e+00> : vector<2x128xf32>
    %14 = vector.multi_reduction <add>, %13, %cst_9 [1] : vector<2x64x128xf32> to vector<2x128xf32>
    %15 = vector.shape_cast %14 : vector<2x128xf32> to vector<2x1x128xf32>
    %c0_10 = arith.constant 0 : index
    %c0_11 = arith.constant 0 : index
    %c0_12 = arith.constant 0 : index
    %16 = vector.load %arg5[%c0_10, %c0_11, %c0_12] : memref<2x1x128xf32, #tpu.memory_space<vmem>>, vector<2x1x128xf32>
    tpu.vector_store %arg5[%c0_10, %c0_11, %c0_12], %15 {strides = array<i32>} : memref<2x1x128xf32, #tpu.memory_space<vmem>>, vector<2x1x128xf32>,
    %17 = vector.shape_cast %3 : vector<128x128xf32> to vector<2x8x8x128xf32>
    %18 = arith.truncf %17 : vector<2x8x8x128xf32> to vector<2x8x8x128xbf16>
    %c0_13 = arith.constant 0 : index
    %c0_14 = arith.constant 0 : index
    %c0_15 = arith.constant 0 : index
    %c0_16 = arith.constant 0 : index
    %19 = vector.load %arg3[%c0_13, %c0_14, %c0_15, %c0_16] : memref<2x8x8x128xbf16, #tpu.memory_space<vmem>>, vector<2x8x8x128xbf16>
    tpu.vector_store %arg3[%c0_13, %c0_14, %c0_15, %c0_16], %18 {strides = array<i32>} : memref<2x8x8x128xbf16, #tpu.memory_space<vmem>>, vector<2x8x8x128xbf16>,
    return
  }
  func.func @transform_0(%arg0: i32) -> (i32, i32, i32) {
    %c0_i32 = arith.constant 0 : i32
    %c0_i32_0 = arith.constant 0 : i32
    %c0_i32_1 = arith.constant 0 : i32
    return %arg0, %c0_i32, %c0_i32_0 : i32, i32, i32
  }
  func.func @transform_1(%arg0: i32) -> (i32, i32) {
    %c0_i32 = arith.constant 0 : i32
    %c0_i32_0 = arith.constant 0 : i32
    %c0_i32_1 = arith.constant 0 : i32
    return %c0_i32, %c0_i32_0 : i32, i32
  }
  func.func @transform_2(%arg0: i32) -> (i32, i32, i32, i32) {
    %c0_i32 = arith.constant 0 : i32
    %c0_i32_0 = arith.constant 0 : i32
    %c0_i32_1 = arith.constant 0 : i32
    %c0_i32_2 = arith.constant 0 : i32
    return %arg0, %c0_i32, %c0_i32_0, %c0_i32_1 : i32, i32, i32, i32
  }
  func.func @transform_3(%arg0: i32) -> (i32, i32, i32) {
    %c0_i32 = arith.constant 0 : i32
    %c0_i32_0 = arith.constant 0 : i32
    %c0_i32_1 = arith.constant 0 : i32
    return %arg0, %c0_i32, %c0_i32_0 : i32, i32, i32
  }
  func.func @transform_4(%arg0: i32) -> (i32, i32, i32) {
    %c0_i32 = arith.constant 0 : i32
    %c0_i32_0 = arith.constant 0 : i32
    %c0_i32_1 = arith.constant 0 : i32
    return %arg0, %c0_i32, %c0_i32_0 : i32, i32, i32
  }
}

module attributes {stable_mosaic.version = 11 : i64} {
  func.func @_head_kernel(%arg0: memref<2x1x128xf32, #tpu.memory_space<vmem>>, %arg1: memref<2x1x128xf32, #tpu.memory_space<vmem>>, %arg2: memref<128x128xbf16, #tpu.memory_space<vmem>>, %arg3: memref<1x128xf32, #tpu.memory_space<vmem>>, %arg4: memref<2x128xf32, #tpu.memory_space<vmem>>) attributes {dimension_semantics = [], scalar_prefetch = 0 : i64, scratch_operands = 0 : i64, tpu.core_type = #tpu.core_type<tc>} {
    %c0 = arith.constant 0 : index
    %c0_0 = arith.constant 0 : index
    %c0_1 = arith.constant 0 : index
    %0 = vector.load %arg0[%c0, %c0_0, %c0_1] : memref<2x1x128xf32, #tpu.memory_space<vmem>>, vector<2x1x128xf32>
    %1 = vector.shape_cast %0 : vector<2x1x128xf32> to vector<2x128xf32>
    %c0_2 = arith.constant 0 : index
    %c0_3 = arith.constant 0 : index
    %c0_4 = arith.constant 0 : index
    %2 = vector.load %arg1[%c0_2, %c0_3, %c0_4] : memref<2x1x128xf32, #tpu.memory_space<vmem>>, vector<2x1x128xf32>
    %3 = vector.shape_cast %2 : vector<2x1x128xf32> to vector<2x128xf32>
    %cst = arith.constant dense<0.000000e+00> : vector<128xf32>
    %4 = vector.multi_reduction <add>, %1, %cst [0] : vector<2x128xf32> to vector<128xf32>
    %5 = vector.shape_cast %4 : vector<128xf32> to vector<1x128xf32>
    %cst_5 = arith.constant 2.000000e+00 : f32
    %6 = vector.broadcast %cst_5 : f32 to vector<1x128xf32>
    %7 = arith.divf %5, %6 : vector<1x128xf32>
    %8 = vector.broadcast %7 : vector<1x128xf32> to vector<2x128xf32>
    %9 = arith.subf %1, %8 : vector<2x128xf32>
    %cst_6 = arith.constant 6.400000e+01 : f32
    %10 = vector.broadcast %cst_6 : f32 to vector<2x128xf32>
    %11 = arith.mulf %10, %9 : vector<2x128xf32>
    %12 = arith.mulf %11, %9 : vector<2x128xf32>
    %13 = arith.addf %3, %12 : vector<2x128xf32>
    %cst_7 = arith.constant dense<0.000000e+00> : vector<128xf32>
    %14 = vector.multi_reduction <add>, %13, %cst_7 [0] : vector<2x128xf32> to vector<128xf32>
    %15 = vector.shape_cast %14 : vector<128xf32> to vector<1x128xf32>
    %cst_8 = arith.constant 1.280000e+02 : f32
    %16 = vector.broadcast %cst_8 : f32 to vector<1x128xf32>
    %17 = arith.divf %15, %16 : vector<1x128xf32>
    %cst_9 = arith.constant 9.99999974E-6 : f32
    %18 = vector.broadcast %cst_9 : f32 to vector<1x128xf32>
    %19 = arith.addf %17, %18 : vector<1x128xf32>
    %20 = math.rsqrt %19 : vector<1x128xf32>
    %21 = vector.broadcast %7 : vector<1x128xf32> to vector<2x128xf32>
    %22 = arith.subf %1, %21 : vector<2x128xf32>
    %23 = vector.broadcast %20 : vector<1x128xf32> to vector<2x128xf32>
    %24 = arith.mulf %22, %23 : vector<2x128xf32>
    %25 = arith.truncf %24 : vector<2x128xf32> to vector<2x128xbf16>
    %c0_10 = arith.constant 0 : index
    %c0_11 = arith.constant 0 : index
    %26 = vector.load %arg2[%c0_10, %c0_11] : memref<128x128xbf16, #tpu.memory_space<vmem>>, vector<128x128xbf16>
    %cst_12 = arith.constant dense<0.000000e+00> : vector<2x128xf32>
    %27 = tpu.matmul %25, %26, %cst_12 {dimension_numbers = #tpu.dot_dimension_numbers<[1], [0], [0], [1], [0, 0, 1, 1], [], []>} : vector<2x128xbf16>, vector<128x128xbf16>, vector<2x128xf32> -> vector<2x128xf32>
    %c0_13 = arith.constant 0 : index
    %c0_14 = arith.constant 0 : index
    %28 = vector.load %arg3[%c0_13, %c0_14] : memref<1x128xf32, #tpu.memory_space<vmem>>, vector<1x128xf32>
    %29 = vector.broadcast %28 : vector<1x128xf32> to vector<2x128xf32>
    %30 = arith.addf %27, %29 : vector<2x128xf32>
    %c0_15 = arith.constant 0 : index
    %c0_16 = arith.constant 0 : index
    %31 = vector.load %arg4[%c0_15, %c0_16] : memref<2x128xf32, #tpu.memory_space<vmem>>, vector<2x128xf32>
    tpu.vector_store %arg4[%c0_15, %c0_16], %30 {strides = array<i32>} : memref<2x128xf32, #tpu.memory_space<vmem>>, vector<2x128xf32>,
    return
  }
}

module attributes {stable_mosaic.version = 11 : i64} {
  func.func @_conv3x3_bn_kernel(%arg0: i32, %arg1: memref<2x8x8x128xbf16, #tpu.memory_space<vmem>>, %arg2: memref<1x128xf32, #tpu.memory_space<vmem>>, %arg3: memref<1x128xf32, #tpu.memory_space<vmem>>, %arg4: memref<9x128x128xbf16, #tpu.memory_space<vmem>>, %arg5: memref<2x1x128xf32, #tpu.memory_space<vmem>>, %arg6: memref<2x1x128xf32, #tpu.memory_space<vmem>>, %arg7: memref<2x10x10x128xbf16, #tpu.memory_space<vmem>>) attributes {dimension_semantics = [#tpu.dimension_semantics<parallel>], iteration_bounds = array<i64: 1>, scalar_prefetch = 0 : i64, scratch_operands = 1 : i64, tpu.core_type = #tpu.core_type<tc>, window_params = [{transform_indices = @transform_0, window_bounds = array<i64: 2, 8, 8, 128>}, {pipeline_mode = #tpu.pipeline_mode<synchronous>, transform_indices = @transform_1, window_bounds = array<i64: 1, 128>}, {pipeline_mode = #tpu.pipeline_mode<synchronous>, transform_indices = @transform_2, window_bounds = array<i64: 1, 128>}, {pipeline_mode = #tpu.pipeline_mode<synchronous>, transform_indices = @transform_3, window_bounds = array<i64: 9, 128, 128>}, {transform_indices = @transform_4, window_bounds = array<i64: 2, 1, 128>}, {transform_indices = @transform_5, window_bounds = array<i64: 2, 1, 128>}]} {
    %cst = arith.constant 0.000000e+00 : bf16
    %0 = vector.broadcast %cst : bf16 to vector<2x10x10x128xbf16>
    %c0 = arith.constant 0 : index
    %c0_0 = arith.constant 0 : index
    %c0_1 = arith.constant 0 : index
    %c0_2 = arith.constant 0 : index
    %1 = vector.load %arg7[%c0, %c0_0, %c0_1, %c0_2] : memref<2x10x10x128xbf16, #tpu.memory_space<vmem>>, vector<2x10x10x128xbf16>
    tpu.vector_store %arg7[%c0, %c0_0, %c0_1, %c0_2], %0 {strides = array<i32>} : memref<2x10x10x128xbf16, #tpu.memory_space<vmem>>, vector<2x10x10x128xbf16>,
    %c0_3 = arith.constant 0 : index
    %c0_4 = arith.constant 0 : index
    %c0_5 = arith.constant 0 : index
    %c0_6 = arith.constant 0 : index
    %2 = vector.load %arg1[%c0_3, %c0_4, %c0_5, %c0_6] : memref<2x8x8x128xbf16, #tpu.memory_space<vmem>>, vector<2x8x8x128xbf16>
    %3 = arith.extf %2 : vector<2x8x8x128xbf16> to vector<2x8x8x128xf32>
    %c0_7 = arith.constant 0 : index
    %c0_8 = arith.constant 0 : index
    %4 = vector.load %arg2[%c0_7, %c0_8] : memref<1x128xf32, #tpu.memory_space<vmem>>, vector<1x128xf32>
    %5 = vector.shape_cast %4 : vector<1x128xf32> to vector<128xf32>
    %6 = vector.shape_cast %5 : vector<128xf32> to vector<1x1x1x128xf32>
    %7 = vector.broadcast %6 : vector<1x1x1x128xf32> to vector<2x8x8x128xf32>
    %8 = arith.mulf %3, %7 : vector<2x8x8x128xf32>
    %c0_9 = arith.constant 0 : index
    %c0_10 = arith.constant 0 : index
    %9 = vector.load %arg3[%c0_9, %c0_10] : memref<1x128xf32, #tpu.memory_space<vmem>>, vector<1x128xf32>
    %10 = vector.shape_cast %9 : vector<1x128xf32> to vector<128xf32>
    %11 = vector.shape_cast %10 : vector<128xf32> to vector<1x1x1x128xf32>
    %12 = vector.broadcast %11 : vector<1x1x1x128xf32> to vector<2x8x8x128xf32>
    %13 = arith.addf %8, %12 : vector<2x8x8x128xf32>
    %cst_11 = arith.constant 0.000000e+00 : f32
    %14 = vector.broadcast %cst_11 : f32 to vector<2x8x8x128xf32>
    %15 = arith.maximumf %13, %14 : vector<2x8x8x128xf32>
    %16 = arith.truncf %15 : vector<2x8x8x128xf32> to vector<2x8x8x128xbf16>
    %c0_12 = arith.constant 0 : index
    %c1 = arith.constant 1 : index
    %c1_13 = arith.constant 1 : index
    %c0_14 = arith.constant 0 : index
    %17 = vector.load %arg7[%c0_12, %c1, %c1_13, %c0_14] : memref<2x10x10x128xbf16, #tpu.memory_space<vmem>>, vector<2x8x8x128xbf16>
    tpu.vector_store %arg7[%c0_12, %c1, %c1_13, %c0_14], %16 {strides = array<i32>} : memref<2x10x10x128xbf16, #tpu.memory_space<vmem>>, vector<2x8x8x128xbf16>,
    %cst_15 = arith.constant 0.000000e+00 : f32
    %18 = vector.broadcast %cst_15 : f32 to vector<128x128xf32>
    %c0_16 = arith.constant 0 : index
    %c0_17 = arith.constant 0 : index
    %c0_18 = arith.constant 0 : index
    %c0_19 = arith.constant 0 : index
    %19 = vector.load %arg7[%c0_16, %c0_17, %c0_18, %c0_19] : memref<2x10x10x128xbf16, #tpu.memory_space<vmem>>, vector<2x8x8x128xbf16>
    %20 = vector.shape_cast %19 : vector<2x8x8x128xbf16> to vector<128x128xbf16>
    %c0_20 = arith.constant 0 : index
    %c0_21 = arith.constant 0 : index
    %c0_22 = arith.constant 0 : index
    %21 = vector.load %arg4[%c0_20, %c0_21, %c0_22] : memref<9x128x128xbf16, #tpu.memory_space<vmem>>, vector<1x128x128xbf16>
    %22 = vector.shape_cast %21 : vector<1x128x128xbf16> to vector<128x128xbf16>
    %cst_23 = arith.constant dense<0.000000e+00> : vector<128x128xf32>
    %23 = tpu.matmul %20, %22, %cst_23 {dimension_numbers = #tpu.dot_dimension_numbers<[1], [0], [0], [1], [0, 0, 1, 1], [], []>} : vector<128x128xbf16>, vector<128x128xbf16>, vector<128x128xf32> -> vector<128x128xf32>
    %24 = arith.addf %18, %23 : vector<128x128xf32>
    %c0_24 = arith.constant 0 : index
    %c0_25 = arith.constant 0 : index
    %c1_26 = arith.constant 1 : index
    %c0_27 = arith.constant 0 : index
    %25 = vector.load %arg7[%c0_24, %c0_25, %c1_26, %c0_27] : memref<2x10x10x128xbf16, #tpu.memory_space<vmem>>, vector<2x8x8x128xbf16>
    %26 = vector.shape_cast %25 : vector<2x8x8x128xbf16> to vector<128x128xbf16>
    %c1_28 = arith.constant 1 : index
    %c0_29 = arith.constant 0 : index
    %c0_30 = arith.constant 0 : index
    %27 = vector.load %arg4[%c1_28, %c0_29, %c0_30] : memref<9x128x128xbf16, #tpu.memory_space<vmem>>, vector<1x128x128xbf16>
    %28 = vector.shape_cast %27 : vector<1x128x128xbf16> to vector<128x128xbf16>
    %cst_31 = arith.constant dense<0.000000e+00> : vector<128x128xf32>
    %29 = tpu.matmul %26, %28, %cst_31 {dimension_numbers = #tpu.dot_dimension_numbers<[1], [0], [0], [1], [0, 0, 1, 1], [], []>} : vector<128x128xbf16>, vector<128x128xbf16>, vector<128x128xf32> -> vector<128x128xf32>
    %30 = arith.addf %24, %29 : vector<128x128xf32>
    %c0_32 = arith.constant 0 : index
    %c0_33 = arith.constant 0 : index
    %c2 = arith.constant 2 : index
    %c0_34 = arith.constant 0 : index
    %31 = vector.load %arg7[%c0_32, %c0_33, %c2, %c0_34] : memref<2x10x10x128xbf16, #tpu.memory_space<vmem>>, vector<2x8x8x128xbf16>
    %32 = vector.shape_cast %31 : vector<2x8x8x128xbf16> to vector<128x128xbf16>
    %c2_35 = arith.constant 2 : index
    %c0_36 = arith.constant 0 : index
    %c0_37 = arith.constant 0 : index
    %33 = vector.load %arg4[%c2_35, %c0_36, %c0_37] : memref<9x128x128xbf16, #tpu.memory_space<vmem>>, vector<1x128x128xbf16>
    %34 = vector.shape_cast %33 : vector<1x128x128xbf16> to vector<128x128xbf16>
    %cst_38 = arith.constant dense<0.000000e+00> : vector<128x128xf32>
    %35 = tpu.matmul %32, %34, %cst_38 {dimension_numbers = #tpu.dot_dimension_numbers<[1], [0], [0], [1], [0, 0, 1, 1], [], []>} : vector<128x128xbf16>, vector<128x128xbf16>, vector<128x128xf32> -> vector<128x128xf32>
    %36 = arith.addf %30, %35 : vector<128x128xf32>
    %c0_39 = arith.constant 0 : index
    %c1_40 = arith.constant 1 : index
    %c0_41 = arith.constant 0 : index
    %c0_42 = arith.constant 0 : index
    %37 = vector.load %arg7[%c0_39, %c1_40, %c0_41, %c0_42] : memref<2x10x10x128xbf16, #tpu.memory_space<vmem>>, vector<2x8x8x128xbf16>
    %38 = vector.shape_cast %37 : vector<2x8x8x128xbf16> to vector<128x128xbf16>
    %c3 = arith.constant 3 : index
    %c0_43 = arith.constant 0 : index
    %c0_44 = arith.constant 0 : index
    %39 = vector.load %arg4[%c3, %c0_43, %c0_44] : memref<9x128x128xbf16, #tpu.memory_space<vmem>>, vector<1x128x128xbf16>
    %40 = vector.shape_cast %39 : vector<1x128x128xbf16> to vector<128x128xbf16>
    %cst_45 = arith.constant dense<0.000000e+00> : vector<128x128xf32>
    %41 = tpu.matmul %38, %40, %cst_45 {dimension_numbers = #tpu.dot_dimension_numbers<[1], [0], [0], [1], [0, 0, 1, 1], [], []>} : vector<128x128xbf16>, vector<128x128xbf16>, vector<128x128xf32> -> vector<128x128xf32>
    %42 = arith.addf %36, %41 : vector<128x128xf32>
    %c0_46 = arith.constant 0 : index
    %c1_47 = arith.constant 1 : index
    %c1_48 = arith.constant 1 : index
    %c0_49 = arith.constant 0 : index
    %43 = vector.load %arg7[%c0_46, %c1_47, %c1_48, %c0_49] : memref<2x10x10x128xbf16, #tpu.memory_space<vmem>>, vector<2x8x8x128xbf16>
    %44 = vector.shape_cast %43 : vector<2x8x8x128xbf16> to vector<128x128xbf16>
    %c4 = arith.constant 4 : index
    %c0_50 = arith.constant 0 : index
    %c0_51 = arith.constant 0 : index
    %45 = vector.load %arg4[%c4, %c0_50, %c0_51] : memref<9x128x128xbf16, #tpu.memory_space<vmem>>, vector<1x128x128xbf16>
    %46 = vector.shape_cast %45 : vector<1x128x128xbf16> to vector<128x128xbf16>
    %cst_52 = arith.constant dense<0.000000e+00> : vector<128x128xf32>
    %47 = tpu.matmul %44, %46, %cst_52 {dimension_numbers = #tpu.dot_dimension_numbers<[1], [0], [0], [1], [0, 0, 1, 1], [], []>} : vector<128x128xbf16>, vector<128x128xbf16>, vector<128x128xf32> -> vector<128x128xf32>
    %48 = arith.addf %42, %47 : vector<128x128xf32>
    %c0_53 = arith.constant 0 : index
    %c1_54 = arith.constant 1 : index
    %c2_55 = arith.constant 2 : index
    %c0_56 = arith.constant 0 : index
    %49 = vector.load %arg7[%c0_53, %c1_54, %c2_55, %c0_56] : memref<2x10x10x128xbf16, #tpu.memory_space<vmem>>, vector<2x8x8x128xbf16>
    %50 = vector.shape_cast %49 : vector<2x8x8x128xbf16> to vector<128x128xbf16>
    %c5 = arith.constant 5 : index
    %c0_57 = arith.constant 0 : index
    %c0_58 = arith.constant 0 : index
    %51 = vector.load %arg4[%c5, %c0_57, %c0_58] : memref<9x128x128xbf16, #tpu.memory_space<vmem>>, vector<1x128x128xbf16>
    %52 = vector.shape_cast %51 : vector<1x128x128xbf16> to vector<128x128xbf16>
    %cst_59 = arith.constant dense<0.000000e+00> : vector<128x128xf32>
    %53 = tpu.matmul %50, %52, %cst_59 {dimension_numbers = #tpu.dot_dimension_numbers<[1], [0], [0], [1], [0, 0, 1, 1], [], []>} : vector<128x128xbf16>, vector<128x128xbf16>, vector<128x128xf32> -> vector<128x128xf32>
    %54 = arith.addf %48, %53 : vector<128x128xf32>
    %c0_60 = arith.constant 0 : index
    %c2_61 = arith.constant 2 : index
    %c0_62 = arith.constant 0 : index
    %c0_63 = arith.constant 0 : index
    %55 = vector.load %arg7[%c0_60, %c2_61, %c0_62, %c0_63] : memref<2x10x10x128xbf16, #tpu.memory_space<vmem>>, vector<2x8x8x128xbf16>
    %56 = vector.shape_cast %55 : vector<2x8x8x128xbf16> to vector<128x128xbf16>
    %c6 = arith.constant 6 : index
    %c0_64 = arith.constant 0 : index
    %c0_65 = arith.constant 0 : index
    %57 = vector.load %arg4[%c6, %c0_64, %c0_65] : memref<9x128x128xbf16, #tpu.memory_space<vmem>>, vector<1x128x128xbf16>
    %58 = vector.shape_cast %57 : vector<1x128x128xbf16> to vector<128x128xbf16>
    %cst_66 = arith.constant dense<0.000000e+00> : vector<128x128xf32>
    %59 = tpu.matmul %56, %58, %cst_66 {dimension_numbers = #tpu.dot_dimension_numbers<[1], [0], [0], [1], [0, 0, 1, 1], [], []>} : vector<128x128xbf16>, vector<128x128xbf16>, vector<128x128xf32> -> vector<128x128xf32>
    %60 = arith.addf %54, %59 : vector<128x128xf32>
    %c0_67 = arith.constant 0 : index
    %c2_68 = arith.constant 2 : index
    %c1_69 = arith.constant 1 : index
    %c0_70 = arith.constant 0 : index
    %61 = vector.load %arg7[%c0_67, %c2_68, %c1_69, %c0_70] : memref<2x10x10x128xbf16, #tpu.memory_space<vmem>>, vector<2x8x8x128xbf16>
    %62 = vector.shape_cast %61 : vector<2x8x8x128xbf16> to vector<128x128xbf16>
    %c7 = arith.constant 7 : index
    %c0_71 = arith.constant 0 : index
    %c0_72 = arith.constant 0 : index
    %63 = vector.load %arg4[%c7, %c0_71, %c0_72] : memref<9x128x128xbf16, #tpu.memory_space<vmem>>, vector<1x128x128xbf16>
    %64 = vector.shape_cast %63 : vector<1x128x128xbf16> to vector<128x128xbf16>
    %cst_73 = arith.constant dense<0.000000e+00> : vector<128x128xf32>
    %65 = tpu.matmul %62, %64, %cst_73 {dimension_numbers = #tpu.dot_dimension_numbers<[1], [0], [0], [1], [0, 0, 1, 1], [], []>} : vector<128x128xbf16>, vector<128x128xbf16>, vector<128x128xf32> -> vector<128x128xf32>
    %66 = arith.addf %60, %65 : vector<128x128xf32>
    %c0_74 = arith.constant 0 : index
    %c2_75 = arith.constant 2 : index
    %c2_76 = arith.constant 2 : index
    %c0_77 = arith.constant 0 : index
    %67 = vector.load %arg7[%c0_74, %c2_75, %c2_76, %c0_77] : memref<2x10x10x128xbf16, #tpu.memory_space<vmem>>, vector<2x8x8x128xbf16>
    %68 = vector.shape_cast %67 : vector<2x8x8x128xbf16> to vector<128x128xbf16>
    %c8 = arith.constant 8 : index
    %c0_78 = arith.constant 0 : index
    %c0_79 = arith.constant 0 : index
    %69 = vector.load %arg4[%c8, %c0_78, %c0_79] : memref<9x128x128xbf16, #tpu.memory_space<vmem>>, vector<1x128x128xbf16>
    %70 = vector.shape_cast %69 : vector<1x128x128xbf16> to vector<128x128xbf16>
    %cst_80 = arith.constant dense<0.000000e+00> : vector<128x128xf32>
    %71 = tpu.matmul %68, %70, %cst_80 {dimension_numbers = #tpu.dot_dimension_numbers<[1], [0], [0], [1], [0, 0, 1, 1], [], []>} : vector<128x128xbf16>, vector<128x128xbf16>, vector<128x128xf32> -> vector<128x128xf32>
    %72 = arith.addf %66, %71 : vector<128x128xf32>
    %73 = vector.shape_cast %72 : vector<128x128xf32> to vector<2x64x128xf32>
    %cst_81 = arith.constant dense<0.000000e+00> : vector<2x128xf32>
    %74 = vector.multi_reduction <add>, %73, %cst_81 [1] : vector<2x64x128xf32> to vector<2x128xf32>
    %cst_82 = arith.constant 6.400000e+01 : f32
    %75 = vector.broadcast %cst_82 : f32 to vector<2x128xf32>
    %76 = arith.divf %74, %75 : vector<2x128xf32>
    %77 = vector.shape_cast %76 : vector<2x128xf32> to vector<2x1x128xf32>
    %78 = vector.broadcast %77 : vector<2x1x128xf32> to vector<2x64x128xf32>
    %79 = arith.subf %73, %78 : vector<2x64x128xf32>
    %80 = vector.shape_cast %76 : vector<2x128xf32> to vector<2x1x128xf32>
    %c0_83 = arith.constant 0 : index
    %c0_84 = arith.constant 0 : index
    %c0_85 = arith.constant 0 : index
    %81 = vector.load %arg5[%c0_83, %c0_84, %c0_85] : memref<2x1x128xf32, #tpu.memory_space<vmem>>, vector<2x1x128xf32>
    tpu.vector_store %arg5[%c0_83, %c0_84, %c0_85], %80 {strides = array<i32>} : memref<2x1x128xf32, #tpu.memory_space<vmem>>, vector<2x1x128xf32>,
    %82 = arith.mulf %79, %79 : vector<2x64x128xf32>
    %cst_86 = arith.constant dense<0.000000e+00> : vector<2x128xf32>
    %83 = vector.multi_reduction <add>, %82, %cst_86 [1] : vector<2x64x128xf32> to vector<2x128xf32>
    %84 = vector.shape_cast %83 : vector<2x128xf32> to vector<2x1x128xf32>
    %c0_87 = arith.constant 0 : index
    %c0_88 = arith.constant 0 : index
    %c0_89 = arith.constant 0 : index
    %85 = vector.load %arg6[%c0_87, %c0_88, %c0_89] : memref<2x1x128xf32, #tpu.memory_space<vmem>>, vector<2x1x128xf32>
    tpu.vector_store %arg6[%c0_87, %c0_88, %c0_89], %84 {strides = array<i32>} : memref<2x1x128xf32, #tpu.memory_space<vmem>>, vector<2x1x128xf32>,
    return
  }
  func.func @transform_0(%arg0: i32) -> (i32, i32, i32, i32) {
    %c0_i32 = arith.constant 0 : i32
    %c0_i32_0 = arith.constant 0 : i32
    %c0_i32_1 = arith.constant 0 : i32
    %c0_i32_2 = arith.constant 0 : i32
    return %arg0, %c0_i32, %c0_i32_0, %c0_i32_1 : i32, i32, i32, i32
  }
  func.func @transform_1(%arg0: i32) -> (i32, i32) {
    %c0_i32 = arith.constant 0 : i32
    %c0_i32_0 = arith.constant 0 : i32
    %c0_i32_1 = arith.constant 0 : i32
    return %c0_i32, %c0_i32_0 : i32, i32
  }
  func.func @transform_2(%arg0: i32) -> (i32, i32) {
    %c0_i32 = arith.constant 0 : i32
    %c0_i32_0 = arith.constant 0 : i32
    %c0_i32_1 = arith.constant 0 : i32
    return %c0_i32, %c0_i32_0 : i32, i32
  }
  func.func @transform_3(%arg0: i32) -> (i32, i32, i32) {
    %c0_i32 = arith.constant 0 : i32
    %c0_i32_0 = arith.constant 0 : i32
    %c0_i32_1 = arith.constant 0 : i32
    %c0_i32_2 = arith.constant 0 : i32
    return %c0_i32, %c0_i32_0, %c0_i32_1 : i32, i32, i32
  }
  func.func @transform_4(%arg0: i32) -> (i32, i32, i32) {
    %c0_i32 = arith.constant 0 : i32
    %c0_i32_0 = arith.constant 0 : i32
    %c0_i32_1 = arith.constant 0 : i32
    return %arg0, %c0_i32, %c0_i32_0 : i32, i32, i32
  }
  func.func @transform_5(%arg0: i32) -> (i32, i32, i32) {
    %c0_i32 = arith.constant 0 : i32
    %c0_i32_0 = arith.constant 0 : i32
    %c0_i32_1 = arith.constant 0 : i32
    return %arg0, %c0_i32, %c0_i32_0 : i32, i32, i32
  }
}

module attributes {stable_mosaic.version = 11 : i64} {
  func.func @_conv3x3_bn_kernel(%arg0: i32, %arg1: memref<2x8x8x128xbf16, #tpu.memory_space<vmem>>, %arg2: memref<1x128xf32, #tpu.memory_space<vmem>>, %arg3: memref<1x128xf32, #tpu.memory_space<vmem>>, %arg4: memref<9x128x128xbf16, #tpu.memory_space<vmem>>, %arg5: memref<2x8x8x128xbf16, #tpu.memory_space<vmem>>, %arg6: memref<2x1x128xf32, #tpu.memory_space<vmem>>, %arg7: memref<2x1x128xf32, #tpu.memory_space<vmem>>, %arg8: memref<2x10x10x128xbf16, #tpu.memory_space<vmem>>) attributes {dimension_semantics = [#tpu.dimension_semantics<parallel>], iteration_bounds = array<i64: 1>, scalar_prefetch = 0 : i64, scratch_operands = 1 : i64, tpu.core_type = #tpu.core_type<tc>, window_params = [{transform_indices = @transform_0, window_bounds = array<i64: 2, 8, 8, 128>}, {pipeline_mode = #tpu.pipeline_mode<synchronous>, transform_indices = @transform_1, window_bounds = array<i64: 1, 128>}, {pipeline_mode = #tpu.pipeline_mode<synchronous>, transform_indices = @transform_2, window_bounds = array<i64: 1, 128>}, {pipeline_mode = #tpu.pipeline_mode<synchronous>, transform_indices = @transform_3, window_bounds = array<i64: 9, 128, 128>}, {transform_indices = @transform_4, window_bounds = array<i64: 2, 8, 8, 128>}, {transform_indices = @transform_5, window_bounds = array<i64: 2, 1, 128>}, {transform_indices = @transform_6, window_bounds = array<i64: 2, 1, 128>}]} {
    %cst = arith.constant 0.000000e+00 : bf16
    %0 = vector.broadcast %cst : bf16 to vector<2x10x10x128xbf16>
    %c0 = arith.constant 0 : index
    %c0_0 = arith.constant 0 : index
    %c0_1 = arith.constant 0 : index
    %c0_2 = arith.constant 0 : index
    %1 = vector.load %arg8[%c0, %c0_0, %c0_1, %c0_2] : memref<2x10x10x128xbf16, #tpu.memory_space<vmem>>, vector<2x10x10x128xbf16>
    tpu.vector_store %arg8[%c0, %c0_0, %c0_1, %c0_2], %0 {strides = array<i32>} : memref<2x10x10x128xbf16, #tpu.memory_space<vmem>>, vector<2x10x10x128xbf16>,
    %c0_3 = arith.constant 0 : index
    %c0_4 = arith.constant 0 : index
    %c0_5 = arith.constant 0 : index
    %c0_6 = arith.constant 0 : index
    %2 = vector.load %arg1[%c0_3, %c0_4, %c0_5, %c0_6] : memref<2x8x8x128xbf16, #tpu.memory_space<vmem>>, vector<2x8x8x128xbf16>
    %3 = arith.extf %2 : vector<2x8x8x128xbf16> to vector<2x8x8x128xf32>
    %c0_7 = arith.constant 0 : index
    %c0_8 = arith.constant 0 : index
    %4 = vector.load %arg2[%c0_7, %c0_8] : memref<1x128xf32, #tpu.memory_space<vmem>>, vector<1x128xf32>
    %5 = vector.shape_cast %4 : vector<1x128xf32> to vector<128xf32>
    %6 = vector.shape_cast %5 : vector<128xf32> to vector<1x1x1x128xf32>
    %7 = vector.broadcast %6 : vector<1x1x1x128xf32> to vector<2x8x8x128xf32>
    %8 = arith.mulf %3, %7 : vector<2x8x8x128xf32>
    %c0_9 = arith.constant 0 : index
    %c0_10 = arith.constant 0 : index
    %9 = vector.load %arg3[%c0_9, %c0_10] : memref<1x128xf32, #tpu.memory_space<vmem>>, vector<1x128xf32>
    %10 = vector.shape_cast %9 : vector<1x128xf32> to vector<128xf32>
    %11 = vector.shape_cast %10 : vector<128xf32> to vector<1x1x1x128xf32>
    %12 = vector.broadcast %11 : vector<1x1x1x128xf32> to vector<2x8x8x128xf32>
    %13 = arith.addf %8, %12 : vector<2x8x8x128xf32>
    %cst_11 = arith.constant 0.000000e+00 : f32
    %14 = vector.broadcast %cst_11 : f32 to vector<2x8x8x128xf32>
    %15 = arith.maximumf %13, %14 : vector<2x8x8x128xf32>
    %16 = arith.truncf %15 : vector<2x8x8x128xf32> to vector<2x8x8x128xbf16>
    %c0_12 = arith.constant 0 : index
    %c1 = arith.constant 1 : index
    %c1_13 = arith.constant 1 : index
    %c0_14 = arith.constant 0 : index
    %17 = vector.load %arg8[%c0_12, %c1, %c1_13, %c0_14] : memref<2x10x10x128xbf16, #tpu.memory_space<vmem>>, vector<2x8x8x128xbf16>
    tpu.vector_store %arg8[%c0_12, %c1, %c1_13, %c0_14], %16 {strides = array<i32>} : memref<2x10x10x128xbf16, #tpu.memory_space<vmem>>, vector<2x8x8x128xbf16>,
    %cst_15 = arith.constant 0.000000e+00 : f32
    %18 = vector.broadcast %cst_15 : f32 to vector<128x128xf32>
    %c0_16 = arith.constant 0 : index
    %c0_17 = arith.constant 0 : index
    %c0_18 = arith.constant 0 : index
    %c0_19 = arith.constant 0 : index
    %19 = vector.load %arg8[%c0_16, %c0_17, %c0_18, %c0_19] : memref<2x10x10x128xbf16, #tpu.memory_space<vmem>>, vector<2x8x8x128xbf16>
    %20 = vector.shape_cast %19 : vector<2x8x8x128xbf16> to vector<128x128xbf16>
    %c0_20 = arith.constant 0 : index
    %c0_21 = arith.constant 0 : index
    %c0_22 = arith.constant 0 : index
    %21 = vector.load %arg4[%c0_20, %c0_21, %c0_22] : memref<9x128x128xbf16, #tpu.memory_space<vmem>>, vector<1x128x128xbf16>
    %22 = vector.shape_cast %21 : vector<1x128x128xbf16> to vector<128x128xbf16>
    %cst_23 = arith.constant dense<0.000000e+00> : vector<128x128xf32>
    %23 = tpu.matmul %20, %22, %cst_23 {dimension_numbers = #tpu.dot_dimension_numbers<[1], [0], [0], [1], [0, 0, 1, 1], [], []>} : vector<128x128xbf16>, vector<128x128xbf16>, vector<128x128xf32> -> vector<128x128xf32>
    %24 = arith.addf %18, %23 : vector<128x128xf32>
    %c0_24 = arith.constant 0 : index
    %c0_25 = arith.constant 0 : index
    %c1_26 = arith.constant 1 : index
    %c0_27 = arith.constant 0 : index
    %25 = vector.load %arg8[%c0_24, %c0_25, %c1_26, %c0_27] : memref<2x10x10x128xbf16, #tpu.memory_space<vmem>>, vector<2x8x8x128xbf16>
    %26 = vector.shape_cast %25 : vector<2x8x8x128xbf16> to vector<128x128xbf16>
    %c1_28 = arith.constant 1 : index
    %c0_29 = arith.constant 0 : index
    %c0_30 = arith.constant 0 : index
    %27 = vector.load %arg4[%c1_28, %c0_29, %c0_30] : memref<9x128x128xbf16, #tpu.memory_space<vmem>>, vector<1x128x128xbf16>
    %28 = vector.shape_cast %27 : vector<1x128x128xbf16> to vector<128x128xbf16>
    %cst_31 = arith.constant dense<0.000000e+00> : vector<128x128xf32>
    %29 = tpu.matmul %26, %28, %cst_31 {dimension_numbers = #tpu.dot_dimension_numbers<[1], [0], [0], [1], [0, 0, 1, 1], [], []>} : vector<128x128xbf16>, vector<128x128xbf16>, vector<128x128xf32> -> vector<128x128xf32>
    %30 = arith.addf %24, %29 : vector<128x128xf32>
    %c0_32 = arith.constant 0 : index
    %c0_33 = arith.constant 0 : index
    %c2 = arith.constant 2 : index
    %c0_34 = arith.constant 0 : index
    %31 = vector.load %arg8[%c0_32, %c0_33, %c2, %c0_34] : memref<2x10x10x128xbf16, #tpu.memory_space<vmem>>, vector<2x8x8x128xbf16>
    %32 = vector.shape_cast %31 : vector<2x8x8x128xbf16> to vector<128x128xbf16>
    %c2_35 = arith.constant 2 : index
    %c0_36 = arith.constant 0 : index
    %c0_37 = arith.constant 0 : index
    %33 = vector.load %arg4[%c2_35, %c0_36, %c0_37] : memref<9x128x128xbf16, #tpu.memory_space<vmem>>, vector<1x128x128xbf16>
    %34 = vector.shape_cast %33 : vector<1x128x128xbf16> to vector<128x128xbf16>
    %cst_38 = arith.constant dense<0.000000e+00> : vector<128x128xf32>
    %35 = tpu.matmul %32, %34, %cst_38 {dimension_numbers = #tpu.dot_dimension_numbers<[1], [0], [0], [1], [0, 0, 1, 1], [], []>} : vector<128x128xbf16>, vector<128x128xbf16>, vector<128x128xf32> -> vector<128x128xf32>
    %36 = arith.addf %30, %35 : vector<128x128xf32>
    %c0_39 = arith.constant 0 : index
    %c1_40 = arith.constant 1 : index
    %c0_41 = arith.constant 0 : index
    %c0_42 = arith.constant 0 : index
    %37 = vector.load %arg8[%c0_39, %c1_40, %c0_41, %c0_42] : memref<2x10x10x128xbf16, #tpu.memory_space<vmem>>, vector<2x8x8x128xbf16>
    %38 = vector.shape_cast %37 : vector<2x8x8x128xbf16> to vector<128x128xbf16>
    %c3 = arith.constant 3 : index
    %c0_43 = arith.constant 0 : index
    %c0_44 = arith.constant 0 : index
    %39 = vector.load %arg4[%c3, %c0_43, %c0_44] : memref<9x128x128xbf16, #tpu.memory_space<vmem>>, vector<1x128x128xbf16>
    %40 = vector.shape_cast %39 : vector<1x128x128xbf16> to vector<128x128xbf16>
    %cst_45 = arith.constant dense<0.000000e+00> : vector<128x128xf32>
    %41 = tpu.matmul %38, %40, %cst_45 {dimension_numbers = #tpu.dot_dimension_numbers<[1], [0], [0], [1], [0, 0, 1, 1], [], []>} : vector<128x128xbf16>, vector<128x128xbf16>, vector<128x128xf32> -> vector<128x128xf32>
    %42 = arith.addf %36, %41 : vector<128x128xf32>
    %c0_46 = arith.constant 0 : index
    %c1_47 = arith.constant 1 : index
    %c1_48 = arith.constant 1 : index
    %c0_49 = arith.constant 0 : index
    %43 = vector.load %arg8[%c0_46, %c1_47, %c1_48, %c0_49] : memref<2x10x10x128xbf16, #tpu.memory_space<vmem>>, vector<2x8x8x128xbf16>
    %44 = vector.shape_cast %43 : vector<2x8x8x128xbf16> to vector<128x128xbf16>
    %c4 = arith.constant 4 : index
    %c0_50 = arith.constant 0 : index
    %c0_51 = arith.constant 0 : index
    %45 = vector.load %arg4[%c4, %c0_50, %c0_51] : memref<9x128x128xbf16, #tpu.memory_space<vmem>>, vector<1x128x128xbf16>
    %46 = vector.shape_cast %45 : vector<1x128x128xbf16> to vector<128x128xbf16>
    %cst_52 = arith.constant dense<0.000000e+00> : vector<128x128xf32>
    %47 = tpu.matmul %44, %46, %cst_52 {dimension_numbers = #tpu.dot_dimension_numbers<[1], [0], [0], [1], [0, 0, 1, 1], [], []>} : vector<128x128xbf16>, vector<128x128xbf16>, vector<128x128xf32> -> vector<128x128xf32>
    %48 = arith.addf %42, %47 : vector<128x128xf32>
    %c0_53 = arith.constant 0 : index
    %c1_54 = arith.constant 1 : index
    %c2_55 = arith.constant 2 : index
    %c0_56 = arith.constant 0 : index
    %49 = vector.load %arg8[%c0_53, %c1_54, %c2_55, %c0_56] : memref<2x10x10x128xbf16, #tpu.memory_space<vmem>>, vector<2x8x8x128xbf16>
    %50 = vector.shape_cast %49 : vector<2x8x8x128xbf16> to vector<128x128xbf16>
    %c5 = arith.constant 5 : index
    %c0_57 = arith.constant 0 : index
    %c0_58 = arith.constant 0 : index
    %51 = vector.load %arg4[%c5, %c0_57, %c0_58] : memref<9x128x128xbf16, #tpu.memory_space<vmem>>, vector<1x128x128xbf16>
    %52 = vector.shape_cast %51 : vector<1x128x128xbf16> to vector<128x128xbf16>
    %cst_59 = arith.constant dense<0.000000e+00> : vector<128x128xf32>
    %53 = tpu.matmul %50, %52, %cst_59 {dimension_numbers = #tpu.dot_dimension_numbers<[1], [0], [0], [1], [0, 0, 1, 1], [], []>} : vector<128x128xbf16>, vector<128x128xbf16>, vector<128x128xf32> -> vector<128x128xf32>
    %54 = arith.addf %48, %53 : vector<128x128xf32>
    %c0_60 = arith.constant 0 : index
    %c2_61 = arith.constant 2 : index
    %c0_62 = arith.constant 0 : index
    %c0_63 = arith.constant 0 : index
    %55 = vector.load %arg8[%c0_60, %c2_61, %c0_62, %c0_63] : memref<2x10x10x128xbf16, #tpu.memory_space<vmem>>, vector<2x8x8x128xbf16>
    %56 = vector.shape_cast %55 : vector<2x8x8x128xbf16> to vector<128x128xbf16>
    %c6 = arith.constant 6 : index
    %c0_64 = arith.constant 0 : index
    %c0_65 = arith.constant 0 : index
    %57 = vector.load %arg4[%c6, %c0_64, %c0_65] : memref<9x128x128xbf16, #tpu.memory_space<vmem>>, vector<1x128x128xbf16>
    %58 = vector.shape_cast %57 : vector<1x128x128xbf16> to vector<128x128xbf16>
    %cst_66 = arith.constant dense<0.000000e+00> : vector<128x128xf32>
    %59 = tpu.matmul %56, %58, %cst_66 {dimension_numbers = #tpu.dot_dimension_numbers<[1], [0], [0], [1], [0, 0, 1, 1], [], []>} : vector<128x128xbf16>, vector<128x128xbf16>, vector<128x128xf32> -> vector<128x128xf32>
    %60 = arith.addf %54, %59 : vector<128x128xf32>
    %c0_67 = arith.constant 0 : index
    %c2_68 = arith.constant 2 : index
    %c1_69 = arith.constant 1 : index
    %c0_70 = arith.constant 0 : index
    %61 = vector.load %arg8[%c0_67, %c2_68, %c1_69, %c0_70] : memref<2x10x10x128xbf16, #tpu.memory_space<vmem>>, vector<2x8x8x128xbf16>
    %62 = vector.shape_cast %61 : vector<2x8x8x128xbf16> to vector<128x128xbf16>
    %c7 = arith.constant 7 : index
    %c0_71 = arith.constant 0 : index
    %c0_72 = arith.constant 0 : index
    %63 = vector.load %arg4[%c7, %c0_71, %c0_72] : memref<9x128x128xbf16, #tpu.memory_space<vmem>>, vector<1x128x128xbf16>
    %64 = vector.shape_cast %63 : vector<1x128x128xbf16> to vector<128x128xbf16>
    %cst_73 = arith.constant dense<0.000000e+00> : vector<128x128xf32>
    %65 = tpu.matmul %62, %64, %cst_73 {dimension_numbers = #tpu.dot_dimension_numbers<[1], [0], [0], [1], [0, 0, 1, 1], [], []>} : vector<128x128xbf16>, vector<128x128xbf16>, vector<128x128xf32> -> vector<128x128xf32>
    %66 = arith.addf %60, %65 : vector<128x128xf32>
    %c0_74 = arith.constant 0 : index
    %c2_75 = arith.constant 2 : index
    %c2_76 = arith.constant 2 : index
    %c0_77 = arith.constant 0 : index
    %67 = vector.load %arg8[%c0_74, %c2_75, %c2_76, %c0_77] : memref<2x10x10x128xbf16, #tpu.memory_space<vmem>>, vector<2x8x8x128xbf16>
    %68 = vector.shape_cast %67 : vector<2x8x8x128xbf16> to vector<128x128xbf16>
    %c8 = arith.constant 8 : index
    %c0_78 = arith.constant 0 : index
    %c0_79 = arith.constant 0 : index
    %69 = vector.load %arg4[%c8, %c0_78, %c0_79] : memref<9x128x128xbf16, #tpu.memory_space<vmem>>, vector<1x128x128xbf16>
    %70 = vector.shape_cast %69 : vector<1x128x128xbf16> to vector<128x128xbf16>
    %cst_80 = arith.constant dense<0.000000e+00> : vector<128x128xf32>
    %71 = tpu.matmul %68, %70, %cst_80 {dimension_numbers = #tpu.dot_dimension_numbers<[1], [0], [0], [1], [0, 0, 1, 1], [], []>} : vector<128x128xbf16>, vector<128x128xbf16>, vector<128x128xf32> -> vector<128x128xf32>
    %72 = arith.addf %66, %71 : vector<128x128xf32>
    %73 = vector.shape_cast %72 : vector<128x128xf32> to vector<2x64x128xf32>
    %cst_81 = arith.constant dense<0.000000e+00> : vector<2x128xf32>
    %74 = vector.multi_reduction <add>, %73, %cst_81 [1] : vector<2x64x128xf32> to vector<2x128xf32>
    %cst_82 = arith.constant 6.400000e+01 : f32
    %75 = vector.broadcast %cst_82 : f32 to vector<2x128xf32>
    %76 = arith.divf %74, %75 : vector<2x128xf32>
    %77 = vector.shape_cast %76 : vector<2x128xf32> to vector<2x1x128xf32>
    %78 = vector.broadcast %77 : vector<2x1x128xf32> to vector<2x64x128xf32>
    %79 = arith.subf %73, %78 : vector<2x64x128xf32>
    %80 = vector.shape_cast %76 : vector<2x128xf32> to vector<2x1x128xf32>
    %c0_83 = arith.constant 0 : index
    %c0_84 = arith.constant 0 : index
    %c0_85 = arith.constant 0 : index
    %81 = vector.load %arg6[%c0_83, %c0_84, %c0_85] : memref<2x1x128xf32, #tpu.memory_space<vmem>>, vector<2x1x128xf32>
    tpu.vector_store %arg6[%c0_83, %c0_84, %c0_85], %80 {strides = array<i32>} : memref<2x1x128xf32, #tpu.memory_space<vmem>>, vector<2x1x128xf32>,
    %82 = arith.mulf %79, %79 : vector<2x64x128xf32>
    %cst_86 = arith.constant dense<0.000000e+00> : vector<2x128xf32>
    %83 = vector.multi_reduction <add>, %82, %cst_86 [1] : vector<2x64x128xf32> to vector<2x128xf32>
    %84 = vector.shape_cast %83 : vector<2x128xf32> to vector<2x1x128xf32>
    %c0_87 = arith.constant 0 : index
    %c0_88 = arith.constant 0 : index
    %c0_89 = arith.constant 0 : index
    %85 = vector.load %arg7[%c0_87, %c0_88, %c0_89] : memref<2x1x128xf32, #tpu.memory_space<vmem>>, vector<2x1x128xf32>
    tpu.vector_store %arg7[%c0_87, %c0_88, %c0_89], %84 {strides = array<i32>} : memref<2x1x128xf32, #tpu.memory_space<vmem>>, vector<2x1x128xf32>,
    %86 = vector.shape_cast %72 : vector<128x128xf32> to vector<2x8x8x128xf32>
    %87 = arith.truncf %86 : vector<2x8x8x128xf32> to vector<2x8x8x128xbf16>
    %c0_90 = arith.constant 0 : index
    %c0_91 = arith.constant 0 : index
    %c0_92 = arith.constant 0 : index
    %c0_93 = arith.constant 0 : index
    %88 = vector.load %arg5[%c0_90, %c0_91, %c0_92, %c0_93] : memref<2x8x8x128xbf16, #tpu.memory_space<vmem>>, vector<2x8x8x128xbf16>
    tpu.vector_store %arg5[%c0_90, %c0_91, %c0_92, %c0_93], %87 {strides = array<i32>} : memref<2x8x8x128xbf16, #tpu.memory_space<vmem>>, vector<2x8x8x128xbf16>,
    return
  }
  func.func @transform_0(%arg0: i32) -> (i32, i32, i32, i32) {
    %c0_i32 = arith.constant 0 : i32
    %c0_i32_0 = arith.constant 0 : i32
    %c0_i32_1 = arith.constant 0 : i32
    %c0_i32_2 = arith.constant 0 : i32
    return %arg0, %c0_i32, %c0_i32_0, %c0_i32_1 : i32, i32, i32, i32
  }
  func.func @transform_1(%arg0: i32) -> (i32, i32) {
    %c0_i32 = arith.constant 0 : i32
    %c0_i32_0 = arith.constant 0 : i32
    %c0_i32_1 = arith.constant 0 : i32
    return %c0_i32, %c0_i32_0 : i32, i32
  }
  func.func @transform_2(%arg0: i32) -> (i32, i32) {
    %c0_i32 = arith.constant 0 : i32
    %c0_i32_0 = arith.constant 0 : i32
    %c0_i32_1 = arith.constant 0 : i32
    return %c0_i32, %c0_i32_0 : i32, i32
  }
  func.func @transform_3(%arg0: i32) -> (i32, i32, i32) {
    %c0_i32 = arith.constant 0 : i32
    %c0_i32_0 = arith.constant 0 : i32
    %c0_i32_1 = arith.constant 0 : i32
    %c0_i32_2 = arith.constant 0 : i32
    return %c0_i32, %c0_i32_0, %c0_i32_1 : i32, i32, i32
  }
  func.func @transform_4(%arg0: i32) -> (i32, i32, i32, i32) {
    %c0_i32 = arith.constant 0 : i32
    %c0_i32_0 = arith.constant 0 : i32
    %c0_i32_1 = arith.constant 0 : i32
    %c0_i32_2 = arith.constant 0 : i32
    return %arg0, %c0_i32, %c0_i32_0, %c0_i32_1 : i32, i32, i32, i32
  }
  func.func @transform_5(%arg0: i32) -> (i32, i32, i32) {
    %c0_i32 = arith.constant 0 : i32
    %c0_i32_0 = arith.constant 0 : i32
    %c0_i32_1 = arith.constant 0 : i32
    return %arg0, %c0_i32, %c0_i32_0 : i32, i32, i32
  }
  func.func @transform_6(%arg0: i32) -> (i32, i32, i32) {
    %c0_i32 = arith.constant 0 : i32
    %c0_i32_0 = arith.constant 0 : i32
    %c0_i32_1 = arith.constant 0 : i32
    return %arg0, %c0_i32, %c0_i32_0 : i32, i32, i32
  }
}

</mosaic_0001>

<bundles_post_ra>
// kernel: cnn_forward.7
= control target key start
LH: loop header
LB: loop body
LE: loop exit
PB: predicated region body
PF: predicated region fallthrough
CT: control target
= control target key end

     0   :  { %v361_v1 = vmov 0.0   ;;  %vm362_vm0 = vmmov 0   ;;  %v29_v4 = vlaneseq  ;;  %v363_v8 = vmov 1966171168   ;;  %s443_s0 = inlined_call_operand.vmem [shape: f32[2,1,128], index: 0, kind: input, shape index: {}]   ;;  %s444_s1 = inlined_call_operand.vmem [shape: f32[2,1,128], index: 1, kind: input, shape index: {}]   ;;  %s445_s2 = inlined_call_operand.vmem [shape: bf16[128,128], index: 2, kind: input, shape index: {}]   ;;  %s446_s3 = inlined_call_operand.vmem [shape: f32[1,128], index: 3, kind: input, shape index: {}]   ;;  %s447_s4 = inlined_call_operand.hbm [shape: f32[2,128], index: 4, kind: output, shape index: {}]  }
   0x1   :  { %v327_v0 = vld [vmem:[%s445_s2] sm:$0xff]   ;;  %303 = vmatprep.subr.bf16.mxu0 %v361_v1  ;;  %v328_v2 = vld [vmem:[%s445_s2 + $0x8] sm:$0xff]   ;;  %319 = vmatprep.mubr.msk.bf16.mxu0 %vm362_vm0, %v361_v1  ;;  %v329_v3 = vld [vmem:[%s445_s2 + $0x10] sm:$0xff]   ;;  %v27_v9 = vunpack.c.l.s4 %v363_v8 }
   0x2   :  { %304 = vmatpush3.bf16.msra.mxu0 %v327_v0  ;;  %v19_v5 = vld [vmem:[%s443_s0] sm:$0x1]  ;;  %v20_v6 = vld [vmem:[%s443_s0 + $0x1] sm:$0x1]  ;;  %v330_v7 = vld [vmem:[%s445_s2 + $0x18] sm:$0xff]   ;;  %v30_v10 = vshrl.u32 %v29_v4, 7 }
   0x3   :  { %305 = vmatprep.subr.bf16.mxu0 %v361_v1 }
   0x6   :  { %306 = vmatpush3.bf16.msra.mxu0 %v328_v2 }
   0x7   :  { %307 = vmatprep.subr.bf16.mxu0 %v361_v1 }
   0xa   :  { %308 = vmatpush3.bf16.msra.mxu0 %v329_v3 }
   0xb   :  { %9 = vsyncpa [#allocation3], 0  ;;  %309 = vmatprep.subr.bf16.mxu0 %v361_v1  ;;  %v25_v11 = vcombine.low %v19_v5, %v20_v6  ;;  %v28_v12 = vunpack.c.0.s8 %v27_v9  ;;  %v331_v13 = vld [vmem:[%s445_s2 + $0x20] sm:$0xff]   ;;  %vm41_vm1 = vcmask 1041408   ;;  %v332_v16 = vld [vmem:[%s445_s2 + $0x28] sm:$0xff]   ;;  %v53_v27 = vsub.s32 0, %v30_v10 }
   0xc   :  { %v333_v20 = vld [vmem:[%s445_s2 + $0x30] sm:$0xff]   ;;  %v334_v23 = vld [vmem:[%s445_s2 + $0x38] sm:$0xff]   ;;  %v21_v37 = vld [vmem:[%s444_s1] sm:$0x1]  ;;  %vm178_vm2 = vcmask 1041409   ;;  %s364_s12 = smov [#allocation2]  }
   0xd   :  { %v31_v14 = vsub.s32 %v28_v12, %v30_v10  ;;  %v22_v40 = vld [vmem:[%s444_s1 + $0x1] sm:$0x1]  ;;  %s277_s13 = sshll.u32 %s364_s12, 4  ;;  %s278_s13 = int_to_ptr.vmem [resolvable:$true] %s277_s13 }
   0xe   :  { %310 = vmatpush3.bf16.msra.mxu0 %v330_v7  ;;  %v285_v7 = vld [vmem:[%s446_s3] ss:$0 sm:$0xff]  ;;  %s337_s14 = scalar_lea.vmem %s278_s13, 32  ;;  %p342_p1 = scmp.lt.s32.totalorder %s278_s13, %s278_s13 }
   0xf   :  { %311 = vmatprep.subr.bf16.mxu0 %v361_v1  ;;  %v32_v15 = vrot.slane %v25_v11, %v31_v14  ;;  %p338_p0 = scmp.ne.s32.totalorder %s278_s13, %s337_s14  ;;  %p343_p2 = scmp.lt.s32.totalorder %s337_s14, %s337_s14 }
  0x11   :  { %v39_v17 = vrot.slane %v32_v15, %v31_v14  ;;  %p344_p3 = por %p343_p2, %p342_p1 }
  0x12   :  { %312 = vmatpush3.bf16.msra.mxu0 %v331_v13 }
  0x13   :  { %313 = vmatprep.subr.bf16.mxu0 %v361_v1  ;;  %v42_v18 = vsel %vm41_vm1, %v39_v17, 0.0  ;;  %p345_p4 = pnand %p344_p3, %p338_p0 }
  0x14   :  { %v43_v19 = vrot.slane %v42_v18, 4 }
  0x16   :  { %314 = vmatpush3.bf16.msra.mxu0 %v332_v16  ;;  %v44_v21 = vadd.f32 %v43_v19, %v42_v18 }
  0x17   :  { %315 = vmatprep.subr.bf16.mxu0 %v361_v1 }
  0x18   :  { %v45_v22 = vrot.slane %v44_v21, 2 }
  0x1a   :  { %316 = vmatpush3.bf16.msra.mxu0 %v333_v20  ;;  %v46_v24 = vadd.f32 %v45_v22, %v44_v21 }
  0x1b   :  { %317 = vmatprep.subr.bf16.mxu0 %v361_v1 }
  0x1c   :  { %v47_v25 = vrot.slane %v46_v24, 1 }
  0x1e   :  { %318 = vmatpush3.bf16.msra.mxu0 %v334_v23  ;;  %v48_v26 = vadd.f32 %v47_v25, %v46_v24 }
  0x20   :  { %v50_v28 = vmul.f32 0.5, %v48_v26 }
  0x22   :  { %v54_v29 = vrot.slane %v50_v28, %v53_v27 }
  0x24   :  { %v62_v30 = vrot.slane %v54_v29, %v31_v14 }
  0x26   :  { %v63_v31 = vcombine.high %v62_v30, %v62_v30  ;;  %v70_v32 = vrot.slane %v62_v30, %v31_v14 }
  0x28   :  { %v77_v33 = vrot.slane %v63_v31, %v31_v14  ;;  %v80_v34 = vsub.f32 %v19_v5, %v70_v32 }
  0x2a   :  { %v81_v35 = vsub.f32 %v20_v6, %v77_v33  ;;  %v82_v36 = vmul.f32 64.0, %v80_v34 }
  0x2c   :  { %v83_v38 = vmul.f32 64.0, %v81_v35  ;;  %v84_v39 = vmul.f32 %v82_v36, %v80_v34 }
  0x2e   :  { %v85_v41 = vmul.f32 %v83_v38, %v81_v35  ;;  %v86_v42 = vadd.f32 %v84_v39, %v21_v37 }
  0x30   :  { %v87_v43 = vadd.f32 %v85_v41, %v22_v40 }
  0x32   :  { %v90_v44 = vcombine.low %v86_v42, %v87_v43 }
  0x34   :  { %v97_v45 = vrot.slane %v90_v44, %v31_v14 }
  0x36   :  { %v104_v46 = vrot.slane %v97_v45, %v31_v14 }
  0x38   :  { %v106_v47 = vsel %vm41_vm1, %v104_v46, 0.0 }
  0x39   :  { %v107_v48 = vrot.slane %v106_v47, 4 }
  0x3b   :  { %v108_v49 = vadd.f32 %v107_v48, %v106_v47 }
  0x3d   :  { %v109_v50 = vrot.slane %v108_v49, 2 }
  0x3f   :  { %v110_v51 = vadd.f32 %v109_v50, %v108_v49 }
  0x41   :  { %v111_v52 = vrot.slane %v110_v51, 1 }
  0x43   :  { %v112_v53 = vadd.f32 %v111_v52, %v110_v51 }
  0x45   :  { %v114_v54 = vmul.f32 0.0078125, %v112_v53 }
  0x47   :  { %v115_v55 = vadd.f32 1e-05, %v114_v54 }
  0x49   :  { %335 = vrsqrt.f32 %v115_v55 }
  0x53   :  { %v336_v56 = vpop.eup %335 }
  0x54   :  { %v120_v57 = vrot.slane %v336_v56, %v53_v27 }
  0x56   :  { %v128_v58 = vrot.slane %v120_v57, %v31_v14 }
  0x58   :  { %v129_v59 = vcombine.high %v128_v58, %v128_v58  ;;  %v136_v60 = vrot.slane %v128_v58, %v31_v14 }
  0x5a   :  { %v143_v61 = vrot.slane %v129_v59, %v31_v14  ;;  %v146_v62 = vmul.f32 %v136_v60, %v80_v34 }
  0x5c   :  { %v147_v63 = vmul.f32 %v143_v61, %v81_v35  ;;  %v148_v0 = vpack.c.bf16 %v146_v62, %v146_v62 }
  0x5e   :  { %v149_v1 = vpack.c.bf16 %v147_v63, %v147_v63  ;;  %v175_v2 = vunpack.c.l.b16 %v148_v0 }
  0x60   :  { %v176_v3 = vunpack.c.l.b16 %v149_v1 }
  0x62   :  { %v177_v4 = vrot.slane %v176_v3, 7 }
  0x64   :  { %v179_v5 = vsel %vm178_vm2, %v177_v4, %v175_v2 }
  0x65   :  { %v180_v6 = vpack.c.b16 %v179_v5, %v179_v5 }
  0x67   :  { %320 = vmatmul.mubr.bf16.vlgmr.msra.gmra.mrb[0].mxu0 %v180_v6 }
 0x13a   :  { %v264_v8 = vpop.f32.mrb[0].mxu0 }
 0x13b   :  { %v265_v9 = vadd.f32 %v285_v7, %v264_v8  ;;  %v321_v10 = vpop.f32.mrb[1].mxu0 }
 0x13c   :  { %v267_v11 = vpop.f32.mrb[2].mxu0 }
 0x13d   :  { %270 = vst [vmem:[#allocation2] sm:$0x3] %v265_v9  ;;  %v322_v12 = vpop.f32.mrb[3].mxu0 }
 0x13e   :  { %348 = shalt.err (!%p345_p4)
}
 0x13f   :  { %s349_s3 = scalar_lea.hbm %s447_s4, 32 }
 0x140   :  { %p350_p5 = scmp.ne.s32.totalorder %s447_s4, %s349_s3  ;;  %p353_p6 = scmp.lt.u32.totalorder %s349_s3, %s447_s4 }
 0x142   :  { %p355_p7 = pnand %p353_p6, %p350_p5 }
 0x144   :  { %358 = shalt.err (!%p355_p7)
}
 0x145   :  { %280 = dma.vmem_to_hbm [thread:$0]  %s278_s13, 32, %s447_s4, [#allocation3]  }
 0x146   :  { %359 = dma.done.wait [#allocation3], 32  }
 0x147   :  { %360 = vsyncadd [#allocation3], 4294967264 }
 0x148   :  { %284 = vsyncpa [#allocation3], 1 }

// kernel: cnn_forward.4
= control target key start
LH: loop header
LB: loop body
LE: loop exit
PB: predicated region body
PF: predicated region fallthrough
CT: control target
= control target key end

     0   :  { %s872_s1 = inlined_call_operand.vmem [shape: bf16[256,128], index: 1, kind: input, shape index: {}]   ;;  %s873_s0 = inlined_call_operand.vmem [shape: bf16[2,64,256], index: 0, kind: input, shape index: {}]   ;;  %s874_s2 = inlined_call_operand.vmem [shape: bf16[2,8,8,128], index: 2, kind: output, shape index: {0}]   ;;  %s875_s3 = inlined_call_operand.vmem [shape: f32[2,1,128], index: 3, kind: output, shape index: {1}]   ;;  %s876_s4 = inlined_call_operand.vmem [shape: f32[2,1,128], index: 4, kind: output, shape index: {2}]  }
   0x1   :  { %v630_v0 = vld [vmem:[%s872_s1 + $0x40] sm:$0xff]   ;;  %v632_v2 = vld [vmem:[%s872_s1 + $0x48] sm:$0xff]   ;;  %v634_v4 = vld [vmem:[%s872_s1 + $0x50] sm:$0xff]  }
   0x2   :  { %v631_v1 = vld [vmem:[%s872_s1] sm:$0xff]   ;;  %550 = vmatprep.subr.bf16.mxu0 %v630_v0  ;;  %614 = vmatprep.subr.bf16.mxu1 %v630_v0  ;;  %v633_v3 = vld [vmem:[%s872_s1 + $0x8] sm:$0xff]   ;;  %v635_v5 = vld [vmem:[%s872_s1 + $0x10] sm:$0xff]  }
   0x3   :  { %551 = vmatpush3.bf16.msra.mxu0 %v631_v1  ;;  %622 = vmatpush3.bf16.msra.mxu1 %v631_v1  ;;  %v636_v6 = vld [vmem:[%s872_s1 + $0x58] sm:$0xff]   ;;  %v638_v8 = vld [vmem:[%s872_s1 + $0x60] sm:$0xff]   ;;  %v640_v10 = vld [vmem:[%s872_s1 + $0x68] sm:$0xff]  }
   0x4   :  { %552 = vmatprep.subr.bf16.mxu0 %v632_v2  ;;  %615 = vmatprep.subr.bf16.mxu1 %v632_v2  ;;  %v637_v7 = vld [vmem:[%s872_s1 + $0x18] sm:$0xff]   ;;  %v639_v9 = vld [vmem:[%s872_s1 + $0x20] sm:$0xff]   ;;  %v641_v13 = vld [vmem:[%s872_s1 + $0x28] sm:$0xff]  }
   0x5   :  { %v648_v11 = vld [vmem:[%s873_s0 + $0x4] ss:$8 sps:$4 sm:$0xff]   ;;  %v642_v14 = vld [vmem:[%s872_s1 + $0x70] sm:$0xff]   ;;  %v644_v16 = vld [vmem:[%s872_s1 + $0x78] sm:$0xff]  }
   0x6   :  { %v651_v12 = vld [vmem:[%s873_s0 + $0x44] ss:$8 sps:$4 sm:$0xff]   ;;  %271 = vmatprep.mubr.bf16.mxu0 %v648_v11  ;;  %v643_v15 = vld [vmem:[%s872_s1 + $0x30] sm:$0xff]   ;;  %v645_v17 = vld [vmem:[%s872_s1 + $0x38] sm:$0xff]  }
   0x7   :  { %553 = vmatpush3.bf16.msra.mxu0 %v633_v3  ;;  %623 = vmatpush3.bf16.msra.mxu1 %v633_v3  ;;  %v646_v18 = vld [vmem:[%s873_s0] ss:$8 sps:$4 sm:$0xff]   ;;  %v652_v20 = vld [vmem:[%s873_s0 + $0x14] ss:$8 sps:$4 sm:$0xff]   ;;  %v656_v22 = vld [vmem:[%s873_s0 + $0x10] ss:$8 sps:$4 sm:$0xff]  }
   0x8   :  { %554 = vmatprep.subr.bf16.mxu0 %v634_v4  ;;  %616 = vmatprep.subr.bf16.mxu1 %v634_v4  ;;  %v649_v19 = vld [vmem:[%s873_s0 + $0x40] ss:$8 sps:$4 sm:$0xff]   ;;  %v654_v21 = vld [vmem:[%s873_s0 + $0x54] ss:$8 sps:$4 sm:$0xff]   ;;  %v657_v23 = vld [vmem:[%s873_s0 + $0x50] ss:$8 sps:$4 sm:$0xff]  }
   0x9   :  { %303 = vmatprep.mubr.bf16.mxu1 %v651_v12  ;;  %v658_v24 = vld [vmem:[%s873_s0 + $0x24] ss:$8 sps:$4 sm:$0xff]   ;;  %v662_v26 = vld [vmem:[%s873_s0 + $0x20] ss:$8 sps:$4 sm:$0xff]   ;;  %v664_v28 = vld [vmem:[%s873_s0 + $0x34] ss:$8 sps:$4 sm:$0xff]  }
   0xa   :  { %v660_v25 = vld [vmem:[%s873_s0 + $0x64] ss:$8 sps:$4 sm:$0xff]   ;;  %v663_v27 = vld [vmem:[%s873_s0 + $0x60] ss:$8 sps:$4 sm:$0xff]   ;;  %v666_v29 = vld [vmem:[%s873_s0 + $0x74] ss:$8 sps:$4 sm:$0xff]  }
   0xb   :  { %555 = vmatpush3.bf16.msra.mxu0 %v635_v5  ;;  %624 = vmatpush3.bf16.msra.mxu1 %v635_v5  ;;  %v668_v30 = vld [vmem:[%s873_s0 + $0x30] ss:$8 sps:$4 sm:$0xff]  }
   0xc   :  { %556 = vmatprep.subr.bf16.mxu0 %v636_v6  ;;  %617 = vmatprep.subr.bf16.mxu1 %v636_v6  ;;  %v669_v31 = vld [vmem:[%s873_s0 + $0x70] ss:$8 sps:$4 sm:$0xff]  }
   0xf   :  { %557 = vmatpush3.bf16.msra.mxu0 %v637_v7  ;;  %625 = vmatpush3.bf16.msra.mxu1 %v637_v7 }
  0x10   :  { %558 = vmatprep.subr.bf16.mxu0 %v638_v8  ;;  %618 = vmatprep.subr.bf16.mxu1 %v638_v8 }
  0x13   :  { %559 = vmatpush3.bf16.msra.mxu0 %v639_v9  ;;  %626 = vmatpush3.bf16.msra.mxu1 %v639_v9 }
  0x14   :  { %560 = vmatprep.subr.bf16.mxu0 %v640_v10  ;;  %619 = vmatprep.subr.bf16.mxu1 %v640_v10 }
  0x17   :  { %561 = vmatpush3.bf16.msra.mxu0 %v641_v13  ;;  %627 = vmatpush3.bf16.msra.mxu1 %v641_v13 }
  0x18   :  { %562 = vmatprep.subr.bf16.mxu0 %v642_v14  ;;  %620 = vmatprep.subr.bf16.mxu1 %v642_v14 }
  0x1b   :  { %563 = vmatpush3.bf16.msra.mxu0 %v643_v15  ;;  %628 = vmatpush3.bf16.msra.mxu1 %v643_v15 }
  0x1c   :  { %564 = vmatprep.subr.bf16.mxu0 %v644_v16  ;;  %621 = vmatprep.subr.bf16.mxu1 %v644_v16 }
  0x1f   :  { %565 = vmatpush3.bf16.msra.mxu0 %v645_v17  ;;  %629 = vmatpush3.bf16.msra.mxu1 %v645_v17 }
  0x22   :  { %272 = vmatmul.mubr.bf16.vlgmr.msra.gmra.mrb[0].mxu0 %v646_v18  ;;  %304 = vmatmul.mubr.bf16.vlgmr.msra.gmra.mrb[0].mxu1 %v649_v19 }
  0x23   :  { %279 = vmatprep.mubr.bf16.mxu0 %v652_v20  ;;  %311 = vmatprep.mubr.bf16.mxu1 %v654_v21 }
  0x2a   :  { %280 = vmatmul.mubr.bf16.gmra.mrb[4].mxu0 %v656_v22  ;;  %312 = vmatmul.mubr.bf16.gmra.mrb[4].mxu1 %v657_v23 }
  0x2b   :  { %287 = vmatprep.mubr.bf16.mxu0 %v658_v24  ;;  %319 = vmatprep.mubr.bf16.mxu1 %v660_v25 }
  0x32   :  { %288 = vmatmul.mubr.bf16.gmra.mrb[8].mxu0 %v662_v26  ;;  %320 = vmatmul.mubr.bf16.gmra.mrb[8].mxu1 %v663_v27 }
  0x33   :  { %295 = vmatprep.mubr.bf16.mxu0 %v664_v28  ;;  %327 = vmatprep.mubr.bf16.mxu1 %v666_v29 }
  0x3a   :  { %296 = vmatmul.mubr.bf16.gmra.mrb[12].mxu0 %v668_v30  ;;  %328 = vmatmul.mubr.bf16.gmra.mrb[12].mxu1 %v669_v31 }
  0xf5   :  { %v566_v32 = vpop.f32.mrb[0].mxu0  ;;  %v590_v33 = vpop.f32.mrb[0].mxu1 }
  0xf6   :  { %v567_v34 = vpop.f32.mrb[1].mxu0  ;;  %v591_v35 = vpop.f32.mrb[1].mxu1 }
  0xf7   :  { %v791_v36 = vadd.f32 %v567_v34, %v566_v32  ;;  %v793_v37 = vadd.f32 %v591_v35, %v590_v33  ;;  %v569_v38 = vpop.f32.mrb[2].mxu0  ;;  %v593_v39 = vpop.f32.mrb[2].mxu1 }
  0xf8   :  { %v570_v40 = vpop.f32.mrb[3].mxu0  ;;  %v594_v41 = vpop.f32.mrb[3].mxu1 }
  0xf9   :  { %v795_v42 = vadd.f32 %v570_v40, %v569_v38  ;;  %v797_v43 = vadd.f32 %v594_v41, %v593_v39 }
  0xfb   :  { %v336_v44 = vadd.f32 %v795_v42, %v791_v36  ;;  %v506_v45 = vpack.c.bf16 %v795_v42, %v791_v36  ;;  %v349_v46 = vadd.f32 %v797_v43, %v793_v37  ;;  %v526_v47 = vpack.c.bf16 %v797_v43, %v793_v37 }
  0xfd   :  { %507 = vst [vmem:[%s874_s2] sm:$0xff] %v506_v45   ;;  %546 = vst [vmem:[%s874_s2 + $0x20] sm:$0xff] %v526_v47   ;;  %v572_v48 = vpop.f32.mrb[4].mxu0  ;;  %v596_v49 = vpop.f32.mrb[4].mxu1 }
  0xfe   :  { %v573_v50 = vpop.f32.mrb[5].mxu0  ;;  %v597_v51 = vpop.f32.mrb[5].mxu1 }
  0xff   :  { %v813_v52 = vadd.f32 %v573_v50, %v572_v48  ;;  %v815_v53 = vadd.f32 %v597_v51, %v596_v49  ;;  %v575_v54 = vpop.f32.mrb[6].mxu0  ;;  %v599_v55 = vpop.f32.mrb[6].mxu1 }
 0x100   :  { %v576_v56 = vpop.f32.mrb[7].mxu0  ;;  %v600_v57 = vpop.f32.mrb[7].mxu1 }
 0x101   :  { %v337_v58 = vadd.f32 %v813_v52, %v336_v44  ;;  %v350_v59 = vadd.f32 %v815_v53, %v349_v46  ;;  %v819_v60 = vadd.f32 %v576_v56, %v575_v54  ;;  %v821_v61 = vadd.f32 %v600_v57, %v599_v55 }
 0x103   :  { %v338_v62 = vadd.f32 %v819_v60, %v337_v58  ;;  %v511_v63 = vpack.c.bf16 %v819_v60, %v813_v52  ;;  %v351_v0 = vadd.f32 %v821_v61, %v350_v59  ;;  %v531_v1 = vpack.c.bf16 %v821_v61, %v815_v53 }
 0x105   :  { %543 = vst [vmem:[%s874_s2 + $0x8] sm:$0xff] %v511_v63   ;;  %547 = vst [vmem:[%s874_s2 + $0x28] sm:$0xff] %v531_v1   ;;  %v578_v2 = vpop.f32.mrb[8].mxu0  ;;  %v602_v3 = vpop.f32.mrb[8].mxu1 }
 0x106   :  { %v579_v4 = vpop.f32.mrb[9].mxu0  ;;  %v603_v5 = vpop.f32.mrb[9].mxu1 }
 0x107   :  { %v580_v6 = vadd.f32 %v579_v4, %v578_v2  ;;  %v835_v7 = vadd.f32 %v603_v5, %v602_v3  ;;  %v581_v8 = vpop.f32.mrb[10].mxu0  ;;  %v605_v9 = vpop.f32.mrb[10].mxu1 }
 0x108   :  { %v582_v10 = vpop.f32.mrb[11].mxu0  ;;  %v606_v11 = vpop.f32.mrb[11].mxu1 }
 0x109   :  { %v339_v12 = vadd.f32 %v580_v6, %v338_v62  ;;  %v352_v13 = vadd.f32 %v835_v7, %v351_v0  ;;  %v583_v14 = vadd.f32 %v582_v10, %v581_v8  ;;  %v607_v15 = vadd.f32 %v606_v11, %v605_v9 }
 0x10b   :  { %v340_v16 = vadd.f32 %v583_v14, %v339_v12  ;;  %v516_v17 = vpack.c.bf16 %v583_v14, %v580_v6  ;;  %v353_v18 = vadd.f32 %v607_v15, %v352_v13  ;;  %v536_v19 = vpack.c.bf16 %v607_v15, %v835_v7 }
 0x10d   :  { %544 = vst [vmem:[%s874_s2 + $0x10] sm:$0xff] %v516_v17   ;;  %548 = vst [vmem:[%s874_s2 + $0x30] sm:$0xff] %v536_v19   ;;  %v584_v20 = vpop.f32.mrb[12].mxu0  ;;  %v608_v21 = vpop.f32.mrb[12].mxu1 }
 0x10e   :  { %v585_v22 = vpop.f32.mrb[13].mxu0  ;;  %v609_v23 = vpop.f32.mrb[13].mxu1 }
 0x10f   :  { %v586_v24 = vadd.f32 %v585_v22, %v584_v20  ;;  %v610_v25 = vadd.f32 %v609_v23, %v608_v21  ;;  %v587_v26 = vpop.f32.mrb[14].mxu0  ;;  %v611_v27 = vpop.f32.mrb[14].mxu1 }
 0x110   :  { %v588_v28 = vpop.f32.mrb[15].mxu0  ;;  %v612_v29 = vpop.f32.mrb[15].mxu1 }
 0x111   :  { %v341_v30 = vadd.f32 %v586_v24, %v340_v16  ;;  %v354_v31 = vadd.f32 %v610_v25, %v353_v18  ;;  %v589_v32 = vadd.f32 %v588_v28, %v587_v26  ;;  %v613_v33 = vadd.f32 %v612_v29, %v611_v27 }
 0x113   :  { %v342_v34 = vadd.f32 %v589_v32, %v341_v30  ;;  %v521_v35 = vpack.c.bf16 %v589_v32, %v586_v24  ;;  %v355_v38 = vadd.f32 %v613_v33, %v354_v31  ;;  %v541_v39 = vpack.c.bf16 %v613_v33, %v610_v25 }
 0x115   :  { %v343_v40 = vrot.slane %v342_v34, 4  ;;  %545 = vst [vmem:[%s874_s2 + $0x18] sm:$0xff] %v521_v35   ;;  %v356_v41 = vrot.slane %v355_v38, 4  ;;  %549 = vst [vmem:[%s874_s2 + $0x38] sm:$0xff] %v541_v39  }
 0x117   :  { %v344_v44 = vadd.f32 %v343_v40, %v342_v34  ;;  %v357_v45 = vadd.f32 %v356_v41, %v355_v38 }
 0x119   :  { %v345_v46 = vrot.slane %v344_v44, 2  ;;  %v358_v47 = vrot.slane %v357_v45, 2 }
 0x11b   :  { %v346_v48 = vadd.f32 %v345_v46, %v344_v44  ;;  %v359_v49 = vadd.f32 %v358_v47, %v357_v45 }
 0x11d   :  { %v347_v50 = vrot.slane %v346_v48, 1  ;;  %v360_v51 = vrot.slane %v359_v49, 1 }
 0x11f   :  { %v348_v54 = vadd.f32 %v347_v50, %v346_v48  ;;  %v361_v55 = vadd.f32 %v360_v51, %v359_v49 }
 0x121   :  { %v363_v56 = vmul.f32 0.015625, %v348_v54  ;;  %v364_v57 = vmul.f32 0.015625, %v361_v55 }
 0x123   :  { %v365_v58 = vsub.f32 %v791_v36, %v363_v56  ;;  %v366_v59 = vsub.f32 %v795_v42, %v363_v56  ;;  %v367_v62 = vsub.f32 %v813_v52, %v363_v56  ;;  %v368_v63 = vsub.f32 %v819_v60, %v363_v56  ;;  %381 = vst [vmem:[%s875_s3] sm:$0x1] %v363_v56 }
 0x124   :  { %382 = vst [vmem:[%s875_s3 + $0x1] sm:$0x1] %v364_v57  ;;  %v369_v0 = vsub.f32 %v580_v6, %v363_v56  ;;  %v370_v1 = vsub.f32 %v583_v14, %v363_v56  ;;  %v371_v2 = vsub.f32 %v586_v24, %v363_v56  ;;  %v372_v3 = vsub.f32 %v589_v32, %v363_v56 }
 0x125   :  { %v383_v4 = vmul.f32 %v365_v58, %v365_v58  ;;  %v384_v36 = vmul.f32 %v366_v59, %v366_v59  ;;  %v385_v5 = vmul.f32 %v367_v62, %v367_v62  ;;  %v386_v42 = vmul.f32 %v368_v63, %v368_v63 }
 0x126   :  { %v373_v52 = vsub.f32 %v793_v37, %v364_v57  ;;  %v374_v60 = vsub.f32 %v797_v43, %v364_v57  ;;  %v375_v9 = vsub.f32 %v815_v53, %v364_v57  ;;  %v376_v10 = vsub.f32 %v821_v61, %v364_v57 }
 0x127   :  { %v399_v8 = vadd.f32 %v384_v36, %v383_v4  ;;  %v377_v11 = vsub.f32 %v835_v7, %v364_v57  ;;  %v378_v12 = vsub.f32 %v607_v15, %v364_v57  ;;  %v379_v6 = vsub.f32 %v610_v25, %v364_v57 }
 0x128   :  { %v380_v14 = vsub.f32 %v613_v33, %v364_v57  ;;  %v391_v16 = vmul.f32 %v373_v52, %v373_v52  ;;  %v392_v17 = vmul.f32 %v374_v60, %v374_v60  ;;  %v387_v18 = vmul.f32 %v369_v0, %v369_v0 }
 0x129   :  { %v400_v13 = vadd.f32 %v399_v8, %v385_v5  ;;  %v393_v20 = vmul.f32 %v375_v9, %v375_v9  ;;  %v388_v22 = vmul.f32 %v370_v1, %v370_v1  ;;  %v394_v23 = vmul.f32 %v376_v10, %v376_v10 }
 0x12a   :  { %v412_v21 = vadd.f32 %v392_v17, %v391_v16  ;;  %v389_v24 = vmul.f32 %v371_v2, %v371_v2  ;;  %v395_v26 = vmul.f32 %v377_v11, %v377_v11  ;;  %v390_v27 = vmul.f32 %v372_v3, %v372_v3 }
 0x12b   :  { %v401_v19 = vadd.f32 %v400_v13, %v386_v42  ;;  %v396_v15 = vmul.f32 %v378_v12, %v378_v12  ;;  %v397_v29 = vmul.f32 %v379_v6, %v379_v6  ;;  %v398_v32 = vmul.f32 %v380_v14, %v380_v14 }
 0x12c   :  { %v413_v43 = vadd.f32 %v412_v21, %v393_v20 }
 0x12d   :  { %v402_v37 = vadd.f32 %v401_v19, %v387_v18 }
 0x12e   :  { %v414_v61 = vadd.f32 %v413_v43, %v394_v23 }
 0x12f   :  { %v403_v53 = vadd.f32 %v402_v37, %v388_v22 }
 0x130   :  { %v415_v25 = vadd.f32 %v414_v61, %v395_v26 }
 0x131   :  { %v404_v7 = vadd.f32 %v403_v53, %v389_v24 }
 0x132   :  { %v416_v30 = vadd.f32 %v415_v25, %v396_v15 }
 0x133   :  { %v405_v28 = vadd.f32 %v404_v7, %v390_v27 }
 0x134   :  { %v417_v33 = vadd.f32 %v416_v30, %v397_v29 }
 0x135   :  { %v406_v31 = vrot.slane %v405_v28, 4 }
 0x136   :  { %v418_v35 = vadd.f32 %v417_v33, %v398_v32 }
 0x137   :  { %v407_v34 = vadd.f32 %v406_v31, %v405_v28 }
 0x138   :  { %v419_v39 = vrot.slane %v418_v35, 4 }
 0x139   :  { %v408_v38 = vrot.slane %v407_v34, 2 }
 0x13a   :  { %v420_v41 = vadd.f32 %v419_v39, %v418_v35 }
 0x13b   :  { %v409_v40 = vadd.f32 %v408_v38, %v407_v34 }
 0x13c   :  { %v421_v45 = vrot.slane %v420_v41, 2 }
 0x13d   :  { %v410_v44 = vrot.slane %v409_v40, 1 }
 0x13e   :  { %v422_v47 = vadd.f32 %v421_v45, %v420_v41 }
 0x13f   :  { %v411_v46 = vadd.f32 %v410_v44, %v409_v40 }
 0x140   :  { %v423_v48 = vrot.slane %v422_v47, 1 }
 0x141   :  { %425 = vst [vmem:[%s876_s4] sm:$0x1] %v411_v46 }
 0x142   :  { %v424_v49 = vadd.f32 %v423_v48, %v422_v47 }
 0x144   :  { %426 = vst [vmem:[%s876_s4 + $0x1] sm:$0x1] %v424_v49 }

// kernel: cnn_forward.5
= control target key start
LH: loop header
LB: loop body
LE: loop exit
PB: predicated region body
PF: predicated region fallthrough
CT: control target
= control target key end

     0   :  { %v4794_v1 = vmov 0   ;;  %vm380_vm0 = vcmask 1043456   ;;  %vm381_vm1 = vsmask.f32 7938  ;;  %vm386_vm2 = vcmask 1040384   ;;  %s5989_s3 = inlined_call_operand.vmem [shape: bf16[9,128,128], index: 3, kind: input, shape index: {}]   ;;  %s5990_s0 = inlined_call_operand.vmem [shape: bf16[2,8,8,128], index: 0, kind: input, shape index: {}]   ;;  %s5991_s1 = inlined_call_operand.vmem [shape: f32[1,128], index: 1, kind: input, shape index: {}]   ;;  %s5992_s2 = inlined_call_operand.vmem [shape: f32[1,128], index: 2, kind: input, shape index: {}]   ;;  %s5993_s4 = inlined_call_operand.vmem [shape: bf16[2,8,8,128], index: 4, kind: output, shape index: {0}]   ;;  %s5994_s5 = inlined_call_operand.vmem [shape: f32[2,1,128], index: 5, kind: output, shape index: {1}]   ;;  %s5995_s6 = inlined_call_operand.vmem [shape: f32[2,1,128], index: 6, kind: output, shape index: {2}]  }
   0x1   :  { %v4682_v0 = vld [vmem:[%s5989_s3 + $0x40] sm:$0xff]   ;;  %21 = vst [vmem:[#allocation2] sm:$0xf] %v4794_v1  ;;  %22 = vst [vmem:[#allocation2 + $0x4] sm:$0x1] %v4794_v1  ;;  %v4684_v3 = vld [vmem:[%s5989_s3 + $0x48] sm:$0xff]  }
   0x2   :  { %23 = vst [vmem:[#allocation2 + $0x8] sm:$0xf] %v4794_v1  ;;  %24 = vst [vmem:[#allocation2 + $0xc] sm:$0x1] %v4794_v1  ;;  %v4683_v2 = vld [vmem:[%s5989_s3 + $0x100] sm:$0xff]   ;;  %4249 = vmatprep.subr.bf16.mxu1 %v4682_v0  ;;  %v4685_v4 = vld [vmem:[%s5989_s3 + $0x108] sm:$0xff]  }
   0x3   :  { %25 = vst [vmem:[#allocation2 + $0x10] sm:$0xf] %v4794_v1  ;;  %26 = vst [vmem:[#allocation2 + $0x14] sm:$0x1] %v4794_v1  ;;  %4377 = vmatprep.subr.bf16.mxu0 %v4683_v2  ;;  %4250 = vmatpush3.bf16.msra.mxu1 %v4682_v0  ;;  %v4686_v5 = vld [vmem:[%s5989_s3 + $0x50] sm:$0xff]   ;;  %v4688_v7 = vld [vmem:[%s5989_s3 + $0x58] sm:$0xff]  }
   0x4   :  { %27 = vst [vmem:[#allocation2 + $0x18] sm:$0xf] %v4794_v1  ;;  %28 = vst [vmem:[#allocation2 + $0x1c] sm:$0x1] %v4794_v1  ;;  %4378 = vmatpush3.bf16.msra.mxu0 %v4683_v2  ;;  %4251 = vmatprep.subr.bf16.mxu1 %v4684_v3  ;;  %v4687_v6 = vld [vmem:[%s5989_s3 + $0x110] sm:$0xff]   ;;  %v4689_v8 = vld [vmem:[%s5989_s3 + $0x118] sm:$0xff]  }
   0x5   :  { %29 = vst [vmem:[#allocation2 + $0x20] sm:$0xf] %v4794_v1  ;;  %30 = vst [vmem:[#allocation2 + $0x24] sm:$0x1] %v4794_v1  ;;  %4379 = vmatprep.subr.bf16.mxu0 %v4685_v4  ;;  %v4690_v9 = vld [vmem:[%s5989_s3 + $0x60] sm:$0xff]   ;;  %v4692_v11 = vld [vmem:[%s5989_s3 + $0x68] sm:$0xff]  }
   0x6   :  { %31 = vst [vmem:[#allocation2 + $0x28] sm:$0xf] %v4794_v1  ;;  %32 = vst [vmem:[#allocation2 + $0x2c] sm:$0x1] %v4794_v1  ;;  %v4691_v10 = vld [vmem:[%s5989_s3 + $0x120] sm:$0xff]   ;;  %v4693_v14 = vld [vmem:[%s5989_s3 + $0x128] sm:$0xff]  }
   0x7   :  { %33 = vst [vmem:[#allocation2 + $0x30] sm:$0xf] %v4794_v1  ;;  %34 = vst [vmem:[#allocation2 + $0x34] sm:$0x1] %v4794_v1  ;;  %4252 = vmatpush3.bf16.msra.mxu1 %v4684_v3  ;;  %v4020_v12 = vld [vmem:[%s5990_s0] sm:$0xff]   ;;  %v4694_v20 = vld [vmem:[%s5989_s3 + $0x70] sm:$0xff]  }
   0x8   :  { %35 = vst [vmem:[#allocation2 + $0x38] sm:$0xf] %v4794_v1  ;;  %36 = vst [vmem:[#allocation2 + $0x3c] sm:$0x1] %v4794_v1  ;;  %4380 = vmatpush3.bf16.msra.mxu0 %v4685_v4  ;;  %4253 = vmatprep.subr.bf16.mxu1 %v4686_v5  ;;  %v4869_v13 = vld [vmem:[%s5991_s1] ss:$0 sm:$0xff]  ;;  %v4021_v15 = vunpack.c.l.bf16 %v4020_v12  ;;  %v4022_v16 = vunpack.c.h.bf16 %v4020_v12 }
   0x9   :  { %37 = vst [vmem:[#allocation2 + $0x40] sm:$0xf] %v4794_v1  ;;  %38 = vst [vmem:[#allocation2 + $0x44] sm:$0x1] %v4794_v1  ;;  %4381 = vmatprep.subr.bf16.mxu0 %v4687_v6  ;;  %v4877_v17 = vld [vmem:[%s5992_s2] ss:$0 sm:$0xff] }
   0xa   :  { %39 = vst [vmem:[#allocation2 + $0x48] sm:$0xf] %v4794_v1  ;;  %40 = vst [vmem:[#allocation2 + $0x4c] sm:$0x1] %v4794_v1  ;;  %v482_v18 = vld [vmem:[#allocation2] sm:$0xf]  ;;  %v100_v19 = vmul.f32 %v4021_v15, %v4869_v13  ;;  %v101_v21 = vmul.f32 %v4022_v16, %v4869_v13 }
   0xb   :  { %41 = vst [vmem:[#allocation2 + $0x50] sm:$0xf] %v4794_v1  ;;  %42 = vst [vmem:[#allocation2 + $0x54] sm:$0x1] %v4794_v1  ;;  %4254 = vmatpush3.bf16.msra.mxu1 %v4686_v5  ;;  %v4695_v22 = vld [vmem:[%s5989_s3 + $0x130] sm:$0xff]   ;;  %v534_v25 = vshrl.u32 %v482_v18, 16 }
   0xc   :  { %43 = vst [vmem:[#allocation2 + $0x58] sm:$0xf] %v4794_v1  ;;  %44 = vst [vmem:[#allocation2 + $0x5c] sm:$0x1] %v4794_v1  ;;  %4382 = vmatpush3.bf16.msra.mxu0 %v4687_v6  ;;  %4255 = vmatprep.subr.bf16.mxu1 %v4688_v7  ;;  %v123_v23 = vadd.f32 %v4877_v17, %v100_v19  ;;  %v514_v24 = vld [vmem:[#allocation2 + $0x4] sm:$0x1]  ;;  %v124_v27 = vadd.f32 %v4877_v17, %v101_v21 }
   0xd   :  { %45 = vst [vmem:[#allocation2 + $0x60] sm:$0xf] %v4794_v1  ;;  %46 = vst [vmem:[#allocation2 + $0x64] sm:$0x1] %v4794_v1  ;;  %4383 = vmatprep.subr.bf16.mxu0 %v4689_v8  ;;  %v537_v26 = vshll.u32 %v482_v18, 16  ;;  %v4091_v29 = vld [vmem:[%s5990_s0 + $0x8] sm:$0xff]  }
   0xe   :  { %47 = vst [vmem:[#allocation2 + $0x68] sm:$0xf] %v4794_v1  ;;  %48 = vst [vmem:[#allocation2 + $0x6c] sm:$0x1] %v4794_v1  ;;  %v139_v28 = vmax.f32 %v123_v23, 0.0  ;;  %v4696_v30 = vld [vmem:[%s5989_s3 + $0x78] sm:$0xff]   ;;  %v4025_v33 = vunpack.c.l.bf16 %v4091_v29  ;;  %v4026_v34 = vunpack.c.h.bf16 %v4091_v29 }
   0xf   :  { %49 = vst [vmem:[#allocation2 + $0x70] sm:$0xf] %v4794_v1  ;;  %50 = vst [vmem:[#allocation2 + $0x74] sm:$0x1] %v4794_v1  ;;  %4256 = vmatpush3.bf16.msra.mxu1 %v4688_v7  ;;  %v4697_v31 = vld [vmem:[%s5989_s3 + $0x138] sm:$0xff]   ;;  %v140_v32 = vmax.f32 %v124_v27, 0.0 }
  0x10   :  { %51 = vst [vmem:[#allocation2 + $0x78] sm:$0xf] %v4794_v1  ;;  %52 = vst [vmem:[#allocation2 + $0x7c] sm:$0x1] %v4794_v1  ;;  %4384 = vmatpush3.bf16.msra.mxu0 %v4689_v8  ;;  %4257 = vmatprep.subr.bf16.mxu1 %v4690_v9  ;;  %vm387_vm3 = vsmask.f32 256  ;;  %v4003_v35 = vpack.c.bf16 %v139_v28, %v139_v28  ;;  %v102_v40 = vmul.f32 %v4025_v33, %v4869_v13 }
  0x11   :  { %53 = vst [vmem:[#allocation2 + $0x80] sm:$0xf] %v4794_v1  ;;  %54 = vst [vmem:[#allocation2 + $0x84] sm:$0x1] %v4794_v1  ;;  %4385 = vmatprep.subr.bf16.mxu0 %v4691_v10  ;;  %v4898_v36 = vrot.slane %v534_v25, 4  ;;  %v543_v37 = vshll.u32 %v514_v24, 16  ;;  %v4004_v39 = vpack.c.bf16 %v140_v32, %v140_v32  ;;  %v103_v41 = vmul.f32 %v4026_v34, %v4869_v13 }
  0x12   :  { %55 = vst [vmem:[#allocation2 + $0x88] sm:$0xf] %v4794_v1  ;;  %56 = vst [vmem:[#allocation2 + $0x8c] sm:$0x1] %v4794_v1  ;;  %vm530_vm4 = vsmask.f32 3328  ;;  %v125_v51 = vadd.f32 %v4877_v17, %v102_v40 }
  0x13   :  { %57 = vst [vmem:[#allocation2 + $0x90] sm:$0xf] %v4794_v1  ;;  %58 = vst [vmem:[#allocation2 + $0x94] sm:$0x1] %v4794_v1  ;;  %4258 = vmatpush3.bf16.msra.mxu1 %v4690_v9  ;;  %v539_v38 = vrot.slane %v537_v26, 5  ;;  %v4092_v42 = vld [vmem:[%s5990_s0 + $0x10] sm:$0xff]   ;;  %v126_v52 = vadd.f32 %v4877_v17, %v103_v41 }
  0x14   :  { %59 = vst [vmem:[#allocation2 + $0x98] sm:$0xf] %v4794_v1  ;;  %60 = vst [vmem:[#allocation2 + $0x9c] sm:$0x1] %v4794_v1  ;;  %4386 = vmatpush3.bf16.msra.mxu0 %v4691_v10  ;;  %4259 = vmatprep.subr.bf16.mxu1 %v4692_v11  ;;  %v220_v43 = vshrl.u32 %v4003_v35, 16  ;;  %v223_v44 = vshll.u32 %v4003_v35, 16  ;;  %v4029_v46 = vunpack.c.l.bf16 %v4092_v42  ;;  %v4030_v59 = vunpack.c.h.bf16 %v4092_v42 }
  0x15   :  { %4387 = vmatprep.subr.bf16.mxu0 %v4693_v14  ;;  %vm531_vm5 = vsmask.f32 7440  ;;  %v4908_v45 = vld [vmem:[%s5989_s3] sm:$0xff]   ;;  %v383_v47 = vld [vmem:[#allocation2 + $0x8] sm:$0xf]  ;;  %v228_v49 = vshrl.u32 %v4004_v39, 16  ;;  %vm4914_vm6 = vmand %vm380_vm0, %vm381_vm1  ;;  %v540_v61 = vor.u32 %v539_v38, %v4898_v36 }
  0x16   :  { %v389_v48 = vld [vmem:[#allocation2 + $0xc] sm:$0x1]  ;;  %v231_v50 = vshll.u32 %v4004_v39, 16  ;;  %v222_v53 = vrot.slane %v220_v43, 7  ;;  %v4918_v55 = vrot.slane %v543_v37, 5  ;;  %v4923_v57 = vld [vmem:[%s5989_s3 + $0x140] sm:$0xff]   ;;  %v104_v58 = vmul.f32 %v4029_v46, %v4869_v13  ;;  %vm4928_vm7 = vmand %vm386_vm2, %vm387_vm3 }
  0x17   :  { %4260 = vmatpush3.bf16.msra.mxu1 %v4692_v11  ;;  %v392_v56 = vld [vmem:[#allocation2 + $0x10] sm:$0xf]  ;;  %v230_v62 = vrot.slane %v228_v49, 7  ;;  %v141_v63 = vmax.f32 %v125_v51, 0.0  ;;  %v142_v0 = vmax.f32 %v126_v52, 0.0  ;;  %v105_v5 = vmul.f32 %v4030_v59, %v4869_v13  ;;  %v4093_v15 = vld [vmem:[%s5990_s0 + $0x18] sm:$0xff]   ;;  %vm4953_vm8 = vmor %vm530_vm4, %vm531_vm5 }
  0x18   :  { %4388 = vmatpush3.bf16.msra.mxu0 %v4693_v14  ;;  %4261 = vmatprep.subr.bf16.mxu1 %v4694_v20  ;;  %v225_v1 = vor.u32 %v223_v44, %v222_v53  ;;  %v226_v2 = vrot.slane %v222_v53, 4  ;;  %v395_v3 = vld [vmem:[#allocation2 + $0x14] sm:$0x1]  ;;  %v127_v4 = vadd.f32 %v4877_v17, %v104_v58  ;;  %v4949_v25 = vrot.slane %v540_v61, 4  ;;  %v398_v27 = vld [vmem:[#allocation2 + $0x18] sm:$0xf] }
  0x19   :  { %4389 = vmatprep.subr.bf16.mxu0 %v4695_v22  ;;  %v233_v6 = vor.u32 %v231_v50, %v230_v62  ;;  %v234_v7 = vrot.slane %v230_v62, 4  ;;  %v4005_v8 = vpack.c.bf16 %v141_v63, %v141_v63  ;;  %v4006_v9 = vpack.c.bf16 %v142_v0, %v142_v0  ;;  %v401_v28 = vld [vmem:[#allocation2 + $0x1c] sm:$0x1]  ;;  %v4960_v35 = vld [vmem:[%s5990_s0 + $0x20] sm:$0xff]  }
  0x1a   :  { %v384_v10 = vsel %vm4914_vm6, %v225_v1, %v383_v47  ;;  %v390_v11 = vsel %vm4928_vm7, %v226_v2, %v389_v48  ;;  %v143_v12 = vmax.f32 %v127_v4, 0.0  ;;  %v128_v14 = vadd.f32 %v4877_v17, %v105_v5  ;;  %v407_v38 = vld [vmem:[#allocation2 + $0x24] sm:$0x1]  ;;  %v410_v48 = vld [vmem:[#allocation2 + $0x28] sm:$0xf] }
  0x1b   :  { %4262 = vmatpush3.bf16.msra.mxu1 %v4694_v20  ;;  %385 = vst [vmem:[#allocation2 + $0x8] sm:$0xf] %v384_v10  ;;  %391 = vst [vmem:[#allocation2 + $0xc] sm:$0x1] %v390_v11  ;;  %v393_v16 = vsel %vm4914_vm6, %v233_v6, %v392_v56  ;;  %v396_v18 = vsel %vm4928_vm7, %v234_v7, %v395_v3  ;;  %v236_v19 = vshrl.u32 %v4005_v8, 16  ;;  %v239_v20 = vshll.u32 %v4005_v8, 16 }
  0x1c   :  { %4390 = vmatpush3.bf16.msra.mxu0 %v4695_v22  ;;  %4263 = vmatprep.subr.bf16.mxu1 %v4696_v30  ;;  %394 = vst [vmem:[#allocation2 + $0x10] sm:$0xf] %v393_v16  ;;  %397 = vst [vmem:[#allocation2 + $0x14] sm:$0x1] %v396_v18  ;;  %v244_v21 = vshrl.u32 %v4006_v9, 16  ;;  %v247_v22 = vshll.u32 %v4006_v9, 16  ;;  %v4007_v23 = vpack.c.bf16 %v143_v12, %v143_v12  ;;  %v4033_v34 = vunpack.c.l.bf16 %v4093_v15 }
  0x1d   :  { %4391 = vmatprep.subr.bf16.mxu0 %v4697_v31  ;;  %v144_v24 = vmax.f32 %v128_v14, 0.0  ;;  %v238_v26 = vrot.slane %v236_v19, 7  ;;  %v4034_v43 = vunpack.c.h.bf16 %v4093_v15  ;;  %v546_v44 = vsel %vm4953_vm8, %v4949_v25, %v4918_v55 }
  0x1e   :  { %v252_v32 = vshrl.u32 %v4007_v23, 16  ;;  %v255_v33 = vshll.u32 %v4007_v23, 16  ;;  %v4037_v49 = vunpack.c.l.bf16 %v4960_v35  ;;  %v106_v58 = vmul.f32 %v4033_v34, %v4869_v13 }
  0x1f   :  { %4264 = vmatpush3.bf16.msra.mxu1 %v4696_v30  ;;  %v246_v30 = vrot.slane %v244_v21, 7  ;;  %v241_v36 = vor.u32 %v239_v20, %v238_v26  ;;  %v242_v37 = vrot.slane %v238_v26, 4  ;;  %v4962_v39 = vpack.c.bf16 %v144_v24, %v144_v24 }
  0x20   :  { %4392 = vmatpush3.bf16.msra.mxu0 %v4697_v31  ;;  %4281 = vmatprep.subr.bf16.mxu1 %v4908_v45  ;;  %v404_v31 = vld [vmem:[#allocation2 + $0x20] sm:$0xf]  ;;  %v4964_v42 = vrot.slane %v252_v32, 7  ;;  %v107_v6 = vmul.f32 %v4034_v43, %v4869_v13  ;;  %v108_v32 = vmul.f32 %v4037_v49, %v4869_v13  ;;  %vm1192_vm9 = vcmask 1042432  }
  0x21   :  { %4409 = vmatprep.subr.bf16.mxu0 %v4923_v57  ;;  %v249_v40 = vor.u32 %v247_v22, %v246_v30  ;;  %v250_v41 = vrot.slane %v246_v30, 4  ;;  %v399_v46 = vsel %vm4914_vm6, %v241_v36, %v398_v27  ;;  %v402_v47 = vsel %vm4928_vm7, %v242_v37, %v401_v28 }
  0x22   :  { %v483_v50 = vld [vmem:[#allocation2 + $0x8] sm:$0xf]  ;;  %v515_v51 = vld [vmem:[#allocation2 + $0xc] sm:$0x1]  ;;  %400 = vst [vmem:[#allocation2 + $0x18] sm:$0xf] %v399_v46  ;;  %v257_v56 = vor.u32 %v255_v33, %v4964_v42  ;;  %v4995_v22 = vadd.f32 %v4877_v17, %v106_v58 }
  0x23   :  { %v1711_v52 = vld [vmem:[#allocation2 + $0x8] sm:$0xf]  ;;  %403 = vst [vmem:[#allocation2 + $0x1c] sm:$0x1] %v402_v47  ;;  %v405_v53 = vsel %vm4914_vm6, %v249_v40, %v404_v31  ;;  %v408_v55 = vsel %vm4928_vm7, %v250_v41, %v407_v38  ;;  %v548_v59 = vshrl.u32 %v483_v50, 16  ;;  %v551_v61 = vshll.u32 %v483_v50, 16 }
  0x24   :  { %v557_v62 = vshll.u32 %v515_v51, 16  ;;  %v4981_v63 = vld [vmem:[#allocation2 + $0xc] sm:$0x1]  ;;  %406 = vst [vmem:[#allocation2 + $0x20] sm:$0xf] %v405_v53  ;;  %v260_v0 = vshrl.u32 %v4962_v39, 16  ;;  %v411_v5 = vsel %vm4914_vm6, %v257_v56, %v410_v48  ;;  %v5000_v31 = vadd.f32 %v4877_v17, %v107_v6 }
  0x25   :  { %409 = vst [vmem:[#allocation2 + $0x24] sm:$0x1] %v408_v55  ;;  %v1713_v1 = vld [vmem:[#allocation2 + $0x10] sm:$0xf]  ;;  %v4984_v2 = vld [vmem:[#allocation2 + $0x14] sm:$0x1] }
  0x26   :  { %v1744_v3 = vshrl.u32 %v1711_v52, 16  ;;  %v1747_v4 = vshll.u32 %v1711_v52, 16  ;;  %v550_v7 = vrot.slane %v548_v59, 4  ;;  %v553_v8 = vrot.slane %v551_v61, 5  ;;  %412 = vst [vmem:[#allocation2 + $0x28] sm:$0xf] %v411_v5 }
  0x27   :  { %v1753_v9 = vshll.u32 %v4981_v63, 16  ;;  %v263_v10 = vshll.u32 %v4962_v39, 16  ;;  %v1758_v14 = vshrl.u32 %v1713_v1, 16  ;;  %v1761_v15 = vshll.u32 %v1713_v1, 16  ;;  %v4991_v16 = vld [vmem:[#allocation2 + $0x10] sm:$0xf] }
  0x28   :  { %v1746_v11 = vrot.slane %v1744_v3, 4  ;;  %v1749_v12 = vrot.slane %v1747_v4, 5  ;;  %v554_v18 = vor.u32 %v553_v8, %v550_v7  ;;  %v559_v19 = vrot.slane %v557_v62, 5  ;;  %v516_v21 = vld [vmem:[#allocation2 + $0x14] sm:$0x1] }
  0x29   :  { %v1767_v20 = vshll.u32 %v4984_v2, 16  ;;  %v1755_v24 = vrot.slane %v1753_v9, 5  ;;  %v1760_v25 = vrot.slane %v1758_v14, 4  ;;  %v1763_v26 = vrot.slane %v1761_v15, 5  ;;  %v4997_v30 = vld [vmem:[#allocation2 + $0x18] sm:$0xf] }
  0x2a   :  { %v1750_v23 = vor.u32 %v1749_v12, %v1746_v11  ;;  %v555_v27 = vrot.slane %v554_v18, 4  ;;  %v562_v36 = vshrl.u32 %v4991_v16, 16  ;;  %v565_v37 = vshll.u32 %v4991_v16, 16  ;;  %v517_v40 = vld [vmem:[#allocation2 + $0x1c] sm:$0x1] }
  0x2b   :  { %v1769_v28 = vrot.slane %v1767_v20, 5  ;;  %v1764_v34 = vor.u32 %v1763_v26, %v1760_v25  ;;  %v571_v41 = vshll.u32 %v516_v21, 16  ;;  %v576_v43 = vshrl.u32 %v4997_v30, 16  ;;  %v1715_v51 = vld [vmem:[#allocation2 + $0x18] sm:$0xf] }
  0x2c   :  { %v1751_v33 = vrot.slane %v1750_v23, 4  ;;  %v560_v38 = vsel %vm4953_vm8, %v555_v27, %v559_v19  ;;  %v579_v46 = vshll.u32 %v4997_v30, 16  ;;  %v564_v50 = vrot.slane %v562_v36, 4  ;;  %v5011_v52 = vld [vmem:[#allocation2 + $0x1c] sm:$0x1]  ;;  %v4700_v36 = vld [vmem:[%s5989_s3 + $0x8] sm:$0xff]  }
  0x2d   :  { %v3699_v47 = vcombine.low %v546_v44, %v560_v38  ;;  %v1765_v49 = vrot.slane %v1764_v34, 4  ;;  %v2227_v53 = vrot.slane %v4981_v63, 5  ;;  %v567_v55 = vrot.slane %v565_v37, 5  ;;  %v1717_v59 = vld [vmem:[#allocation2 + $0x20] sm:$0xf] }
  0x2e   :  { %v1756_v48 = vsel %vm4953_vm8, %v1751_v33, %v1755_v24  ;;  %v578_v56 = vrot.slane %v576_v43, 4  ;;  %v581_v58 = vrot.slane %v579_v46, 5  ;;  %v573_v62 = vrot.slane %v571_v41, 5  ;;  %v5017_v6 = vld [vmem:[#allocation2 + $0x24] sm:$0x1] }
  0x2f   :  { %4265 = vmatprep.mubr.bf16.mxu1 %v3699_v47  ;;  %v1770_v61 = vsel %vm4953_vm8, %v1765_v49, %v1769_v28  ;;  %v585_v1 = vshll.u32 %v517_v40, 16  ;;  %v568_v4 = vor.u32 %v567_v55, %v564_v50  ;;  %v1772_v7 = vshrl.u32 %v1715_v51, 16  ;;  %v5020_v20 = vld [vmem:[#allocation2 + $0x20] sm:$0xf]  ;;  %v413_v25 = vld [vmem:[#allocation2 + $0x2c] sm:$0x1] }
  0x30   :  { %v3827_v3 = vcombine.low %v1756_v48, %v1770_v61  ;;  %v582_v5 = vor.u32 %v581_v58, %v578_v56  ;;  %v1775_v9 = vshll.u32 %v1715_v51, 16  ;;  %v1781_v11 = vshll.u32 %v5011_v52, 16  ;;  %v5023_v26 = vld [vmem:[#allocation2 + $0x28] sm:$0xf]  ;;  %v518_v37 = vld [vmem:[#allocation2 + $0x24] sm:$0x1] }
  0x31   :  { %v587_v8 = vrot.slane %v585_v1, 5  ;;  %v1786_v12 = vshrl.u32 %v1717_v59, 16  ;;  %v569_v14 = vrot.slane %v568_v4, 4  ;;  %v1774_v18 = vrot.slane %v1772_v7, 4  ;;  %v1719_v58 = vld [vmem:[#allocation2 + $0x28] sm:$0xf] }
  0x32   :  { %4393 = vmatprep.mubr.bf16.mxu0 %v3827_v3  ;;  %v583_v15 = vrot.slane %v582_v5, 4  ;;  %v1789_v19 = vshll.u32 %v1717_v59, 16  ;;  %v1777_v21 = vrot.slane %v1775_v9, 5  ;;  %v1795_v24 = vshll.u32 %v5017_v6, 16  ;;  %v4701_v3 = vld [vmem:[%s5989_s3 + $0x148] sm:$0xff]  }
  0x33   :  { %v1788_v23 = vrot.slane %v1786_v12, 4  ;;  %v5026_v27 = vadd.f32 %v4877_v17, %v108_v32  ;;  %v574_v28 = vsel %vm4953_vm8, %v569_v14, %v573_v62  ;;  %v4038_v38 = vunpack.c.h.bf16 %v4960_v35  ;;  %v416_v12 = vld [vmem:[#allocation2 + $0x30] sm:$0xf]  ;;  %v473_v44 = vld [vmem:[#allocation2 + $0x8c] sm:$0x1] }
  0x34   :  { %v588_v33 = vsel %vm4953_vm8, %v583_v15, %v587_v8  ;;  %v1791_v34 = vrot.slane %v1789_v19, 5  ;;  %v1778_v41 = vor.u32 %v1777_v21, %v1774_v18  ;;  %v1783_v43 = vrot.slane %v1781_v11, 5  ;;  %v419_v19 = vld [vmem:[#allocation2 + $0x34] sm:$0x1]  ;;  %v3211_v29 = vld [vmem:[#allocation2 + $0x28] sm:$0xe] }
  0x35   :  { %v3700_v40 = vcombine.low %v574_v28, %v588_v33  ;;  %v1797_v46 = vrot.slane %v1795_v24, 5  ;;  %v258_v47 = vrot.slane %v4964_v42, 4  ;;  %v590_v48 = vshrl.u32 %v5020_v20, 16 }
  0x36   :  { %v1792_v32 = vor.u32 %v1791_v34, %v1788_v23  ;;  %v593_v49 = vshll.u32 %v5020_v20, 16  ;;  %v1779_v50 = vrot.slane %v1778_v41, 4  ;;  %v599_v51 = vshll.u32 %v518_v37, 16 }
  0x37   :  { %4266 = vmatmul.mubr.bf16.vlgmr.msra.gmra.mrb[0].mxu1 %v3700_v40  ;;  %v604_v55 = vshrl.u32 %v5023_v26, 16  ;;  %v607_v56 = vshll.u32 %v5023_v26, 16  ;;  %v414_v61 = vsel %vm4928_vm7, %v258_v47, %v413_v25  ;;  %v592_v62 = vrot.slane %v590_v48, 4 }
  0x38   :  { %4282 = vmatpush3.bf16.msra.mxu1 %v4908_v45  ;;  %v1793_v59 = vrot.slane %v1792_v32, 4  ;;  %v595_v42 = vrot.slane %v593_v49, 5  ;;  %v1784_v1 = vsel %vm4953_vm8, %v1779_v50, %v1783_v43  ;;  %415 = vst [vmem:[#allocation2 + $0x2c] sm:$0x1] %v414_v61  ;;  %v5049_v4 = vrot.slane %v599_v51, 5  ;;  %v4702_v45 = vld [vmem:[%s5989_s3 + $0x10] sm:$0xff]  }
  0x39   :  { %4283 = vmatprep.subr.bf16.mxu1 %v4700_v36  ;;  %v606_v5 = vrot.slane %v604_v55, 4  ;;  %v609_v7 = vrot.slane %v607_v56, 5  ;;  %v262_v11 = vrot.slane %v260_v0, 7  ;;  %v1800_v14 = vshrl.u32 %v1719_v58, 16  ;;  %v422_v51 = vld [vmem:[#allocation2 + $0x38] sm:$0xf] }
  0x3a   :  { %v1798_v8 = vsel %vm4953_vm8, %v1793_v59, %v1797_v46  ;;  %v596_v9 = vor.u32 %v595_v42, %v592_v62  ;;  %v1803_v21 = vshll.u32 %v1719_v58, 16  ;;  %v145_v23 = vmax.f32 %v4995_v22, 0.0  ;;  %v4704_v22 = vld [vmem:[%s5989_s3 + $0x18] sm:$0xff]   ;;  %v4703_v46 = vld [vmem:[%s5989_s3 + $0x150] sm:$0xff]   ;;  %v4706_v42 = vld [vmem:[%s5989_s3 + $0x20] sm:$0xff]  }
  0x3b   :  { %v3828_v15 = vcombine.low %v1784_v1, %v1798_v8  ;;  %v610_v18 = vor.u32 %v609_v7, %v606_v5  ;;  %v265_v25 = vor.u32 %v263_v10, %v262_v11  ;;  %v266_v28 = vrot.slane %v262_v11, 4 }
  0x3c   :  { %4284 = vmatpush3.bf16.msra.mxu1 %v4700_v36  ;;  %v5059_v24 = vrot.slane %v596_v9, 4  ;;  %v1802_v33 = vrot.slane %v1800_v14, 4  ;;  %v1805_v0 = vrot.slane %v1803_v21, 5  ;;  %v4009_v37 = vpack.c.bf16 %v145_v23, %v145_v23  ;;  %v490_v36 = vld [vmem:[#allocation2 + $0x50] sm:$0xf] }
  0x3d   :  { %4394 = vmatmul.mubr.bf16.vlgmr.msra.gmra.mrb[0].mxu0 %v3828_v15  ;;  %4285 = vmatprep.subr.bf16.mxu1 %v4702_v45  ;;  %v146_v40 = vmax.f32 %v5000_v31, 0.0  ;;  %v611_v41 = vrot.slane %v610_v18, 4  ;;  %v417_v39 = vsel %vm4914_vm6, %v265_v25, %v416_v12  ;;  %v420_v10 = vsel %vm4928_vm7, %v266_v28, %v419_v19  ;;  %v428_v14 = vld [vmem:[#allocation2 + $0x40] sm:$0xf]  ;;  %v4705_v15 = vld [vmem:[%s5989_s3 + $0x158] sm:$0xff]  }
  0x3e   :  { %4410 = vmatpush3.bf16.msra.mxu0 %v4923_v57  ;;  %v147_v43 = vmax.f32 %v5026_v27, 0.0  ;;  %418 = vst [vmem:[#allocation2 + $0x30] sm:$0xf] %v417_v39  ;;  %421 = vst [vmem:[#allocation2 + $0x34] sm:$0x1] %v420_v10  ;;  %v1806_v31 = vor.u32 %v1805_v0, %v1802_v33  ;;  %v268_v32 = vshrl.u32 %v4009_v37, 16  ;;  %v602_v49 = vsel %vm4953_vm8, %v5059_v24, %v5049_v4 }
  0x3f   :  { %4411 = vmatprep.subr.bf16.mxu0 %v4701_v3  ;;  %v271_v47 = vshll.u32 %v4009_v37, 16  ;;  %v4010_v57 = vpack.c.bf16 %v146_v40, %v146_v40  ;;  %v519_v48 = vld [vmem:[#allocation2 + $0x2c] sm:$0x1]  ;;  %v425_v27 = vld [vmem:[#allocation2 + $0x3c] sm:$0x1]  ;;  %v646_v56 = vshrl.u32 %v490_v36, 16  ;;  %v5087_v1 = vmul.f32 %v4038_v38, %v4869_v13 }
  0x40   :  { %v1720_v50 = vld [vmem:[#allocation2 + $0x2c] sm:$0x1]  ;;  %4286 = vmatpush3.bf16.msra.mxu1 %v4702_v45  ;;  %v4011_v55 = vpack.c.bf16 %v147_v43, %v147_v43  ;;  %v649_v58 = vshll.u32 %v490_v36, 16  ;;  %v613_v59 = vshll.u32 %v519_v48, 16  ;;  %v270_v62 = vrot.slane %v268_v32, 7  ;;  %v5107_v28 = vld [vmem:[%s5989_s3 + $0x160] sm:$0xff]  }
  0x41   :  { %v1809_v61 = vshll.u32 %v1720_v50, 16  ;;  %4287 = vmatprep.subr.bf16.mxu1 %v4704_v22  ;;  %v276_v4 = vshrl.u32 %v4010_v57, 16  ;;  %v279_v5 = vshll.u32 %v4010_v57, 16  ;;  %v5089_v9 = vrot.slane %v1806_v31, 4  ;;  %v431_v25 = vld [vmem:[#allocation2 + $0x44] sm:$0x1] }
  0x42   :  { %4412 = vmatpush3.bf16.msra.mxu0 %v4701_v3  ;;  %v284_v7 = vshrl.u32 %v4011_v55, 16  ;;  %v287_v45 = vshll.u32 %v4011_v55, 16  ;;  %v615_v8 = vrot.slane %v613_v59, 5  ;;  %v273_v11 = vor.u32 %v271_v47, %v270_v62  ;;  %v4708_v33 = vld [vmem:[%s5989_s3 + $0x28] sm:$0xff]   ;;  %v434_v39 = vld [vmem:[#allocation2 + $0x58] sm:$0xf] }
  0x43   :  { %4413 = vmatprep.subr.bf16.mxu0 %v4703_v46  ;;  %v274_v12 = vrot.slane %v270_v62, 4  ;;  %v278_v18 = vrot.slane %v276_v4, 7  ;;  %v648_v38 = vrot.slane %v646_v56, 4  ;;  %v651_v3 = vrot.slane %v649_v58, 5  ;;  %v522_v10 = vld [vmem:[#allocation2 + $0x54] sm:$0x1] }
  0x44   :  { %4288 = vmatpush3.bf16.msra.mxu1 %v4704_v22  ;;  %v5094_v35 = vrot.slane %v284_v7, 7  ;;  %v616_v19 = vsel %vm4953_vm8, %v611_v41, %v615_v8  ;;  %v5098_v21 = vrot.slane %v1809_v61, 5  ;;  %v423_v23 = vsel %vm4914_vm6, %v273_v11, %v422_v51  ;;  %v4710_v55 = vld [vmem:[%s5989_s3 + $0x30] sm:$0xff]  }
  0x45   :  { %v426_v24 = vsel %vm4928_vm7, %v274_v12, %v425_v27  ;;  %4289 = vmatprep.subr.bf16.mxu1 %v4706_v42  ;;  %v3701_v0 = vcombine.low %v602_v49, %v616_v19  ;;  %v1721_v37 = vld [vmem:[#allocation2 + $0x30] sm:$0xf]  ;;  %v5112_v40 = vld [vmem:[#allocation2 + $0x34] sm:$0x1]  ;;  %424 = vst [vmem:[#allocation2 + $0x38] sm:$0xf] %v423_v23  ;;  %v281_v36 = vor.u32 %v279_v5, %v278_v18 }
  0x46   :  { %427 = vst [vmem:[#allocation2 + $0x3c] sm:$0x1] %v426_v24  ;;  %v5114_v22 = vld [vmem:[#allocation2 + $0x30] sm:$0xf]  ;;  %4414 = vmatpush3.bf16.msra.mxu0 %v4703_v46  ;;  %v289_v41 = vor.u32 %v287_v45, %v5094_v35  ;;  %v652_v43 = vor.u32 %v651_v3, %v648_v38  ;;  %v1814_v31 = vshrl.u32 %v1721_v37, 16  ;;  %v1817_v32 = vshll.u32 %v1721_v37, 16 }
  0x47   :  { %v1823_v47 = vshll.u32 %v5112_v40, 16  ;;  %v520_v57 = vld [vmem:[#allocation2 + $0x34] sm:$0x1]  ;;  %v618_v48 = vshrl.u32 %v5114_v22, 16  ;;  %4415 = vmatprep.subr.bf16.mxu0 %v4705_v15  ;;  %v437_v49 = vld [vmem:[#allocation2 + $0x5c] sm:$0x1]  ;;  %4269 = vmatprep.mubr.bf16.mxu1 %v3701_v0  ;;  %v429_v46 = vsel %vm4914_vm6, %v281_v36, %v428_v14  ;;  %v5159_v19 = vadd.f32 %v4877_v17, %v5087_v1 }
  0x48   :  { %v621_v50 = vshll.u32 %v5114_v22, 16  ;;  %v627_v51 = vshll.u32 %v520_v57, 16  ;;  %v282_v27 = vrot.slane %v278_v18, 4  ;;  %4290 = vmatpush3.bf16.msra.mxu1 %v4706_v42  ;;  %v1816_v56 = vrot.slane %v1814_v31, 4  ;;  %430 = vst [vmem:[#allocation2 + $0x40] sm:$0xf] %v429_v46 }
  0x49   :  { %v1819_v58 = vrot.slane %v1817_v32, 5  ;;  %v1825_v59 = vrot.slane %v1823_v47, 5  ;;  %v620_v61 = vrot.slane %v618_v48, 4  ;;  %4291 = vmatprep.subr.bf16.mxu1 %v4708_v33  ;;  %v290_v7 = vrot.slane %v5094_v35, 4  ;;  %v5133_v42 = vld [vmem:[%s5990_s0 + $0x28] sm:$0xff]   ;;  %v4712_v18 = vld [vmem:[%s5989_s3 + $0x38] sm:$0xff]  }
  0x4a   :  { %v623_v62 = vrot.slane %v621_v50, 5  ;;  %v5125_v4 = vrot.slane %v627_v51, 5  ;;  %v432_v5 = vsel %vm4928_vm7, %v282_v27, %v431_v25  ;;  %4416 = vmatpush3.bf16.msra.mxu0 %v4705_v15  ;;  %v4709_v45 = vld [vmem:[%s5989_s3 + $0x168] sm:$0xff]   ;;  %v435_v11 = vsel %vm4914_vm6, %v289_v41, %v434_v39  ;;  %v5146_v15 = vld [vmem:[%s5990_s0 + $0x30] sm:$0xff]  }
  0x4b   :  { %v1820_v8 = vor.u32 %v1819_v58, %v1816_v56  ;;  %433 = vst [vmem:[#allocation2 + $0x44] sm:$0x1] %v432_v5  ;;  %v5140_v12 = vrot.slane %v652_v43, 4  ;;  %v655_v14 = vshll.u32 %v522_v10, 16  ;;  %4417 = vmatprep.subr.bf16.mxu0 %v5107_v28  ;;  %v1812_v35 = vsel %vm4953_vm8, %v5089_v9, %v5098_v21  ;;  %436 = vst [vmem:[#allocation2 + $0x58] sm:$0xf] %v435_v11 }
  0x4c   :  { %v624_v38 = vor.u32 %v623_v62, %v620_v61  ;;  %v438_v3 = vsel %vm4928_vm7, %v290_v7, %v437_v49  ;;  %4292 = vmatpush3.bf16.msra.mxu1 %v4708_v33  ;;  %v5161_v24 = vld [vmem:[#allocation2 + $0x38] sm:$0xf]  ;;  %v4041_v37 = vunpack.c.l.bf16 %v5133_v42  ;;  %v4042_v9 = vunpack.c.h.bf16 %v5133_v42  ;;  %v4711_v21 = vld [vmem:[%s5989_s3 + $0x170] sm:$0xff]   ;;  %v5185_v58 = vld [vmem:[%s5989_s3 + $0x80] sm:$0xff]  }
  0x4d   :  { %v1821_v23 = vrot.slane %v1820_v8, 4  ;;  %v521_v25 = vld [vmem:[#allocation2 + $0x3c] sm:$0x1]  ;;  %439 = vst [vmem:[#allocation2 + $0x5c] sm:$0x1] %v438_v3  ;;  %v5163_v0 = vrot.slane %v655_v14, 5  ;;  %4293 = vmatprep.subr.bf16.mxu1 %v4710_v55  ;;  %v4045_v47 = vunpack.c.l.bf16 %v5146_v15 }
  0x4e   :  { %v625_v36 = vrot.slane %v624_v38, 4  ;;  %v632_v1 = vshrl.u32 %v5161_v24, 16  ;;  %v635_v33 = vshll.u32 %v5161_v24, 16  ;;  %v641_v41 = vshll.u32 %v521_v25, 16  ;;  %v1723_v39 = vld [vmem:[#allocation2 + $0x38] sm:$0xf]  ;;  %4418 = vmatpush3.bf16.msra.mxu0 %v5107_v28 }
  0x4f   :  { %v1826_v10 = vsel %vm4953_vm8, %v1821_v23, %v1825_v59  ;;  %v5175_v43 = vld [vmem:[#allocation2 + $0x3c] sm:$0x1]  ;;  %v1828_v31 = vshrl.u32 %v1723_v39, 16  ;;  %v1831_v32 = vshll.u32 %v1723_v39, 16  ;;  %4419 = vmatprep.subr.bf16.mxu0 %v4709_v45  ;;  %v1725_v51 = vld [vmem:[#allocation2 + $0x40] sm:$0xf]  ;;  %v110_v14 = vmul.f32 %v4041_v37, %v4869_v13 }
  0x50   :  { %v3829_v57 = vcombine.low %v1812_v35, %v1826_v10  ;;  %v630_v48 = vsel %vm4953_vm8, %v625_v36, %v5125_v4  ;;  %v634_v49 = vrot.slane %v632_v1, 4  ;;  %v637_v50 = vrot.slane %v635_v33, 5  ;;  %4294 = vmatpush3.bf16.msra.mxu1 %v4710_v55  ;;  %v4713_v35 = vld [vmem:[%s5989_s3 + $0x178] sm:$0xff]  }
  0x51   :  { %v643_v28 = vrot.slane %v641_v41, 5  ;;  %v1830_v27 = vrot.slane %v1828_v31, 4  ;;  %v1833_v46 = vrot.slane %v1831_v32, 5  ;;  %v1837_v56 = vshll.u32 %v5175_v43, 16  ;;  %4295 = vmatprep.subr.bf16.mxu1 %v4712_v18  ;;  %v4097_v42 = vld [vmem:[%s5990_s0 + $0x38] sm:$0xff]  }
  0x52   :  { %4397 = vmatprep.mubr.bf16.mxu0 %v3829_v57  ;;  %v638_v59 = vor.u32 %v637_v50, %v634_v49  ;;  %v5187_v61 = vld [vmem:[#allocation2 + $0x44] sm:$0x1]  ;;  %v1842_v62 = vshrl.u32 %v1725_v51, 16  ;;  %v1845_v4 = vshll.u32 %v1725_v51, 16  ;;  %v148_v5 = vmax.f32 %v5159_v19, 0.0  ;;  %4420 = vmatpush3.bf16.msra.mxu0 %v4709_v45 }
  0x53   :  { %v1834_v55 = vor.u32 %v1833_v46, %v1830_v27  ;;  %v1839_v7 = vrot.slane %v1837_v56, 5  ;;  %v1851_v8 = vshll.u32 %v5187_v61, 16  ;;  %v5191_v11 = vld [vmem:[#allocation2 + $0x58] sm:$0xf]  ;;  %4421 = vmatprep.subr.bf16.mxu0 %v4711_v21  ;;  %v5213_v51 = vld [vmem:[%s5989_s3 + $0x180] sm:$0xff]   ;;  %vm1193_vm10 = vcmask 1046532  }
  0x54   :  { %v639_v38 = vrot.slane %v638_v59, 4  ;;  %v1844_v3 = vrot.slane %v1842_v62, 4  ;;  %v1847_v23 = vrot.slane %v1845_v4, 5  ;;  %v523_v25 = vld [vmem:[#allocation2 + $0x5c] sm:$0x1]  ;;  %v660_v19 = vshrl.u32 %v5191_v11, 16  ;;  %4296 = vmatpush3.bf16.msra.mxu1 %v4712_v18  ;;  %vm5350_vm11 = vmor %vm1192_vm9, %vm1193_vm10 }
  0x55   :  { %v1835_v45 = vrot.slane %v1834_v55, 4  ;;  %v1853_v36 = vrot.slane %v1851_v8, 5  ;;  %v663_v1 = vshll.u32 %v5191_v11, 16  ;;  %v669_v33 = vshll.u32 %v523_v25, 16  ;;  %v1727_v41 = vld [vmem:[#allocation2 + $0x58] sm:$0xf]  ;;  %4313 = vmatprep.subr.bf16.mxu1 %v5185_v58 }
  0x56   :  { %v644_v37 = vsel %vm4953_vm8, %v639_v38, %v643_v28  ;;  %v1848_v39 = vor.u32 %v1847_v23, %v1844_v3  ;;  %v662_v10 = vrot.slane %v660_v19, 4  ;;  %v4012_v31 = vpack.c.bf16 %v148_v5, %v148_v5  ;;  %4422 = vmatpush3.bf16.msra.mxu0 %v4711_v21  ;;  %v5208_v50 = vld [vmem:[#allocation2 + $0x5c] sm:$0x1]  ;;  %v440_v59 = vld [vmem:[#allocation2 + $0x60] sm:$0xf] }
  0x57   :  { %v3702_v32 = vcombine.low %v630_v48, %v644_v37  ;;  %v1840_v57 = vsel %vm4953_vm8, %v1835_v45, %v1839_v7  ;;  %v658_v18 = vsel %vm4953_vm8, %v5140_v12, %v5163_v0  ;;  %v665_v49 = vrot.slane %v663_v1, 5  ;;  %4423 = vmatprep.subr.bf16.mxu0 %v4713_v35  ;;  %v443_v62 = vld [vmem:[#allocation2 + $0x64] sm:$0x1] }
  0x58   :  { %v1849_v28 = vrot.slane %v1848_v39, 4  ;;  %v292_v21 = vshrl.u32 %v4012_v31, 16  ;;  %v295_v48 = vshll.u32 %v4012_v31, 16  ;;  %v1856_v27 = vshrl.u32 %v1727_v41, 16 }
  0x59   :  { %4270 = vmatmul.mubr.bf16.gmra.mrb[4].mxu1 %v3702_v32  ;;  %v666_v46 = vor.u32 %v665_v49, %v662_v10  ;;  %v671_v56 = vrot.slane %v669_v33, 5  ;;  %v1859_v4 = vshll.u32 %v1727_v41, 16  ;;  %v133_v12 = vadd.f32 %v4877_v17, %v110_v14  ;;  %v4778_v14 = vld [vmem:[%s5992_s2] ss:$0 sm:$0xff] }
  0x5a   :  { %v1854_v0 = vsel %vm4953_vm8, %v1849_v28, %v1853_v36  ;;  %v294_v5 = vrot.slane %v292_v21, 7  ;;  %v1865_v55 = vshll.u32 %v5208_v50, 16  ;;  %v111_v7 = vmul.f32 %v4042_v9, %v4869_v13  ;;  %4424 = vmatpush3.bf16.msra.mxu0 %v4713_v35  ;;  %v4779_v9 = vld [vmem:[%s5991_s1] ss:$0 sm:$0xff]  ;;  %v449_v21 = vld [vmem:[#allocation2 + $0x6c] sm:$0x1] }
  0x5b   :  { %v3830_v8 = vcombine.low %v1840_v57, %v1854_v0  ;;  %v667_v38 = vrot.slane %v666_v46, 4  ;;  %v1858_v3 = vrot.slane %v1856_v27, 4  ;;  %v1861_v23 = vrot.slane %v1859_v4, 5  ;;  %4441 = vmatprep.subr.bf16.mxu0 %v5213_v51 }
  0x5c   :  { %v297_v25 = vor.u32 %v295_v48, %v294_v5  ;;  %v298_v19 = vrot.slane %v294_v5, 4  ;;  %v149_v17 = vmax.f32 %v133_v12, 0.0  ;;  %v134_v45 = vadd.f32 %v4778_v14, %v111_v7 }
  0x5d   :  { %4398 = vmatmul.mubr.bf16.gmra.mrb[4].mxu0 %v3830_v8  ;;  %v672_v13 = vsel %vm4953_vm8, %v667_v38, %v671_v56  ;;  %v112_v35 = vmul.f32 %v4779_v9, %v4045_v47  ;;  %v4046_v36 = vunpack.c.h.bf16 %v5146_v15  ;;  %v1862_v39 = vor.u32 %v1861_v23, %v1858_v3  ;;  %v470_v15 = vld [vmem:[#allocation2 + $0x88] sm:$0xf] }
  0x5e   :  { %v3703_v1 = vcombine.low %v658_v18, %v672_v13  ;;  %v441_v33 = vsel %vm4914_vm6, %v297_v25, %v440_v59  ;;  %v444_v41 = vsel %vm4928_vm7, %v298_v19, %v443_v62  ;;  %v4013_v37 = vpack.c.bf16 %v149_v17, %v149_v17  ;;  %v446_v18 = vld [vmem:[#allocation2 + $0x68] sm:$0xf]  ;;  %v452_v19 = vld [vmem:[#allocation2 + $0x70] sm:$0xf]  ;;  %v455_v17 = vld [vmem:[#allocation2 + $0x74] sm:$0x1] }
  0x5f   :  { %442 = vst [vmem:[#allocation2 + $0x60] sm:$0xf] %v441_v33  ;;  %445 = vst [vmem:[#allocation2 + $0x64] sm:$0x1] %v444_v41  ;;  %v150_v10 = vmax.f32 %v134_v45, 0.0  ;;  %v135_v31 = vadd.f32 %v4778_v14, %v112_v35  ;;  %v113_v32 = vmul.f32 %v4779_v9, %v4046_v36  ;;  %v4049_v47 = vunpack.c.l.bf16 %v4097_v42 }
  0x60   :  { %4273 = vmatprep.mubr.bf16.mxu1 %v3703_v1  ;;  %v300_v57 = vshrl.u32 %v4013_v37, 16  ;;  %v303_v49 = vshll.u32 %v4013_v37, 16  ;;  %v4050_v28 = vunpack.c.h.bf16 %v4097_v42  ;;  %v5242_v56 = vrot.slane %v1865_v55, 5 }
  0x61   :  { %v4014_v48 = vpack.c.bf16 %v150_v10, %v150_v10  ;;  %v151_v27 = vmax.f32 %v135_v31, 0.0  ;;  %v136_v46 = vadd.f32 %v4778_v14, %v113_v32  ;;  %v114_v62 = vmul.f32 %v4779_v9, %v4049_v47 }
  0x62   :  { %v302_v59 = vrot.slane %v300_v57, 7  ;;  %v115_v4 = vmul.f32 %v4779_v9, %v4050_v28  ;;  %v5244_v12 = vrot.slane %v1862_v39, 4  ;;  %v6004_v63 = vrot.slane %v4984_v2, 5 }
  0x63   :  { %v308_v0 = vshrl.u32 %v4014_v48, 16  ;;  %v4015_v5 = vpack.c.bf16 %v151_v27, %v151_v27  ;;  %v152_v7 = vmax.f32 %v136_v46, 0.0  ;;  %v311_v3 = vshll.u32 %v4014_v48, 16 }
  0x64   :  { %v305_v8 = vor.u32 %v303_v49, %v302_v59  ;;  %v306_v38 = vrot.slane %v302_v59, 4  ;;  %v137_v23 = vadd.f32 %v4778_v14, %v114_v62  ;;  %v138_v55 = vadd.f32 %v4778_v14, %v115_v4 }
  0x65   :  { %v310_v25 = vrot.slane %v308_v0, 7  ;;  %v316_v45 = vshrl.u32 %v4015_v5, 16  ;;  %v5246_v42 = vpack.c.bf16 %v152_v7, %v152_v7  ;;  %v319_v48 = vshll.u32 %v4015_v5, 16 }
  0x66   :  { %v1729_v13 = vld [vmem:[#allocation2 + $0x60] sm:$0xf]  ;;  %v5248_v35 = vld [vmem:[#allocation2 + $0x64] sm:$0x1]  ;;  %v447_v9 = vsel %vm4914_vm6, %v305_v8, %v446_v18  ;;  %v450_v36 = vsel %vm4928_vm7, %v306_v38, %v449_v21  ;;  %v1868_v27 = vsel %vm4953_vm8, %v5244_v12, %v5242_v56 }
  0x67   :  { %v5254_v1 = vld [vmem:[#allocation2 + $0x60] sm:$0xf]  ;;  %v1870_v37 = vshrl.u32 %v1729_v13, 16  ;;  %v1873_v39 = vshll.u32 %v1729_v13, 16  ;;  %v1879_v14 = vshll.u32 %v5248_v35, 16  ;;  %v313_v49 = vor.u32 %v311_v3, %v310_v25 }
  0x68   :  { %448 = vst [vmem:[#allocation2 + $0x68] sm:$0xf] %v447_v9  ;;  %451 = vst [vmem:[#allocation2 + $0x6c] sm:$0x1] %v450_v36  ;;  %v5261_v10 = vld [vmem:[#allocation2 + $0x64] sm:$0x1] }
  0x69   :  { %v674_v31 = vshrl.u32 %v5254_v1, 16  ;;  %v677_v32 = vshll.u32 %v5254_v1, 16  ;;  %v683_v57 = vshll.u32 %v5261_v10, 16  ;;  %v314_v47 = vrot.slane %v310_v25, 4  ;;  %v458_v9 = vld [vmem:[#allocation2 + $0x78] sm:$0xf] }
  0x6a   :  { %v1872_v28 = vrot.slane %v1870_v37, 4  ;;  %v1875_v18 = vrot.slane %v1873_v39, 5  ;;  %v453_v59 = vsel %vm4914_vm6, %v313_v49, %v452_v19  ;;  %v1881_v0 = vrot.slane %v1879_v14, 5  ;;  %v461_v19 = vld [vmem:[#allocation2 + $0x7c] sm:$0x1] }
  0x6b   :  { %v676_v21 = vrot.slane %v674_v31, 4  ;;  %v679_v46 = vrot.slane %v677_v32, 5  ;;  %v456_v62 = vsel %vm4928_vm7, %v314_v47, %v455_v17  ;;  %454 = vst [vmem:[#allocation2 + $0x70] sm:$0xf] %v453_v59  ;;  %v318_v7 = vrot.slane %v316_v45, 7 }
  0x6c   :  { %v1876_v4 = vor.u32 %v1875_v18, %v1872_v28  ;;  %457 = vst [vmem:[#allocation2 + $0x74] sm:$0x1] %v456_v62  ;;  %v324_v8 = vshrl.u32 %v5246_v42, 16  ;;  %v5275_v38 = vrot.slane %v683_v57, 5  ;;  %v153_v3 = vmax.f32 %v137_v23, 0.0 }
  0x6d   :  { %v680_v5 = vor.u32 %v679_v46, %v676_v21  ;;  %v154_v25 = vmax.f32 %v138_v55, 0.0  ;;  %v321_v12 = vor.u32 %v319_v48, %v318_v7  ;;  %v322_v13 = vrot.slane %v318_v7, 4 }
  0x6e   :  { %v1877_v56 = vrot.slane %v1876_v4, 4  ;;  %v327_v36 = vshll.u32 %v5246_v42, 16  ;;  %v5282_v45 = vrot.slane %v324_v8, 7  ;;  %v5284_v14 = vpack.c.bf16 %v153_v3, %v153_v3 }
  0x6f   :  { %v5278_v17 = vld [vmem:[#allocation2 + $0x68] sm:$0xf]  ;;  %v5280_v37 = vld [vmem:[#allocation2 + $0x6c] sm:$0x1]  ;;  %v681_v39 = vrot.slane %v680_v5, 4  ;;  %v5286_v31 = vpack.c.bf16 %v154_v25, %v154_v25  ;;  %v462_v5 = vsel %vm4928_vm7, %v322_v13, %v461_v19 }
  0x70   :  { %v1882_v23 = vsel %vm4953_vm8, %v1877_v56, %v1881_v0  ;;  %v688_v55 = vshrl.u32 %v5278_v17, 16  ;;  %v691_v32 = vshll.u32 %v5278_v17, 16  ;;  %v697_v42 = vshll.u32 %v5280_v37, 16  ;;  %v1731_v57 = vld [vmem:[#allocation2 + $0x68] sm:$0xf] }
  0x71   :  { %v3831_v49 = vcombine.low %v1868_v27, %v1882_v23  ;;  %v686_v47 = vsel %vm4953_vm8, %v681_v39, %v5275_v38  ;;  %v5296_v28 = vld [vmem:[#allocation2 + $0x6c] sm:$0x1]  ;;  %v1884_v18 = vshrl.u32 %v1731_v57, 16  ;;  %v1887_v21 = vshll.u32 %v1731_v57, 16  ;;  %463 = vst [vmem:[#allocation2 + $0x7c] sm:$0x1] %v462_v5 }
  0x72   :  { %v690_v48 = vrot.slane %v688_v55, 4  ;;  %v693_v46 = vrot.slane %v691_v32, 5  ;;  %v699_v59 = vrot.slane %v697_v42, 5  ;;  %v1893_v62 = vshll.u32 %v5296_v28, 16  ;;  %v1733_v4 = vld [vmem:[#allocation2 + $0x70] sm:$0xf] }
  0x73   :  { %4401 = vmatprep.mubr.bf16.mxu0 %v3831_v49  ;;  %v5299_v0 = vld [vmem:[#allocation2 + $0x74] sm:$0x1]  ;;  %v1886_v7 = vrot.slane %v1884_v18, 4  ;;  %v1889_v8 = vrot.slane %v1887_v21, 5  ;;  %v459_v27 = vsel %vm4914_vm6, %v321_v12, %v458_v9  ;;  %v1898_v25 = vshrl.u32 %v1733_v4, 16 }
  0x74   :  { %v694_v38 = vor.u32 %v693_v46, %v690_v48  ;;  %v1895_v3 = vrot.slane %v1893_v62, 5  ;;  %v1901_v56 = vshll.u32 %v1733_v4, 16  ;;  %460 = vst [vmem:[#allocation2 + $0x78] sm:$0xf] %v459_v27  ;;  %v5305_v39 = vld [vmem:[#allocation2 + $0x70] sm:$0xf] }
  0x75   :  { %v1890_v23 = vor.u32 %v1889_v8, %v1886_v7  ;;  %v1907_v55 = vshll.u32 %v5299_v0, 16  ;;  %v5308_v32 = vld [vmem:[#allocation2 + $0x74] sm:$0x1]  ;;  %v702_v42 = vshrl.u32 %v5305_v39, 16  ;;  %v705_v12 = vshll.u32 %v5305_v39, 16 }
  0x76   :  { %v695_v9 = vrot.slane %v694_v38, 4  ;;  %v1900_v57 = vrot.slane %v1898_v25, 4  ;;  %v1903_v13 = vrot.slane %v1901_v56, 5  ;;  %v711_v19 = vshll.u32 %v5308_v32, 16  ;;  %v464_v49 = vld [vmem:[#allocation2 + $0x80] sm:$0xf] }
  0x77   :  { %v1891_v18 = vrot.slane %v1890_v23, 4  ;;  %v704_v21 = vrot.slane %v702_v42, 4  ;;  %v707_v48 = vrot.slane %v705_v12, 5  ;;  %v467_v46 = vld [vmem:[#allocation2 + $0x84] sm:$0x1]  ;;  %v1909_v7 = vrot.slane %v1907_v55, 5 }
  0x78   :  { %v700_v62 = vsel %vm4953_vm8, %v695_v9, %v699_v59  ;;  %v1904_v4 = vor.u32 %v1903_v13, %v1900_v57  ;;  %v329_v8 = vor.u32 %v327_v36, %v5282_v45  ;;  %v5316_v38 = vrot.slane %v711_v19, 5  ;;  %v5326_v55 = vld [vmem:[#allocation2 + $0x7c] sm:$0x1] }
  0x79   :  { %v3704_v27 = vcombine.low %v686_v47, %v700_v62  ;;  %v708_v5 = vor.u32 %v707_v48, %v704_v21  ;;  %v330_v25 = vrot.slane %v5282_v45, 4  ;;  %v1896_v56 = vsel %vm4953_vm8, %v1891_v18, %v1895_v3  ;;  %v2177_v3 = vld [vmem:[#allocation2 + $0x8] sm:$0xe] }
  0x7a   :  { %v1905_v23 = vrot.slane %v1904_v4, 4  ;;  %v465_v42 = vsel %vm4914_vm6, %v329_v8, %v464_v49  ;;  %v332_v12 = vshrl.u32 %v5284_v14, 16  ;;  %v335_v45 = vshll.u32 %v5284_v14, 16  ;;  %v5339_v14 = vld [vmem:[#allocation2 + $0x7c] sm:$0x1] }
  0x7b   :  { %4274 = vmatmul.mubr.bf16.gmra.mrb[8].mxu1 %v3704_v27  ;;  %v5324_v59 = vld [vmem:[#allocation2 + $0x78] sm:$0xf]  ;;  %466 = vst [vmem:[#allocation2 + $0x80] sm:$0xf] %v465_v42  ;;  %v468_v36 = vsel %vm4928_vm7, %v330_v25, %v467_v46  ;;  %v340_v47 = vshrl.u32 %v5286_v31, 16  ;;  %v725_v49 = vshll.u32 %v5326_v55, 16 }
  0x7c   :  { %v1910_v57 = vsel %vm4953_vm8, %v1905_v23, %v1909_v7  ;;  %v716_v13 = vshrl.u32 %v5324_v59, 16  ;;  %v719_v19 = vshll.u32 %v5324_v59, 16  ;;  %469 = vst [vmem:[#allocation2 + $0x84] sm:$0x1] %v468_v36  ;;  %v1735_v18 = vld [vmem:[#allocation2 + $0x78] sm:$0xf] }
  0x7d   :  { %v3832_v21 = vcombine.low %v1896_v56, %v1910_v57  ;;  %v709_v48 = vrot.slane %v708_v5, 4  ;;  %v1912_v46 = vshrl.u32 %v1735_v18, 16  ;;  %v1915_v62 = vshll.u32 %v1735_v18, 16  ;;  %v2178_v4 = vld [vmem:[#allocation2 + $0x10] sm:$0xe] }
  0x7e   :  { %v718_v8 = vrot.slane %v716_v13, 4  ;;  %v721_v27 = vrot.slane %v719_v19, 5  ;;  %v727_v25 = vrot.slane %v725_v49, 5  ;;  %v1921_v7 = vshll.u32 %v5339_v14, 16 }
  0x7f   :  { %4402 = vmatmul.mubr.bf16.gmra.mrb[8].mxu0 %v3832_v21  ;;  %v1914_v23 = vrot.slane %v1912_v46, 4  ;;  %v1917_v42 = vrot.slane %v1915_v62, 5  ;;  %v334_v9 = vrot.slane %v332_v12, 7  ;;  %v342_v41 = vrot.slane %v340_v47, 7  ;;  %v476_v47 = vld [vmem:[#allocation2 + $0x90] sm:$0xf] }
  0x80   :  { %v722_v33 = vor.u32 %v721_v27, %v718_v8  ;;  %v1923_v36 = vrot.slane %v1921_v7, 5  ;;  %v343_v5 = vshll.u32 %v5286_v31, 16  ;;  %v3843_v56 = vrot.slane %v2177_v3, 9  ;;  %v479_v62 = vld [vmem:[#allocation2 + $0x94] sm:$0x1] }
  0x81   :  { %v1918_v57 = vor.u32 %v1917_v42, %v1914_v23  ;;  %v337_v34 = vor.u32 %v335_v45, %v334_v9  ;;  %v338_v18 = vrot.slane %v334_v9, 4  ;;  %v346_v13 = vrot.slane %v342_v41, 4  ;;  %v2180_v42 = vld [vmem:[#allocation2 + $0x20] sm:$0xe] }
  0x82   :  { %v714_v19 = vsel %vm4953_vm8, %v709_v48, %v5316_v38  ;;  %v723_v49 = vrot.slane %v722_v33, 4  ;;  %v1737_v21 = vld [vmem:[#allocation2 + $0x80] sm:$0xf]  ;;  %v345_v12 = vor.u32 %v343_v5, %v342_v41  ;;  %v3844_v45 = vrot.slane %v2178_v4, 9  ;;  %v2179_v38 = vld [vmem:[#allocation2 + $0x18] sm:$0xe] }
  0x83   :  { %v5346_v46 = vld [vmem:[#allocation2 + $0x80] sm:$0xf]  ;;  %v5354_v3 = vld [vmem:[#allocation2 + $0x84] sm:$0x1]  ;;  %v1919_v9 = vrot.slane %v1918_v57, 4  ;;  %v1926_v8 = vshrl.u32 %v1737_v21, 16  ;;  %v471_v33 = vsel %vm4914_vm6, %v337_v34, %v470_v15  ;;  %v474_v7 = vsel %vm4928_vm7, %v338_v18, %v473_v44 }
  0x84   :  { %v1929_v27 = vshll.u32 %v1737_v21, 16  ;;  %v728_v41 = vsel %vm4953_vm8, %v723_v49, %v727_v25  ;;  %v1935_v48 = vshll.u32 %v5354_v3, 16  ;;  %472 = vst [vmem:[#allocation2 + $0x88] sm:$0xf] %v471_v33  ;;  %v5363_v23 = vld [vmem:[#allocation2 + $0x84] sm:$0x1]  ;;  %v5370_v34 = vsel %vm5350_vm11, %v3843_v56, %v2227_v53 }
  0x85   :  { %v730_v4 = vshrl.u32 %v5346_v46, 16  ;;  %v3705_v5 = vcombine.low %v714_v19, %v728_v41  ;;  %v1928_v57 = vrot.slane %v1926_v8, 4  ;;  %475 = vst [vmem:[#allocation2 + $0x8c] sm:$0x1] %v474_v7  ;;  %v733_v49 = vshll.u32 %v5346_v46, 16 }
  0x86   :  { %v1931_v21 = vrot.slane %v1929_v27, 5  ;;  %v1937_v15 = vrot.slane %v1935_v48, 5  ;;  %v739_v44 = vshll.u32 %v5363_v23, 16  ;;  %v477_v19 = vsel %vm4914_vm6, %v345_v12, %v476_v47 }
  0x87   :  { %v732_v25 = vrot.slane %v730_v4, 4  ;;  %4277 = vmatprep.mubr.bf16.mxu1 %v3705_v5  ;;  %v480_v8 = vsel %vm4928_vm7, %v346_v13, %v479_v62  ;;  %v5382_v53 = vsel %vm5350_vm11, %v3844_v45, %v6004_v63  ;;  %v735_v56 = vrot.slane %v733_v49, 5  ;;  %478 = vst [vmem:[#allocation2 + $0x90] sm:$0xf] %v477_v19  ;;  %v2183_v62 = vld [vmem:[#allocation2 + $0x38] sm:$0xe] }
  0x88   :  { %v1932_v18 = vor.u32 %v1931_v21, %v1928_v57  ;;  %481 = vst [vmem:[#allocation2 + $0x94] sm:$0x1] %v480_v8  ;;  %v3875_v27 = vcombine.low %v5370_v34, %v5382_v53  ;;  %v3845_v33 = vrot.slane %v2179_v38, 9  ;;  %v1924_v54 = vsel %vm4953_vm8, %v1919_v9, %v1923_v36  ;;  %v5453_v53 = vld [vmem:[#allocation2 + $0x70] sm:$0xe] }
  0x89   :  { %v3846_v47 = vrot.slane %v2180_v42, 9  ;;  %v736_v60 = vor.u32 %v735_v56, %v732_v25  ;;  %v6005_v13 = vrot.slane %v5011_v52, 5  ;;  %v741_v48 = vrot.slane %v739_v44, 5 }
  0x8a   :  { %v1933_v12 = vrot.slane %v1932_v18, 4  ;;  %v6006_v7 = vrot.slane %v5017_v6, 5  ;;  %v2184_v18 = vld [vmem:[#allocation2 + $0x40] sm:$0xe]  ;;  %v3849_v19 = vrot.slane %v2183_v62, 9 }
  0x8b   :  { %v5392_v2 = vsel %vm5350_vm11, %v3845_v33, %v6005_v13  ;;  %v5396_v41 = vld [vmem:[#allocation2 + $0x88] sm:$0xf]  ;;  %v737_v4 = vrot.slane %v736_v60, 4 }
  0x8c   :  { %v1938_v45 = vsel %vm4953_vm8, %v1933_v12, %v1937_v15  ;;  %v1739_v38 = vld [vmem:[#allocation2 + $0x88] sm:$0xf]  ;;  %v5402_v36 = vsel %vm5350_vm11, %v3846_v47, %v6006_v7  ;;  %v5404_v52 = vld [vmem:[#allocation2 + $0x8c] sm:$0x1]  ;;  %v744_v42 = vshrl.u32 %v5396_v41, 16  ;;  %v747_v5 = vshll.u32 %v5396_v41, 16 }
  0x8d   :  { %v3833_v9 = vcombine.low %v1924_v54, %v1938_v45  ;;  %v753_v57 = vshll.u32 %v5404_v52, 16  ;;  %v5409_v21 = vld [vmem:[#allocation2 + $0x8c] sm:$0x1]  ;;  %v1940_v15 = vshrl.u32 %v1739_v38, 16  ;;  %v1943_v25 = vshll.u32 %v1739_v38, 16 }
  0x8e   :  { %v746_v49 = vrot.slane %v744_v42, 4  ;;  %v749_v44 = vrot.slane %v747_v5, 5  ;;  %v1741_v8 = vld [vmem:[#allocation2 + $0x90] sm:$0xf]  ;;  %v1949_v33 = vshll.u32 %v5409_v21, 16  ;;  %v742_v13 = vsel %vm4953_vm8, %v737_v4, %v741_v48 }
  0x8f   :  { %4405 = vmatprep.mubr.bf16.mxu0 %v3833_v9  ;;  %v5413_v63 = vld [vmem:[#allocation2 + $0x94] sm:$0x1]  ;;  %v1942_v56 = vrot.slane %v1940_v15, 4  ;;  %v755_v12 = vrot.slane %v753_v57, 5  ;;  %v1945_v47 = vrot.slane %v1943_v25, 5  ;;  %v1954_v60 = vshrl.u32 %v1741_v8, 16 }
  0x90   :  { %v750_v54 = vor.u32 %v749_v44, %v746_v49  ;;  %v1957_v45 = vshll.u32 %v1741_v8, 16  ;;  %v1963_v38 = vshll.u32 %v5413_v63, 16  ;;  %v2251_v7 = vrot.slane %v5175_v43, 5  ;;  %v4780_v25 = vld [vmem:[#allocation2] sm:$0xf] }
  0x91   :  { %v1946_v62 = vor.u32 %v1945_v47, %v1942_v56  ;;  %v1956_v42 = vrot.slane %v1954_v60, 4  ;;  %v3850_v5 = vrot.slane %v2184_v18, 9  ;;  %v1951_v6 = vrot.slane %v1949_v33, 5  ;;  %v4781_v44 = vld [vmem:[#allocation2 + $0x8] sm:$0xf] }
  0x92   :  { %v751_v9 = vrot.slane %v750_v54, 4  ;;  %v1959_v15 = vrot.slane %v1957_v45, 5  ;;  %v5422_v49 = vsel %vm5350_vm11, %v3849_v19, %v2251_v7  ;;  %v2255_v57 = vrot.slane %v5187_v61, 5  ;;  %v4782_v33 = vld [vmem:[#allocation2 + $0x4] sm:$0x1] }
  0x93   :  { %v1947_v4 = vrot.slane %v1946_v62, 4  ;;  %v3715_v8 = vcombine.low %v4780_v25, %v4781_v44  ;;  %v1965_v56 = vrot.slane %v1963_v38, 5  ;;  %v1197_v47 = vrot.slane %v4782_v33, 5  ;;  %v4783_v19 = vld [vmem:[#allocation2 + $0xc] sm:$0x1] }
  0x94   :  { %v756_v48 = vsel %vm4953_vm8, %v751_v9, %v755_v12  ;;  %v1960_v54 = vor.u32 %v1959_v15, %v1956_v42  ;;  %v5429_v18 = vsel %vm5350_vm11, %v3850_v5, %v2255_v57  ;;  %v1201_v60 = vrot.slane %v4783_v19, 5  ;;  %v4784_v45 = vld [vmem:[#allocation2 + $0x14] sm:$0x1]  ;;  %v4785_v7 = vld [vmem:[#allocation2 + $0x1c] sm:$0x1] }
  0x95   :  { %v3706_v43 = vcombine.low %v742_v13, %v756_v48  ;;  %v1205_v61 = vrot.slane %v4784_v45, 5  ;;  %v3878_v12 = vcombine.low %v5422_v49, %v5429_v18  ;;  %v1209_v9 = vrot.slane %v4785_v7, 5  ;;  %v2181_v62 = vld [vmem:[#allocation2 + $0x28] sm:$0xe]  ;;  %v2182_v42 = vld [vmem:[#allocation2 + $0x30] sm:$0xe] }
  0x96   :  { %v1952_v13 = vsel %vm4953_vm8, %v1947_v4, %v1951_v6  ;;  %v1961_v38 = vrot.slane %v1960_v54, 4  ;;  %v1144_v15 = vld [vmem:[#allocation2] sm:$0xe]  ;;  %v1145_v57 = vld [vmem:[#allocation2 + $0x8] sm:$0xe]  ;;  %v3847_v25 = vrot.slane %v2181_v62, 9 }
  0x97   :  { %4278 = vmatmul.mubr.bf16.gmra.mrb[12].mxu1 %v3706_v43  ;;  %v4786_v44 = vld [vmem:[#allocation2 + $0x2c] sm:$0x1]  ;;  %v1146_v19 = vld [vmem:[#allocation2 + $0x10] sm:$0xe]  ;;  %v3848_v45 = vrot.slane %v2182_v42, 9  ;;  %v2247_v43 = vrot.slane %v5112_v40, 5  ;;  %v6007_v42 = vcombine.low %v4991_v16, %v4997_v30  ;;  %v6008_v30 = vcombine.low %v5020_v20, %v5023_v26 }
  0x98   :  { %4297 = vmatprep.mubr.bf16.mxu1 %v3715_v8  ;;  %v1966_v5 = vsel %vm4953_vm8, %v1961_v38, %v1965_v56  ;;  %v2243_v33 = vrot.slane %v4786_v44, 5  ;;  %v1147_v7 = vld [vmem:[#allocation2 + $0x18] sm:$0xe]  ;;  %v2186_v4 = vld [vmem:[#allocation2 + $0x60] sm:$0xe]  ;;  %v4718_v8 = vld [vmem:[%s5989_s3 + $0x88] sm:$0xff]  }
  0x99   :  { %v3834_v48 = vcombine.low %v1952_v13, %v1966_v5  ;;  %v2185_v6 = vld [vmem:[#allocation2 + $0x58] sm:$0xe]  ;;  %v5444_v54 = vld [vmem:[#allocation2 + $0x68] sm:$0xe]  ;;  %v3731_v56 = vrot.slane %v1144_v15, 9  ;;  %v3732_v13 = vrot.slane %v1145_v57, 9  ;;  %v2248_v34 = vsel %vm5350_vm11, %v3848_v45, %v2247_v43 }
  0x9a   :  { %v3733_v38 = vrot.slane %v1146_v19, 9  ;;  %v2244_v40 = vsel %vm5350_vm11, %v3847_v25, %v2243_v33  ;;  %v3734_v62 = vrot.slane %v1147_v7, 9  ;;  %v4719_v16 = vld [vmem:[%s5989_s3 + $0x188] sm:$0xff]   ;;  %v2259_v57 = vrot.slane %v5208_v50, 5  ;;  %v4724_v45 = vld [vmem:[%s5989_s3 + $0x98] sm:$0xff]  }
  0x9b   :  { %4406 = vmatmul.mubr.bf16.gmra.mrb[12].mxu0 %v3834_v48  ;;  %v5461_v5 = vsel %vm5350_vm11, %v3732_v13, %v1201_v60  ;;  %v5475_v48 = vld [vmem:[#allocation2 + $0x78] sm:$0xe]  ;;  %v3852_v25 = vrot.slane %v2186_v4, 9  ;;  %v2263_v20 = vrot.slane %v5248_v35, 5  ;;  %v3853_v26 = vrot.slane %v5444_v54, 9 }
  0x9c   :  { %4425 = vmatprep.mubr.bf16.mxu0 %v3875_v27  ;;  %v5457_v27 = vsel %vm5350_vm11, %v3731_v56, %v1197_v47  ;;  %v5465_v15 = vsel %vm5350_vm11, %v3733_v38, %v1205_v61  ;;  %v3851_v47 = vrot.slane %v2185_v6, 9  ;;  %v5481_v61 = vsel %vm5350_vm11, %v3734_v62, %v1209_v9  ;;  %v1154_v9 = vld [vmem:[#allocation2 + $0x60] sm:$0xe]  ;;  %v1155_v43 = vld [vmem:[#allocation2 + $0x68] sm:$0xe]  ;;  %v4722_v6 = vld [vmem:[%s5989_s3 + $0x190] sm:$0xff]  }
  0x9d   :  { %v3763_v60 = vcombine.low %v5457_v27, %v5461_v5  ;;  %v3764_v50 = vcombine.low %v5465_v15, %v5481_v61  ;;  %v3877_v44 = vcombine.low %v2244_v40, %v2248_v34  ;;  %v2267_v33 = vrot.slane %v5296_v28, 5  ;;  %v1156_v7 = vld [vmem:[#allocation2 + $0x70] sm:$0xe]  ;;  %v1157_v38 = vld [vmem:[#allocation2 + $0x78] sm:$0xe]  ;;  %v4742_v5 = vld [vmem:[%s5989_s3 + $0xc8] sm:$0xff]  }
  0x9e   :  { %v3854_v19 = vrot.slane %v5453_v53, 9  ;;  %v6009_v35 = vcombine.low %v5392_v2, %v5402_v36  ;;  %v4787_v4 = vld [vmem:[#allocation2 + $0x50] sm:$0xf]  ;;  %v2271_v56 = vrot.slane %v5299_v0, 5  ;;  %v3855_v13 = vrot.slane %v5475_v48, 9 }
  0x9f   :  { %4298 = vmatmul.mubr.bf16.vlgmr.msra.gmra.mrb[0].mxu1 %v6007_v42  ;;  %v3719_v28 = vcombine.low %v4787_v4, %v5191_v11  ;;  %v2260_v2 = vsel %vm5350_vm11, %v3851_v47, %v2259_v57  ;;  %v3720_v36 = vcombine.low %v5254_v1, %v5278_v17  ;;  %v1237_v40 = vrot.slane %v5261_v10, 5  ;;  %v1158_v62 = vld [vmem:[#allocation2 + $0x80] sm:$0xe]  ;;  %v2191_v49 = vld [vmem:[#allocation2 + $0x88] sm:$0xe] }
  0xa0   :  { %4314 = vmatpush3.bf16.msra.mxu1 %v5185_v58  ;;  %4301 = vmatprep.mubr.bf16.mxu1 %v6008_v30  ;;  %v4721_v58 = vld [vmem:[%s5989_s3 + $0x90] sm:$0xff]   ;;  %v2275_v11 = vrot.slane %v5339_v14, 5  ;;  %v3742_v0 = vrot.slane %v1155_v43, 9  ;;  %v1241_v42 = vrot.slane %v5280_v37, 5  ;;  %v3743_v34 = vrot.slane %v1156_v7, 9  ;;  %v4725_v37 = vld [vmem:[%s5989_s3 + $0x198] sm:$0xff]  }
  0xa1   :  { %4315 = vmatprep.subr.bf16.mxu1 %v4718_v8  ;;  %v6010_v53 = vcombine.low %v5114_v22, %v5161_v24  ;;  %v2264_v1 = vsel %vm5350_vm11, %v3852_v25, %v2263_v20  ;;  %v1245_v17 = vrot.slane %v5308_v32, 5  ;;  %v3744_v30 = vrot.slane %v1157_v38, 9  ;;  %v4727_v22 = vld [vmem:[%s5989_s3 + $0xa0] sm:$0xff]   ;;  %v2192_v18 = vld [vmem:[#allocation2 + $0x90] sm:$0xe] }
  0xa2   :  { %v2190_v24 = vld [vmem:[#allocation2 + $0x80] sm:$0xe]  ;;  %v5530_v14 = vsel %vm5350_vm11, %v3742_v0, %v1241_v42  ;;  %v1249_v47 = vrot.slane %v5326_v55, 5  ;;  %v3745_v57 = vrot.slane %v1158_v62, 9  ;;  %v1253_v32 = vrot.slane %v5363_v23, 5 }
  0xa3   :  { %4426 = vmatmul.mubr.bf16.vlgmr.msra.gmra.mrb[0].mxu0 %v6009_v35  ;;  %v1257_v20 = vrot.slane %v5404_v52, 5  ;;  %v3721_v55 = vcombine.low %v5305_v39, %v5324_v59  ;;  %v2279_v43 = vrot.slane %v5354_v3, 5  ;;  %v2268_v39 = vsel %vm5350_vm11, %v3853_v26, %v2267_v33  ;;  %v4730_v3 = vld [vmem:[%s5989_s3 + $0xa8] sm:$0xff]   ;;  %v1148_v38 = vld [vmem:[#allocation2 + $0x20] sm:$0xe] }
  0xa4   :  { %4316 = vmatpush3.bf16.msra.mxu1 %v4718_v8  ;;  %4442 = vmatpush3.bf16.msra.mxu0 %v5213_v51  ;;  %v3741_v8 = vrot.slane %v1154_v9, 9  ;;  %v1159_v51 = vld [vmem:[#allocation2 + $0x88] sm:$0xe]  ;;  %v5545_v23 = vsel %vm5350_vm11, %v3744_v30, %v1249_v47  ;;  %v3856_v9 = vrot.slane %v2190_v24, 9  ;;  %v2272_v59 = vsel %vm5350_vm11, %v3854_v19, %v2271_v56  ;;  %v4733_v56 = vld [vmem:[%s5989_s3 + $0xb0] sm:$0xff]  }
  0xa5   :  { %4317 = vmatprep.subr.bf16.mxu1 %v4721_v58  ;;  %4443 = vmatprep.subr.bf16.mxu0 %v4719_v16  ;;  %v3746_v25 = vrot.slane %v1159_v51, 9  ;;  %v3880_v54 = vcombine.low %v2268_v39, %v2272_v59  ;;  %v2276_v26 = vsel %vm5350_vm11, %v3855_v13, %v2275_v11  ;;  %v3857_v19 = vrot.slane %v2191_v49, 9  ;;  %v4788_v62 = vld [vmem:[#allocation2 + $0x24] sm:$0x1]  ;;  %v4789_v42 = vld [vmem:[#allocation2 + $0x2c] sm:$0x1] }
  0xa6   :  { %4429 = vmatprep.mubr.bf16.mxu0 %v3877_v44  ;;  %v5519_v10 = vsel %vm5350_vm11, %v3741_v8, %v1237_v40  ;;  %v3879_v44 = vcombine.low %v2260_v2, %v2264_v1  ;;  %v2280_v33 = vsel %vm5350_vm11, %v3856_v9, %v2279_v43  ;;  %v2287_v4 = vrot.slane %v5413_v63, 5  ;;  %v1149_v2 = vld [vmem:[#allocation2 + $0x28] sm:$0xe]  ;;  %v4736_v8 = vld [vmem:[%s5989_s3 + $0xb8] sm:$0xff]   ;;  %v1150_v1 = vld [vmem:[#allocation2 + $0x30] sm:$0xe] }
  0xa7   :  { %4302 = vmatmul.mubr.bf16.gmra.mrb[4].mxu1 %v6010_v53  ;;  %v3768_v48 = vcombine.low %v5519_v10, %v5530_v14  ;;  %v5556_v52 = vsel %vm5350_vm11, %v3746_v25, %v1257_v20  ;;  %v3881_v13 = vcombine.low %v2276_v26, %v2280_v33  ;;  %v3735_v40 = vrot.slane %v1148_v38, 9  ;;  %v4737_v51 = vld [vmem:[%s5989_s3 + $0x1b8] sm:$0xff]   ;;  %v4738_v53 = vld [vmem:[%s5989_s3 + $0xc0] sm:$0xff]   ;;  %v1152_v24 = vld [vmem:[#allocation2 + $0x50] sm:$0xe] }
  0xa8   :  { %4318 = vmatpush3.bf16.msra.mxu1 %v4721_v58  ;;  %4305 = vmatprep.mubr.bf16.mxu1 %v3719_v28  ;;  %v5538_v58 = vsel %vm5350_vm11, %v3743_v34, %v1245_v17  ;;  %v4731_v28 = vld [vmem:[%s5989_s3 + $0x1a8] sm:$0xff]   ;;  %v1213_v11 = vrot.slane %v4788_v62, 5  ;;  %v3736_v0 = vrot.slane %v1149_v2, 9  ;;  %v4739_v17 = vld [vmem:[#allocation2 + $0x10] ss:$8 sps:$4 sm:$0xff]   ;;  %v3737_v27 = vrot.slane %v1150_v1, 9 }
  0xa9   :  { %4444 = vmatpush3.bf16.msra.mxu0 %v4719_v16  ;;  %4319 = vmatprep.subr.bf16.mxu1 %v4724_v45  ;;  %v5549_v16 = vsel %vm5350_vm11, %v3745_v57, %v1253_v32  ;;  %v3769_v7 = vcombine.low %v5538_v58, %v5545_v23  ;;  %v1153_v47 = vld [vmem:[#allocation2 + $0x58] sm:$0xe]  ;;  %v4790_v57 = vld [vmem:[#allocation2 + $0x34] sm:$0x1]  ;;  %v4791_v20 = vld [vmem:[#allocation2 + $0x3c] sm:$0x1] }
  0xaa   :  { %4445 = vmatprep.subr.bf16.mxu0 %v4722_v6  ;;  %v3770_v35 = vcombine.low %v5549_v16, %v5556_v52  ;;  %v1214_v30 = vsel %vm5350_vm11, %v3735_v40, %v1213_v11  ;;  %v1221_v32 = vrot.slane %v4790_v57, 5  ;;  %v4792_v9 = vld [vmem:[#allocation2 + $0x54] sm:$0x1]  ;;  %v3740_v39 = vrot.slane %v1153_v47, 9  ;;  %v4793_v59 = vld [vmem:[#allocation2 + $0x5c] sm:$0x1] }
  0xab   :  { %4430 = vmatmul.mubr.bf16.gmra.mrb[4].mxu0 %v3878_v12  ;;  %v4728_v12 = vld [vmem:[%s5989_s3 + $0x1a0] sm:$0xff]   ;;  %v1229_v43 = vrot.slane %v4792_v9, 5  ;;  %v2742_v49 = vld [vmem:[#allocation2 + $0x10] sm:$0xf]  ;;  %v5635_v38 = vld [vmem:[#allocation2 + $0x14] sm:$0x1] }
  0xac   :  { %4320 = vmatpush3.bf16.msra.mxu1 %v4724_v45  ;;  %4433 = vmatprep.mubr.bf16.mxu0 %v3879_v44  ;;  %v2283_v45 = vrot.slane %v5409_v21, 5  ;;  %v3722_v21 = vcombine.low %v5346_v46, %v5396_v41  ;;  %v1217_v46 = vrot.slane %v4789_v42, 5  ;;  %v4734_v41 = vld [vmem:[%s5989_s3 + $0x1b0] sm:$0xff]   ;;  %v1225_v44 = vrot.slane %v4791_v20, 5  ;;  %v4748_v40 = vld [vmem:[%s5989_s3 + $0xd8] sm:$0xff]   ;;  %v4755_v58 = vld [vmem:[%s5989_s3 + $0x1e8] sm:$0xff]  }
  0xad   :  { %4446 = vmatpush3.bf16.msra.mxu0 %v4722_v6  ;;  %4321 = vmatprep.subr.bf16.mxu1 %v4727_v22  ;;  %v3858_v6 = vrot.slane %v2192_v18, 9  ;;  %v4740_v18 = vld [vmem:[%s5989_s3 + $0x1c0] sm:$0xff]   ;;  %v1222_v26 = vsel %vm5350_vm11, %v3737_v27, %v1221_v32 }
  0xae   :  { %4447 = vmatprep.subr.bf16.mxu0 %v4725_v37  ;;  %v2284_v63 = vsel %vm5350_vm11, %v3857_v19, %v2283_v45  ;;  %v2775_v19 = vshrl.u32 %v2742_v49, 16  ;;  %v2778_v45 = vshll.u32 %v2742_v49, 16  ;;  %v5645_v42 = vld [vmem:[#allocation2 + $0x24] sm:$0x1] }
  0xaf   :  { %4306 = vmatmul.mubr.bf16.gmra.mrb[8].mxu1 %v3720_v36  ;;  %v2288_v36 = vsel %vm5350_vm11, %v3858_v6, %v2287_v4  ;;  %v4744_v6 = vld [vmem:[%s5989_s3 + $0xd0] sm:$0xff]  }
  0xb0   :  { %4322 = vmatpush3.bf16.msra.mxu1 %v4727_v22  ;;  %4309 = vmatprep.mubr.bf16.mxu1 %v3721_v55  ;;  %v3882_v34 = vcombine.low %v2284_v63, %v2288_v36  ;;  %v1151_v22 = vld [vmem:[#allocation2 + $0x38] sm:$0xe]  ;;  %v3739_v55 = vrot.slane %v1152_v24, 9  ;;  %v2777_v63 = vrot.slane %v2775_v19, 4  ;;  %v2780_v36 = vrot.slane %v2778_v45, 5 }
  0xb1   :  { %4448 = vmatpush3.bf16.msra.mxu0 %v4725_v37  ;;  %4323 = vmatprep.subr.bf16.mxu1 %v4730_v3  ;;  %v1218_v37 = vsel %vm5350_vm11, %v3736_v0, %v1217_v46  ;;  %v3738_v25 = vrot.slane %v1151_v22, 9  ;;  %v2746_v0 = vld [vmem:[#allocation2 + $0x20] sm:$0xf]  ;;  %v4753_v19 = vld [vmem:[#allocation2 + $0x70] ss:$8 sps:$4 sm:$0xff]  }
  0xb2   :  { %4449 = vmatprep.subr.bf16.mxu0 %v4728_v12  ;;  %v1230_v15 = vsel %vm5350_vm11, %v3739_v55, %v1229_v43  ;;  %v4747_v46 = vld [vmem:[#allocation2 + $0x40] ss:$8 sps:$4 sm:$0xff]   ;;  %v2781_v1 = vor.u32 %v2780_v36, %v2777_v63  ;;  %v2803_v47 = vshrl.u32 %v2746_v0, 16  ;;  %v2806_v27 = vshll.u32 %v2746_v0, 16  ;;  %v5686_v63 = vld [vmem:[#allocation2 + $0x3c] sm:$0x1] }
  0xb3   :  { %4434 = vmatmul.mubr.bf16.gmra.mrb[8].mxu0 %v3880_v54  ;;  %v4741_v54 = vld [vmem:[#allocation2 + $0x20] ss:$8 sps:$4 sm:$0xff]   ;;  %v1226_v33 = vsel %vm5350_vm11, %v3738_v25, %v1225_v44 }
  0xb4   :  { %4324 = vmatpush3.bf16.msra.mxu1 %v4730_v3  ;;  %4437 = vmatprep.mubr.bf16.mxu0 %v3881_v13  ;;  %v1233_v3 = vrot.slane %v4793_v59, 5  ;;  %v3766_v13 = vcombine.low %v1222_v26, %v1226_v33  ;;  %v4750_v22 = vld [vmem:[%s5989_s3 + $0xe0] sm:$0xff]   ;;  %v4754_v25 = vld [vmem:[%s5989_s3 + $0xe8] sm:$0xff]  }
  0xb5   :  { %4450 = vmatpush3.bf16.msra.mxu0 %v4728_v12  ;;  %4325 = vmatprep.subr.bf16.mxu1 %v4733_v56  ;;  %v2744_v12 = vld [vmem:[#allocation2 + $0x18] sm:$0xf]  ;;  %v4752_v43 = vld [vmem:[%s5989_s3 + $0x1e0] sm:$0xff]   ;;  %v2760_v0 = vld [vmem:[#allocation2 + $0x68] sm:$0xf] }
  0xb6   :  { %4451 = vmatprep.subr.bf16.mxu0 %v4731_v28  ;;  %v1234_v61 = vsel %vm5350_vm11, %v3740_v39, %v1233_v3  ;;  %v2792_v4 = vshll.u32 %v2744_v12, 16  ;;  %v5664_v39 = vrot.slane %v2781_v1, 4  ;;  %v2754_v33 = vld [vmem:[#allocation2 + $0x40] sm:$0xf]  ;;  %v5706_v1 = vld [vmem:[#allocation2 + $0x44] sm:$0x1] }
  0xb7   :  { %4310 = vmatmul.mubr.bf16.gmra.mrb[12].mxu1 %v3722_v21  ;;  %v3767_v2 = vcombine.low %v1230_v15, %v1234_v61  ;;  %v5637_v21 = vld [vmem:[#allocation2 + $0x1c] sm:$0x1]  ;;  %v5675_v15 = vld [vmem:[#allocation2 + $0x34] sm:$0x1]  ;;  %v2756_v61 = vld [vmem:[#allocation2 + $0x48] sm:$0xf] }
  0xb8   :  { %4326 = vmatpush3.bf16.msra.mxu1 %v4733_v56  ;;  %4329 = vmatprep.mubr.bf16.mxu1 %v3763_v60  ;;  %v3765_v60 = vcombine.low %v1214_v30, %v1218_v37  ;;  %v4745_v56 = vld [vmem:[#allocation2 + $0x30] ss:$8 sps:$4 sm:$0xff]   ;;  %v2794_v11 = vrot.slane %v2792_v4, 5  ;;  %v2859_v36 = vshrl.u32 %v2754_v33, 16  ;;  %v2873_v14 = vshrl.u32 %v2756_v61, 16 }
  0xb9   :  { %4452 = vmatpush3.bf16.msra.mxu0 %v4731_v28  ;;  %4327 = vmatprep.subr.bf16.mxu1 %v4736_v8  ;;  %v4743_v28 = vld [vmem:[%s5989_s3 + $0x1c8] sm:$0xff]   ;;  %v2750_v30 = vld [vmem:[#allocation2 + $0x30] sm:$0xf]  ;;  %v2752_v37 = vld [vmem:[#allocation2 + $0x38] sm:$0xf] }
  0xba   :  { %4453 = vmatprep.subr.bf16.mxu0 %v4734_v41  ;;  %v2831_v20 = vshrl.u32 %v2750_v30, 16  ;;  %v2834_v44 = vshll.u32 %v2750_v30, 16  ;;  %v2845_v55 = vshrl.u32 %v2752_v37, 16  ;;  %v2848_v9 = vshll.u32 %v2752_v37, 16  ;;  %v5708_v30 = vld [vmem:[#allocation2 + $0x4c] sm:$0x1] }
  0xbb   :  { %4438 = vmatmul.mubr.bf16.gmra.mrb[12].mxu0 %v3882_v34  ;;  %v2798_v34 = vshll.u32 %v5637_v21, 16  ;;  %v4758_v37 = vld [vmem:[%s5989_s3 + $0x1f0] sm:$0xff]  }
  0xbc   :  { %4328 = vmatpush3.bf16.msra.mxu1 %v4736_v8  ;;  %4457 = vmatprep.mubr.bf16.mxu0 %v4739_v17  ;;  %v4746_v8 = vld [vmem:[%s5989_s3 + $0x1d0] sm:$0xff]   ;;  %v5652_v17 = vld [vmem:[#allocation2 + $0x2c] sm:$0x1]  ;;  %v2833_v4 = vrot.slane %v2831_v20, 4  ;;  %v2904_v20 = vshll.u32 %v2760_v0, 16 }
  0xbd   :  { %4454 = vmatpush3.bf16.msra.mxu0 %v4734_v41  ;;  %4345 = vmatprep.subr.bf16.mxu1 %v4738_v53  ;;  %v2784_v41 = vshll.u32 %v5635_v38, 16  ;;  %v5668_v3 = vrot.slane %v2798_v34, 5  ;;  %v2826_v49 = vshll.u32 %v5652_v17, 16  ;;  %v2840_v34 = vshll.u32 %v5675_v15, 16 }
  0xbe   :  { %4455 = vmatprep.subr.bf16.mxu0 %v4737_v51 }
  0xbf   :  { %4330 = vmatmul.mubr.bf16.vlgmr.msra.gmra.mrb[0].mxu1 %v3764_v50  ;;  %v2789_v50 = vshrl.u32 %v2744_v12, 16  ;;  %v5666_v59 = vrot.slane %v2784_v41, 5  ;;  %v2805_v12 = vrot.slane %v2803_v47, 4 }
  0xc0   :  { %4346 = vmatpush3.bf16.msra.mxu1 %v4738_v53  ;;  %4333 = vmatprep.mubr.bf16.mxu1 %v3765_v60  ;;  %v4749_v53 = vld [vmem:[%s5989_s3 + $0x1d8] sm:$0xff]   ;;  %v4751_v60 = vld [vmem:[#allocation2 + $0x60] ss:$8 sps:$4 sm:$0xff]  }
  0xc1   :  { %4456 = vmatpush3.bf16.msra.mxu0 %v4737_v51  ;;  %4347 = vmatprep.subr.bf16.mxu1 %v4742_v5  ;;  %v2791_v62 = vrot.slane %v2789_v50, 4  ;;  %v2748_v51 = vld [vmem:[#allocation2 + $0x28] sm:$0xf]  ;;  %v4756_v50 = vld [vmem:[%s5989_s3 + $0xf0] sm:$0xff]   ;;  %v2787_v10 = vsel %vm4953_vm8, %v5664_v39, %v5666_v59 }
  0xc2   :  { %4473 = vmatprep.subr.bf16.mxu0 %v4740_v18  ;;  %v2817_v57 = vshrl.u32 %v2748_v51, 16  ;;  %v2820_v32 = vshll.u32 %v2748_v51, 16  ;;  %v4759_v39 = vld [vmem:[#allocation2 + $0x90] ss:$8 sps:$4 sm:$0xff]  }
  0xc3   :  { %v2795_v24 = vor.u32 %v2794_v11, %v2791_v62  ;;  %v5699_v11 = vrot.slane %v2826_v49, 5 }
  0xc4   :  { %4458 = vmatmul.mubr.bf16.vlgmr.msra.gmra.mrb[0].mxu0 %v4741_v54  ;;  %4348 = vmatpush3.bf16.msra.mxu1 %v4742_v5  ;;  %v2812_v5 = vshll.u32 %v5645_v42, 16  ;;  %v2808_v54 = vrot.slane %v2806_v27, 5  ;;  %v2819_v45 = vrot.slane %v2817_v57, 4 }
  0xc5   :  { %4474 = vmatpush3.bf16.msra.mxu0 %v4740_v18  ;;  %4349 = vmatprep.subr.bf16.mxu1 %v4744_v6  ;;  %v5671_v18 = vrot.slane %v2795_v24, 4  ;;  %v2861_v24 = vrot.slane %v2859_v36, 4 }
  0xc6   :  { %4475 = vmatprep.subr.bf16.mxu0 %v4743_v28  ;;  %4461 = vmatprep.mubr.bf16.mxu0 %v4745_v56  ;;  %v5673_v26 = vrot.slane %v2812_v5, 5  ;;  %v2847_v56 = vrot.slane %v2845_v55, 4 }
  0xc7   :  { %4334 = vmatmul.mubr.bf16.gmra.mrb[4].mxu1 %v3766_v13  ;;  %v2850_v13 = vrot.slane %v2848_v9, 5  ;;  %v2801_v23 = vsel %vm4953_vm8, %v5671_v18, %v5668_v3  ;;  %v2882_v9 = vshll.u32 %v5708_v30, 16 }
  0xc8   :  { %4350 = vmatpush3.bf16.msra.mxu1 %v4744_v6  ;;  %4337 = vmatprep.mubr.bf16.mxu1 %v3767_v2  ;;  %v2822_v6 = vrot.slane %v2820_v32, 5  ;;  %v4757_v2 = vld [vmem:[#allocation2 + $0x80] ss:$8 sps:$4 sm:$0xff]   ;;  %v2901_v32 = vshrl.u32 %v2760_v0, 16  ;;  %v3939_v18 = vcombine.low %v2787_v10, %v2801_v23 }
  0xc9   :  { %4476 = vmatpush3.bf16.msra.mxu0 %v4743_v28  ;;  %4351 = vmatprep.subr.bf16.mxu1 %v4748_v40  ;;  %v2836_v28 = vrot.slane %v2834_v44, 5  ;;  %v2851_v51 = vor.u32 %v2850_v13, %v2847_v56  ;;  %v5742_v36 = vrot.slane %v2882_v9, 5  ;;  %v5753_v0 = vld [vmem:[%s5989_s3 + $0x208] sm:$0xff]  }
  0xca   :  { %4477 = vmatprep.subr.bf16.mxu0 %v4746_v8  ;;  %v2823_v62 = vor.u32 %v2822_v6, %v2819_v45  ;;  %v2906_v45 = vrot.slane %v2904_v20, 5  ;;  %v2762_v6 = vld [vmem:[#allocation2 + $0x70] sm:$0xf] }
  0xcb   :  { %v2837_v41 = vor.u32 %v2836_v28, %v2833_v4  ;;  %v2852_v3 = vrot.slane %v2851_v51, 4  ;;  %v5732_v4 = vld [vmem:[%s5989_s3 + $0x200] sm:$0xff]   ;;  %v2915_v23 = vshrl.u32 %v2762_v6, 16  ;;  %v5770_v20 = vld [vmem:[%s5989_s3 + $0x210] sm:$0xff]  }
  0xcc   :  { %4462 = vmatmul.mubr.bf16.gmra.mrb[4].mxu0 %v4747_v46  ;;  %4352 = vmatpush3.bf16.msra.mxu1 %v4748_v40  ;;  %v2758_v40 = vld [vmem:[#allocation2 + $0x60] sm:$0xf]  ;;  %v4760_v46 = vld [vmem:[%s5989_s3 + $0xf8] sm:$0xff]   ;;  %v2824_v55 = vrot.slane %v2823_v62, 4 }
  0xcd   :  { %4478 = vmatpush3.bf16.msra.mxu0 %v4746_v8  ;;  %4353 = vmatprep.subr.bf16.mxu1 %v4750_v22  ;;  %v2862_v8 = vshll.u32 %v2754_v33, 16  ;;  %v2887_v27 = vshrl.u32 %v2758_v40, 16  ;;  %v2890_v5 = vshll.u32 %v2758_v40, 16  ;;  %v2838_v59 = vrot.slane %v2837_v41, 4  ;;  %v4764_v28 = vld [vmem:[#allocation2 + $0x18] ss:$8 sps:$4 sm:$0xff]  }
  0xce   :  { %4479 = vmatprep.subr.bf16.mxu0 %v4749_v53  ;;  %4465 = vmatprep.mubr.bf16.mxu0 %v4751_v60  ;;  %v2875_v60 = vrot.slane %v2873_v14, 4  ;;  %v2829_v13 = vsel %vm4953_vm8, %v2824_v55, %v5699_v11  ;;  %v2766_v40 = vld [vmem:[#allocation2 + $0x80] sm:$0xf] }
  0xcf   :  { %4338 = vmatmul.mubr.bf16.gmra.mrb[8].mxu1 %v3768_v48  ;;  %v2876_v48 = vshll.u32 %v2756_v61, 16  ;;  %v2864_v47 = vrot.slane %v2862_v8, 5  ;;  %v5722_v33 = vrot.slane %v2887_v27, 4  ;;  %v2764_v61 = vld [vmem:[#allocation2 + $0x78] sm:$0xf] }
  0xd0   :  { %4354 = vmatpush3.bf16.msra.mxu1 %v4750_v22  ;;  %4341 = vmatprep.mubr.bf16.mxu1 %v3769_v7  ;;  %v2809_v7 = vor.u32 %v2808_v54, %v2805_v12  ;;  %v4762_v22 = vld [vmem:[#allocation2 + $0x8] ss:$8 sps:$4 sm:$0xff]   ;;  %v5718_v12 = vld [vmem:[#allocation2 + $0x64] sm:$0x1]  ;;  %v5720_v54 = vld [vmem:[#allocation2 + $0x6c] sm:$0x1] }
  0xd1   :  { %4480 = vmatpush3.bf16.msra.mxu0 %v4749_v53  ;;  %4355 = vmatprep.subr.bf16.mxu1 %v4754_v25  ;;  %v2854_v53 = vshll.u32 %v5686_v63, 16  ;;  %v2878_v57 = vrot.slane %v2876_v48, 5  ;;  %v2865_v16 = vor.u32 %v2864_v47, %v2861_v24  ;;  %v2896_v14 = vshll.u32 %v5718_v12, 16 }
  0xd2   :  { %4481 = vmatprep.subr.bf16.mxu0 %v4752_v43  ;;  %v2810_v44 = vrot.slane %v2809_v7, 4  ;;  %v2910_v48 = vshll.u32 %v5720_v54, 16  ;;  %v2918_v7 = vshll.u32 %v2762_v6, 16  ;;  %v2929_v62 = vshrl.u32 %v2764_v61, 16  ;;  %v4768_v6 = vld [vmem:[#allocation2 + $0x38] ss:$8 sps:$4 sm:$0xff]  }
  0xd3   :  { %v2856_v49 = vrot.slane %v2854_v53, 5  ;;  %v2879_v52 = vor.u32 %v2878_v57, %v2875_v60  ;;  %v2932_v11 = vshll.u32 %v2764_v61, 16  ;;  %v2866_v41 = vrot.slane %v2865_v16, 4  ;;  %v5762_v57 = vld [vmem:[#allocation2 + $0x74] sm:$0x1] }
  0xd4   :  { %4466 = vmatmul.mubr.bf16.gmra.mrb[8].mxu0 %v4753_v19  ;;  %4356 = vmatpush3.bf16.msra.mxu1 %v4754_v25  ;;  %v2868_v25 = vshll.u32 %v5706_v1, 16  ;;  %v5724_v19 = vrot.slane %v2890_v5, 5  ;;  %v2815_v56 = vsel %vm4953_vm8, %v2810_v44, %v5673_v26  ;;  %v2768_v26 = vld [vmem:[#allocation2 + $0x88] sm:$0xf]  ;;  %v5758_v5 = vrot.slane %v2896_v14, 5 }
  0xd5   :  { %4482 = vmatpush3.bf16.msra.mxu0 %v4752_v43  ;;  %4357 = vmatprep.subr.bf16.mxu1 %v4756_v50  ;;  %v2842_v43 = vrot.slane %v2840_v34, 5  ;;  %v2857_v10 = vsel %vm4953_vm8, %v2852_v3, %v2856_v49  ;;  %v2880_v34 = vrot.slane %v2879_v52, 4  ;;  %v2957_v24 = vshrl.u32 %v2768_v26, 16 }
  0xd6   :  { %4483 = vmatprep.subr.bf16.mxu0 %v4755_v58  ;;  %4469 = vmatprep.mubr.bf16.mxu0 %v4757_v2  ;;  %v5740_v2 = vrot.slane %v2868_v25, 5  ;;  %v2893_v51 = vor.u32 %v5724_v19, %v5722_v33  ;;  %v2960_v47 = vshll.u32 %v2768_v26, 16  ;;  %v5760_v60 = vrot.slane %v2910_v48, 5  ;;  %v2772_v33 = vld [vmem:[#allocation2 + $0x98] sm:$0xf] }
  0xd7   :  { %4342 = vmatmul.mubr.bf16.gmra.mrb[12].mxu1 %v3770_v35  ;;  %v2903_v35 = vrot.slane %v2901_v32, 4  ;;  %v2843_v8 = vsel %vm4953_vm8, %v2838_v59, %v2842_v43  ;;  %v5764_v32 = vld [vmem:[#allocation2 + $0x7c] sm:$0x1]  ;;  %v2917_v44 = vrot.slane %v2915_v23, 4  ;;  %v2920_v55 = vrot.slane %v2918_v7, 5 }
  0xd8   :  { %4358 = vmatpush3.bf16.msra.mxu1 %v4756_v50  ;;  %4361 = vmatprep.mubr.bf16.mxu1 %v4762_v22  ;;  %v4761_v50 = vld [vmem:[%s5989_s3 + $0x1f8] sm:$0xff]   ;;  %v2946_v22 = vshll.u32 %v2766_v40, 16  ;;  %v3941_v27 = vcombine.low %v2843_v8, %v2857_v10  ;;  %v2931_v25 = vrot.slane %v2929_v62, 4  ;;  %v2934_v9 = vrot.slane %v2932_v11, 5  ;;  %v5782_v19 = vld [vmem:[#allocation2 + $0x8c] sm:$0x1] }
  0xd9   :  { %4484 = vmatpush3.bf16.msra.mxu0 %v4755_v58  ;;  %4359 = vmatprep.subr.bf16.mxu1 %v4760_v46  ;;  %v4766_v58 = vld [vmem:[#allocation2 + $0x28] ss:$8 sps:$4 sm:$0xff]   ;;  %v2907_v53 = vor.u32 %v2906_v45, %v2903_v35  ;;  %v2871_v59 = vsel %vm4953_vm8, %v2866_v41, %v5740_v2  ;;  %v2885_v43 = vsel %vm4953_vm8, %v2880_v34, %v5742_v36  ;;  %v2894_v3 = vrot.slane %v2893_v51, 4  ;;  %v5791_v48 = vld [vmem:[%s5989_s3 + $0x218] sm:$0xff]  }
  0xda   :  { %4485 = vmatprep.subr.bf16.mxu0 %v4758_v37  ;;  %v2948_v52 = vrot.slane %v2946_v22, 5  ;;  %v2959_v35 = vrot.slane %v2957_v24, 4  ;;  %v2962_v45 = vrot.slane %v2960_v47, 5  ;;  %v2924_v61 = vshll.u32 %v5762_v57, 16 }
  0xdb   :  { %v2908_v49 = vrot.slane %v2907_v53, 4  ;;  %v2921_v2 = vor.u32 %v2920_v55, %v2917_v44  ;;  %v2935_v36 = vor.u32 %v2934_v9, %v2931_v25  ;;  %v2985_v8 = vshrl.u32 %v2772_v33, 16  ;;  %v3216_v25 = vld [vmem:[#allocation2 + $0x60] sm:$0xe]  ;;  %v3217_v9 = vld [vmem:[#allocation2 + $0x68] sm:$0xe] }
  0xdc   :  { %4470 = vmatmul.mubr.bf16.gmra.mrb[12].mxu0 %v4759_v39  ;;  %4360 = vmatpush3.bf16.msra.mxu1 %v4760_v46  ;;  %v2943_v46 = vshrl.u32 %v2766_v40, 16  ;;  %v2770_v39 = vld [vmem:[#allocation2 + $0x90] sm:$0xf]  ;;  %v2988_v10 = vshll.u32 %v2772_v33, 16  ;;  %v3942_v14 = vcombine.low %v2871_v59, %v2885_v43  ;;  %v2899_v40 = vsel %vm4953_vm8, %v2894_v3, %v5758_v5 }
  0xdd   :  { %4486 = vmatpush3.bf16.msra.mxu0 %v4758_v37  ;;  %4489 = vmatprep.mubr.bf16.mxu0 %v3939_v18  ;;  %v3940_v37 = vcombine.low %v2815_v56, %v2829_v13  ;;  %v5779_v18 = vld [vmem:[#allocation2 + $0x84] sm:$0x1]  ;;  %v2974_v56 = vshll.u32 %v2770_v39, 16  ;;  %v4770_v13 = vld [vmem:[#allocation2 + $0x58] ss:$8 sps:$4 sm:$0xff]   ;;  %v2963_v7 = vor.u32 %v2962_v45, %v2959_v35  ;;  %v2926_v62 = vrot.slane %v2924_v61, 5 }
  0xde   :  { %4487 = vmatprep.subr.bf16.mxu0 %v4761_v50  ;;  %4537 = vmatprep.subr.bf16.mxu1 %v5732_v4  ;;  %v2945_v16 = vrot.slane %v2943_v46, 4  ;;  %v2952_v26 = vshll.u32 %v5779_v18, 16  ;;  %v2922_v51 = vrot.slane %v2921_v2, 4  ;;  %v2936_v53 = vrot.slane %v2935_v36, 4  ;;  %v5804_v46 = vld [vmem:[#allocation2 + $0x94] sm:$0x1] }
  0xdf   :  { %4362 = vmatmul.mubr.bf16.vlgmr.msra.gmra.mrb[0].mxu1 %v4764_v28  ;;  %v2971_v28 = vshrl.u32 %v2770_v39, 16  ;;  %v2976_v34 = vrot.slane %v2974_v56, 5  ;;  %v2987_v22 = vrot.slane %v2985_v8, 4  ;;  %v2990_v24 = vrot.slane %v2988_v10, 5  ;;  %v4772_v39 = vld [vmem:[#allocation2 + $0x68] ss:$8 sps:$4 sm:$0xff]  }
  0xe0   :  { %4545 = vmatpush3.bf16.msra.mxu1 %v5732_v4  ;;  %4365 = vmatprep.mubr.bf16.mxu1 %v4766_v58  ;;  %v2966_v58 = vshll.u32 %v5782_v19, 16  ;;  %v2949_v23 = vor.u32 %v2948_v52, %v2945_v16  ;;  %v2964_v55 = vrot.slane %v2963_v7, 4  ;;  %v2980_v43 = vshll.u32 %v5804_v46, 16  ;;  %v3208_v52 = vld [vmem:[#allocation2 + $0x10] sm:$0xe]  ;;  %v5827_v45 = vld [vmem:[%s5989_s3 + $0x228] sm:$0xff]  }
  0xe1   :  { %4488 = vmatpush3.bf16.msra.mxu0 %v4761_v50  ;;  %4538 = vmatprep.subr.bf16.mxu1 %v5753_v0  ;;  %v2938_v50 = vshll.u32 %v5764_v32, 16  ;;  %v2973_v41 = vrot.slane %v2971_v28, 4  ;;  %v2927_v3 = vsel %vm4953_vm8, %v2922_v51, %v2926_v62  ;;  %v2991_v33 = vor.u32 %v2990_v24, %v2987_v22  ;;  %v3209_v35 = vld [vmem:[#allocation2 + $0x18] sm:$0xe]  ;;  %v4775_v7 = vld [vmem:[%s5989_s3 + $0x230] sm:$0xff]  }
  0xe2   :  { %4505 = vmatprep.subr.bf16.mxu0 %v5732_v4  ;;  %v2968_v5 = vrot.slane %v2966_v58, 5  ;;  %v2950_v44 = vrot.slane %v2949_v23, 4  ;;  %v3290_v61 = vrot.slane %v5718_v12, 5  ;;  %v3294_v28 = vrot.slane %v5720_v54, 5  ;;  %v3218_v58 = vld [vmem:[#allocation2 + $0x70] sm:$0xe] }
  0xe3   :  { %v2940_v11 = vrot.slane %v2938_v50, 5  ;;  %v2977_v59 = vor.u32 %v2976_v34, %v2973_v41  ;;  %v3964_v50 = vrot.slane %v3217_v9, 9  ;;  %v3262_v2 = vrot.slane %v5637_v21, 5  ;;  %v3221_v62 = vld [vmem:[#allocation2 + $0x88] sm:$0xe] }
  0xe4   :  { %4490 = vmatmul.mubr.bf16.vlgmr.msra.gmra.mrb[0].mxu0 %v3940_v37  ;;  %4546 = vmatpush3.bf16.msra.mxu1 %v5753_v0  ;;  %v5811_v37 = vld [vmem:[%s5989_s3 + $0x220] sm:$0xff]   ;;  %v2982_v12 = vrot.slane %v2980_v43, 5  ;;  %v3955_v8 = vrot.slane %v3208_v52, 9  ;;  %v3956_v10 = vrot.slane %v3209_v35, 9  ;;  %v3298_v23 = vrot.slane %v5762_v57, 5 }
  0xe5   :  { %4506 = vmatpush3.bf16.msra.mxu0 %v5732_v4  ;;  %4493 = vmatprep.mubr.bf16.mxu0 %v3941_v27  ;;  %v2913_v4 = vsel %vm4953_vm8, %v2908_v49, %v5760_v60  ;;  %v2954_v27 = vrot.slane %v2952_v26, 5  ;;  %v5813_v60 = vld [vmem:[#allocation2 + $0x9c] sm:$0x1]  ;;  %v2941_v49 = vsel %vm4953_vm8, %v2936_v53, %v2940_v11  ;;  %v2978_v36 = vrot.slane %v2977_v59, 4  ;;  %v4776_v41 = vld [vmem:[#allocation2 + $0x88] ss:$8 sps:$4 sm:$0xff]  }
  0xe6   :  { %4507 = vmatprep.subr.bf16.mxu0 %v5753_v0  ;;  %4539 = vmatprep.subr.bf16.mxu1 %v5770_v20  ;;  %v3943_v47 = vcombine.low %v2899_v40, %v2913_v4  ;;  %v2994_v16 = vshll.u32 %v5813_v60, 16  ;;  %v3944_v54 = vcombine.low %v2927_v3, %v2941_v49  ;;  %v3295_v21 = vsel %vm5350_vm11, %v3964_v50, %v3294_v28  ;;  %v3219_v4 = vld [vmem:[#allocation2 + $0x78] sm:$0xe]  ;;  %v3210_v24 = vld [vmem:[#allocation2 + $0x20] sm:$0xe] }
  0xe7   :  { %4366 = vmatmul.mubr.bf16.gmra.mrb[4].mxu1 %v4768_v6  ;;  %v3963_v6 = vrot.slane %v3216_v25, 9  ;;  %v2955_v56 = vsel %vm4953_vm8, %v2950_v44, %v2954_v27  ;;  %v3302_v11 = vrot.slane %v5764_v32, 5  ;;  %v2983_v34 = vsel %vm4953_vm8, %v2978_v36, %v2982_v12  ;;  %v4777_v27 = vld [vmem:[%s5989_s3 + $0x238] sm:$0xff]   ;;  %v3222_v3 = vld [vmem:[#allocation2 + $0x90] sm:$0xe] }
  0xe8   :  { %4547 = vmatpush3.bf16.msra.mxu1 %v5770_v20  ;;  %4369 = vmatprep.mubr.bf16.mxu1 %v4770_v13  ;;  %v3258_v13 = vrot.slane %v5635_v38, 5  ;;  %v2996_v40 = vrot.slane %v2994_v16, 5  ;;  %v3263_v53 = vsel %vm5350_vm11, %v3956_v10, %v3262_v2  ;;  %v3966_v32 = vrot.slane %v3219_v4, 9  ;;  %v3214_v36 = vld [vmem:[#allocation2 + $0x40] sm:$0xe] }
  0xe9   :  { %4508 = vmatpush3.bf16.msra.mxu0 %v5753_v0  ;;  %4540 = vmatprep.subr.bf16.mxu1 %v5791_v48  ;;  %v4774_v0 = vld [vmem:[#allocation2 + $0x78] ss:$8 sps:$4 sm:$0xff]   ;;  %v3291_v38 = vsel %vm5350_vm11, %v3963_v6, %v3290_v61  ;;  %v3306_v44 = vrot.slane %v5779_v18, 5  ;;  %v3310_v25 = vrot.slane %v5782_v19, 5  ;;  %v3266_v43 = vrot.slane %v5645_v42, 5 }
  0xea   :  { %4509 = vmatprep.subr.bf16.mxu0 %v5770_v20  ;;  %v3259_v51 = vsel %vm5350_vm11, %v3955_v8, %v3258_v13  ;;  %v3991_v22 = vcombine.low %v3291_v38, %v3295_v21  ;;  %v3303_v19 = vsel %vm5350_vm11, %v3966_v32, %v3302_v11  ;;  %v3958_v49 = vrot.slane %v3211_v29, 9  ;;  %v3223_v42 = vld [vmem:[#allocation2 + $0x98] sm:$0xe] }
  0xeb   :  { %v3987_v9 = vcombine.low %v3259_v51, %v3263_v53  ;;  %v3274_v6 = vrot.slane %v5675_v15, 5  ;;  %v3278_v50 = vrot.slane %v5686_v63, 5  ;;  %v3318_v13 = vrot.slane %v5813_v60, 5 }
  0xec   :  { %4494 = vmatmul.mubr.bf16.gmra.mrb[4].mxu0 %v3942_v14  ;;  %4548 = vmatpush3.bf16.msra.mxu1 %v5791_v48  ;;  %v2992_v14 = vrot.slane %v2991_v33, 4  ;;  %v3270_v33 = vrot.slane %v5652_v17, 5  ;;  %v3314_v17 = vrot.slane %v5804_v46, 5  ;;  %v3215_v46 = vld [vmem:[#allocation2 + $0x48] sm:$0xe]  ;;  %v3961_v60 = vrot.slane %v3214_v36, 9 }
  0xed   :  { %4510 = vmatpush3.bf16.msra.mxu0 %v5770_v20  ;;  %4497 = vmatprep.mubr.bf16.mxu0 %v3943_v47  ;;  %v2969_v20 = vsel %vm4953_vm8, %v2964_v55, %v2968_v5  ;;  %v3965_v47 = vrot.slane %v3218_v58, 9  ;;  %v3968_v55 = vrot.slane %v3221_v62, 9  ;;  %v3286_v38 = vrot.slane %v5708_v30, 5 }
  0xee   :  { %4511 = vmatprep.subr.bf16.mxu0 %v5791_v48  ;;  %4541 = vmatprep.subr.bf16.mxu1 %v5811_v37  ;;  %v3945_v26 = vcombine.low %v2955_v56, %v2969_v20  ;;  %v2997_v57 = vsel %vm4953_vm8, %v2992_v14, %v2996_v40  ;;  %v3970_v20 = vrot.slane %v3223_v42, 9  ;;  %v3271_v15 = vsel %vm5350_vm11, %v3958_v49, %v3270_v33 }
  0xef   :  { %4370 = vmatmul.mubr.bf16.gmra.mrb[8].mxu1 %v4772_v39  ;;  %v3957_v39 = vrot.slane %v3210_v24, 9  ;;  %v3946_v59 = vcombine.low %v2983_v34, %v2997_v57  ;;  %v3299_v18 = vsel %vm5350_vm11, %v3965_v47, %v3298_v23  ;;  %v3311_v52 = vsel %vm5350_vm11, %v3968_v55, %v3310_v25 }
  0xf0   :  { %4549 = vmatpush3.bf16.msra.mxu1 %v5811_v37  ;;  %4373 = vmatprep.mubr.bf16.mxu1 %v4774_v0  ;;  %v3212_v0 = vld [vmem:[#allocation2 + $0x30] sm:$0xe]  ;;  %v3992_v28 = vcombine.low %v3299_v18, %v3303_v19  ;;  %v3282_v40 = vrot.slane %v5706_v1, 5 }
  0xf1   :  { %4512 = vmatpush3.bf16.msra.mxu0 %v5791_v48  ;;  %4542 = vmatprep.subr.bf16.mxu1 %v5827_v45  ;;  %v3220_v48 = vld [vmem:[#allocation2 + $0x80] sm:$0xe]  ;;  %v3959_v35 = vrot.slane %v3212_v0, 9  ;;  %v3267_v2 = vsel %vm5350_vm11, %v3957_v39, %v3266_v43 }
  0xf2   :  { %4513 = vmatprep.subr.bf16.mxu0 %v5811_v37  ;;  %v3967_v5 = vrot.slane %v3220_v48, 9  ;;  %v3988_v8 = vcombine.low %v3267_v2, %v3271_v15  ;;  %v3283_v58 = vsel %vm5350_vm11, %v3961_v60, %v3282_v40 }
  0xf3   :  { %v3275_v63 = vsel %vm5350_vm11, %v3959_v35, %v3274_v6 }
  0xf4   :  { %4498 = vmatmul.mubr.bf16.gmra.mrb[8].mxu0 %v3944_v54  ;;  %4550 = vmatpush3.bf16.msra.mxu1 %v5827_v45  ;;  %v3307_v16 = vsel %vm5350_vm11, %v3967_v5, %v3306_v44  ;;  %v3319_v54 = vsel %vm5350_vm11, %v3970_v20, %v3318_v13 }
  0xf5   :  { %4514 = vmatpush3.bf16.msra.mxu0 %v5811_v37  ;;  %4501 = vmatprep.mubr.bf16.mxu0 %v3945_v26  ;;  %v3213_v37 = vld [vmem:[#allocation2 + $0x38] sm:$0xe]  ;;  %v3993_v56 = vcombine.low %v3307_v16, %v3311_v52  ;;  %v3962_v26 = vrot.slane %v3215_v46, 9 }
  0xf6   :  { %4515 = vmatprep.subr.bf16.mxu0 %v5827_v45  ;;  %4543 = vmatprep.subr.bf16.mxu1 %v4775_v7  ;;  %v3960_v61 = vrot.slane %v3213_v37, 9 }
  0xf7   :  { %4374 = vmatmul.mubr.bf16.gmra.mrb[12].mxu1 %v4776_v41  ;;  %v3287_v4 = vsel %vm5350_vm11, %v3962_v26, %v3286_v38 }
  0xf8   :  { %4551 = vmatpush3.bf16.msra.mxu1 %v4775_v7  ;;  %4529 = vmatprep.mubr.bf16.mxu1 %v3991_v22  ;;  %v3279_v12 = vsel %vm5350_vm11, %v3960_v61, %v3278_v50  ;;  %v3990_v23 = vcombine.low %v3283_v58, %v3287_v4 }
  0xf9   :  { %4516 = vmatpush3.bf16.msra.mxu0 %v5827_v45  ;;  %4544 = vmatprep.subr.bf16.mxu1 %v4777_v27  ;;  %v3969_v45 = vrot.slane %v3222_v3, 9  ;;  %v3989_v14 = vcombine.low %v3275_v63, %v3279_v12 }
  0xfa   :  { %4517 = vmatprep.subr.bf16.mxu0 %v4775_v7 }
  0xfb   :  { %v3315_v10 = vsel %vm5350_vm11, %v3969_v45, %v3314_v17 }
  0xfc   :  { %4502 = vmatmul.mubr.bf16.gmra.mrb[12].mxu0 %v3946_v59  ;;  %4552 = vmatpush3.bf16.msra.mxu1 %v4777_v27  ;;  %v3994_v21 = vcombine.low %v3315_v10, %v3319_v54 }
  0xfd   :  { %4518 = vmatpush3.bf16.msra.mxu0 %v4775_v7  ;;  %4521 = vmatprep.mubr.bf16.mxu0 %v3987_v9 }
  0xfe   :  { %4519 = vmatprep.subr.bf16.mxu0 %v4777_v27 }
  0xff   :  { %4530 = vmatmul.mubr.bf16.vlgmr.msra.gmra.mrb[16].mxu1 %v3992_v28 }
 0x100   :  { %4533 = vmatprep.mubr.bf16.mxu1 %v3993_v56 }
 0x101   :  { %4520 = vmatpush3.bf16.msra.mxu0 %v4777_v27 }
 0x104   :  { %4522 = vmatmul.mubr.bf16.vlgmr.msra.gmra.mrb[0].mxu0 %v3988_v8 }
 0x105   :  { %4525 = vmatprep.mubr.bf16.mxu0 %v3989_v14 }
 0x107   :  { %4534 = vmatmul.mubr.bf16.gmra.mrb[20].mxu1 %v3994_v21 }
 0x10c   :  { %4526 = vmatmul.mubr.bf16.gmra.mrb[4].mxu0 %v3990_v23 }
 0x1b2   :  { %v4363_v7 = vpop.f32.mrb[0].mxu1 }
 0x1b3   :  { %v1632_v48 = vpop.f32.mrb[1].mxu1 }
 0x1b4   :  { %v4364_v62 = vpop.f32.mrb[2].mxu1 }
 0x1b5   :  { %v1635_v11 = vpop.f32.mrb[3].mxu1 }
 0x1ba   :  { %v5901_v1 = vpop.f32.mrb[4].mxu1 }
 0x1bb   :  { %v5903_v41 = vpop.f32.mrb[5].mxu1 }
 0x1bc   :  { %v5905_v30 = vpop.f32.mrb[6].mxu1 }
 0x1bd   :  { %v5907_v34 = vpop.f32.mrb[7].mxu1 }
 0x1c2   :  { %v4371_v51 = vpop.f32.mrb[8].mxu1 }
 0x1c3   :  { %v1664_v53 = vpop.f32.mrb[9].mxu1 }
 0x1c4   :  { %v4372_v57 = vpop.f32.mrb[10].mxu1 }
 0x1c5   :  { %v1667_v31 = vpop.f32.mrb[11].mxu1 }
 0x1c7   :  { %v4499_v22 = vpop.f32.mrb[8].mxu0 }
 0x1c8   :  { %v4561_v24 = vadd.f32 %v4499_v22, %v4371_v51  ;;  %v3161_v47 = vpop.f32.mrb[9].mxu0 }
 0x1c9   :  { %v4563_v32 = vadd.f32 %v3161_v47, %v1664_v53  ;;  %v4500_v27 = vpop.f32.mrb[10].mxu0 }
 0x1ca   :  { %v4565_v5 = vadd.f32 %v4500_v27, %v4372_v57  ;;  %v3164_v44 = vpop.f32.mrb[11].mxu0  ;;  %v4375_v55 = vpop.f32.mrb[12].mxu1 }
 0x1cb   :  { %v4567_v25 = vadd.f32 %v3164_v44, %v1667_v31  ;;  %v1680_v29 = vpop.f32.mrb[13].mxu1 }
 0x1cc   :  { %v4376_v9 = vpop.f32.mrb[14].mxu1 }
 0x1cd   :  { %v1683_v39 = vpop.f32.mrb[15].mxu1 }
 0x1cf   :  { %v4503_v0 = vpop.f32.mrb[12].mxu0 }
 0x1d0   :  { %v4569_v37 = vadd.f32 %v4503_v0, %v4375_v55  ;;  %v3177_v59 = vpop.f32.mrb[13].mxu0 }
 0x1d1   :  { %v4571_v43 = vadd.f32 %v3177_v59, %v1680_v29  ;;  %v4504_v18 = vpop.f32.mrb[14].mxu0 }
 0x1d2   :  { %v4573_v19 = vadd.f32 %v4504_v18, %v4376_v9  ;;  %v3180_v3 = vpop.f32.mrb[15].mxu0  ;;  %v4531_v49 = vpop.f32.mrb[16].mxu1 }
 0x1d3   :  { %v4575_v33 = vadd.f32 %v3180_v3, %v1683_v39  ;;  %v5909_v16 = vadd.f32 %v4561_v24, %v4531_v49  ;;  %v3483_v52 = vpop.f32.mrb[17].mxu1 }
 0x1d4   :  { %v5911_v42 = vadd.f32 %v4563_v32, %v3483_v52  ;;  %v4532_v35 = vpop.f32.mrb[18].mxu1 }
 0x1d5   :  { %v5913_v6 = vadd.f32 %v4565_v5, %v4532_v35  ;;  %v3486_v61 = vpop.f32.mrb[19].mxu1 }
 0x1d6   :  { %v5915_v50 = vadd.f32 %v4567_v25, %v3486_v61 }
 0x1d7   :  { %v4523_v28 = vpop.f32.mrb[0].mxu0  ;;  %v4079_v45 = vpack.c.bf16 %v5913_v6, %v5909_v16 }
 0x1d8   :  { %v5919_v56 = vadd.f32 %v4523_v28, %v4363_v7  ;;  %v3451_v17 = vpop.f32.mrb[1].mxu0  ;;  %v3543_v20 = vadd.f32 %v5915_v50, %v5911_v42  ;;  %v4074_v13 = vpack.c.bf16 %v5915_v50, %v5911_v42 }
 0x1d9   :  { %v5925_v2 = vadd.f32 %v3451_v17, %v1632_v48  ;;  %v4524_v15 = vpop.f32.mrb[2].mxu0  ;;  %4102 = vst [vmem:[%s5993_s4 + $0x28] sm:$0xff] %v4079_v45  }
 0x1da   :  { %v5930_v36 = vadd.f32 %v4524_v15, %v4364_v62  ;;  %v3454_v63 = vpop.f32.mrb[3].mxu0  ;;  %v3544_v12 = vadd.f32 %v5909_v16, %v3543_v20  ;;  %4101 = vst [vmem:[%s5993_s4 + $0x20] sm:$0xff] %v4074_v13   ;;  %v4535_v46 = vpop.f32.mrb[20].mxu1 }
 0x1db   :  { %v5936_v8 = vadd.f32 %v3454_v63, %v1635_v11  ;;  %v4570_v60 = vadd.f32 %v4569_v37, %v4535_v46  ;;  %v3499_v10 = vpop.f32.mrb[21].mxu1 }
 0x1dc   :  { %v4059_v54 = vpack.c.bf16 %v5930_v36, %v5919_v56  ;;  %v4572_v14 = vadd.f32 %v4571_v43, %v3499_v10  ;;  %v3545_v40 = vadd.f32 %v5913_v6, %v3544_v12  ;;  %v4536_v26 = vpop.f32.mrb[22].mxu1 }
 0x1dd   :  { %v3530_v38 = vadd.f32 %v5936_v8, %v5925_v2  ;;  %v4054_v21 = vpack.c.bf16 %v5936_v8, %v5925_v2  ;;  %v4574_v58 = vadd.f32 %v4573_v19, %v4536_v26  ;;  %v3502_v4 = vpop.f32.mrb[23].mxu1 }
 0x1de   :  { %4098 = vst [vmem:[%s5993_s4 + $0x8] sm:$0xff] %v4059_v54   ;;  %v3546_v23 = vadd.f32 %v4572_v14, %v3545_v40  ;;  %v4576_v7 = vadd.f32 %v4575_v33, %v3502_v4 }
 0x1df   :  { %v3531_v48 = vadd.f32 %v5919_v56, %v3530_v38  ;;  %4055 = vst [vmem:[%s5993_s4] sm:$0xff] %v4054_v21   ;;  %v4527_v62 = vpop.f32.mrb[4].mxu0  ;;  %v4089_v11 = vpack.c.bf16 %v4574_v58, %v4570_v60 }
 0x1e0   :  { %v4557_v51 = vadd.f32 %v4527_v62, %v5901_v1  ;;  %v3467_v53 = vpop.f32.mrb[5].mxu0  ;;  %v3547_v57 = vadd.f32 %v4576_v7, %v3546_v23  ;;  %v4084_v31 = vpack.c.bf16 %v4576_v7, %v4572_v14 }
 0x1e1   :  { %v4558_v22 = vadd.f32 %v3467_v53, %v5903_v41  ;;  %v3532_v24 = vadd.f32 %v5930_v36, %v3531_v48  ;;  %v4528_v47 = vpop.f32.mrb[6].mxu0  ;;  %4104 = vst [vmem:[%s5993_s4 + $0x38] sm:$0xff] %v4089_v11  }
 0x1e2   :  { %v4559_v32 = vadd.f32 %v4528_v47, %v5905_v30  ;;  %v3470_v27 = vpop.f32.mrb[7].mxu0  ;;  %v3548_v5 = vadd.f32 %v4570_v60, %v3547_v57  ;;  %4103 = vst [vmem:[%s5993_s4 + $0x30] sm:$0xff] %v4084_v31  }
 0x1e3   :  { %v3533_v1 = vadd.f32 %v4558_v22, %v3532_v24  ;;  %v4560_v44 = vadd.f32 %v3470_v27, %v5907_v34 }
 0x1e4   :  { %v4069_v55 = vpack.c.bf16 %v4559_v32, %v4557_v51  ;;  %v3549_v41 = vadd.f32 %v4574_v58, %v3548_v5 }
 0x1e5   :  { %v3534_v25 = vadd.f32 %v4560_v44, %v3533_v1  ;;  %v4064_v29 = vpack.c.bf16 %v4560_v44, %v4558_v22 }
 0x1e6   :  { %4100 = vst [vmem:[%s5993_s4 + $0x18] sm:$0xff] %v4069_v55   ;;  %v3550_v9 = vrot.slane %v3549_v41, 4 }
 0x1e7   :  { %v3535_v39 = vadd.f32 %v4557_v51, %v3534_v25  ;;  %4099 = vst [vmem:[%s5993_s4 + $0x10] sm:$0xff] %v4064_v29  }
 0x1e8   :  { %v3551_v30 = vadd.f32 %v3550_v9, %v3549_v41 }
 0x1e9   :  { %v3536_v0 = vadd.f32 %v4559_v32, %v3535_v39 }
 0x1ea   :  { %v3552_v37 = vrot.slane %v3551_v30, 2 }
 0x1eb   :  { %v3537_v59 = vrot.slane %v3536_v0, 4 }
 0x1ec   :  { %v3553_v43 = vadd.f32 %v3552_v37, %v3551_v30 }
 0x1ed   :  { %v3538_v34 = vadd.f32 %v3537_v59, %v3536_v0 }
 0x1ee   :  { %v3554_v18 = vrot.slane %v3553_v43, 1 }
 0x1ef   :  { %v3539_v19 = vrot.slane %v3538_v34, 2 }
 0x1f0   :  { %v3555_v3 = vadd.f32 %v3554_v18, %v3553_v43 }
 0x1f1   :  { %v3540_v49 = vadd.f32 %v3539_v19, %v3538_v34 }
 0x1f2   :  { %v3558_v33 = vmul.f32 0.015625, %v3555_v3 }
 0x1f3   :  { %v3541_v52 = vrot.slane %v3540_v49, 1 }
 0x1f4   :  { %v3567_v35 = vsub.f32 %v5911_v42, %v3558_v33  ;;  %v3568_v61 = vsub.f32 %v5915_v50, %v3558_v33  ;;  %v3569_v28 = vsub.f32 %v5909_v16, %v3558_v33  ;;  %v3570_v45 = vsub.f32 %v5913_v6, %v3558_v33  ;;  %3576 = vst [vmem:[%s5994_s5 + $0x1] sm:$0x1] %v3558_v33 }
 0x1f5   :  { %v3542_v17 = vadd.f32 %v3541_v52, %v3540_v49  ;;  %v3571_v20 = vsub.f32 %v4572_v14, %v3558_v33  ;;  %v3572_v13 = vsub.f32 %v4576_v7, %v3558_v33  ;;  %v3573_v15 = vsub.f32 %v4570_v60, %v3558_v33 }
 0x1f6   :  { %v3574_v63 = vsub.f32 %v4574_v58, %v3558_v33  ;;  %v3585_v12 = vmul.f32 %v3567_v35, %v3567_v35  ;;  %v3586_v46 = vmul.f32 %v3568_v61, %v3568_v61  ;;  %v3587_v58 = vmul.f32 %v3569_v28, %v3569_v28 }
 0x1f7   :  { %v3557_v10 = vmul.f32 0.015625, %v3542_v17  ;;  %v3590_v53 = vmul.f32 %v3572_v13, %v3572_v13  ;;  %v3591_v24 = vmul.f32 %v3573_v15, %v3573_v15 }
 0x1f8   :  { %v3606_v54 = vadd.f32 %v3586_v46, %v3585_v12  ;;  %v3592_v27 = vmul.f32 %v3574_v63, %v3574_v63 }
 0x1f9   :  { %v3559_v42 = vsub.f32 %v5925_v2, %v3557_v10  ;;  %v3560_v50 = vsub.f32 %v5936_v8, %v3557_v10  ;;  %v3561_v16 = vsub.f32 %v5919_v56, %v3557_v10  ;;  %v3562_v6 = vsub.f32 %v5930_v36, %v3557_v10  ;;  %3575 = vst [vmem:[%s5994_s5] sm:$0x1] %v3557_v10 }
 0x1fa   :  { %v3563_v14 = vsub.f32 %v4558_v22, %v3557_v10  ;;  %v3564_v40 = vsub.f32 %v4560_v44, %v3557_v10  ;;  %v3565_v60 = vsub.f32 %v4557_v51, %v3557_v10  ;;  %v3566_v26 = vsub.f32 %v4559_v32, %v3557_v10 }
 0x1fb   :  { %v3577_v38 = vmul.f32 %v3559_v42, %v3559_v42  ;;  %v3578_v21 = vmul.f32 %v3560_v50, %v3560_v50  ;;  %v3579_v4 = vmul.f32 %v3561_v16, %v3561_v16  ;;  %v3588_v2 = vmul.f32 %v3570_v45, %v3570_v45 }
 0x1fc   :  { %v3607_v7 = vadd.f32 %v3606_v54, %v3587_v58  ;;  %v3580_v8 = vmul.f32 %v3562_v6, %v3562_v6  ;;  %v3589_v56 = vmul.f32 %v3571_v20, %v3571_v20  ;;  %v3581_v36 = vmul.f32 %v3563_v14, %v3563_v14 }
 0x1fd   :  { %v3593_v23 = vadd.f32 %v3578_v21, %v3577_v38  ;;  %v3582_v31 = vmul.f32 %v3564_v40, %v3564_v40  ;;  %v3583_v47 = vmul.f32 %v3565_v60, %v3565_v60  ;;  %v3584_v1 = vmul.f32 %v3566_v26, %v3566_v26 }
 0x1fe   :  { %v3608_v62 = vadd.f32 %v3607_v7, %v3588_v2 }
 0x1ff   :  { %v3594_v48 = vadd.f32 %v3593_v23, %v3579_v4 }
 0x200   :  { %v3609_v57 = vadd.f32 %v3608_v62, %v3589_v56 }
 0x201   :  { %v3595_v11 = vadd.f32 %v3594_v48, %v3580_v8 }
 0x202   :  { %v3610_v51 = vadd.f32 %v3609_v57, %v3590_v53 }
 0x203   :  { %v3596_v22 = vadd.f32 %v3595_v11, %v3581_v36 }
 0x204   :  { %v3611_v5 = vadd.f32 %v3610_v51, %v3591_v24 }
 0x205   :  { %v3597_v32 = vadd.f32 %v3596_v22, %v3582_v31 }
 0x206   :  { %v3612_v55 = vadd.f32 %v3611_v5, %v3592_v27 }
 0x207   :  { %v3598_v44 = vadd.f32 %v3597_v32, %v3583_v47 }
 0x208   :  { %v3613_v25 = vrot.slane %v3612_v55, 4 }
 0x209   :  { %v3599_v41 = vadd.f32 %v3598_v44, %v3584_v1 }
 0x20a   :  { %v3614_v9 = vadd.f32 %v3613_v25, %v3612_v55 }
 0x20b   :  { %v3600_v29 = vrot.slane %v3599_v41, 4 }
 0x20c   :  { %v3615_v30 = vrot.slane %v3614_v9, 2 }
 0x20d   :  { %v3601_v39 = vadd.f32 %v3600_v29, %v3599_v41 }
 0x20e   :  { %v3616_v37 = vadd.f32 %v3615_v30, %v3614_v9 }
 0x20f   :  { %v3602_v0 = vrot.slane %v3601_v39, 2 }
 0x210   :  { %v3617_v43 = vrot.slane %v3616_v37, 1 }
 0x211   :  { %v3603_v59 = vadd.f32 %v3602_v0, %v3601_v39 }
 0x212   :  { %v3618_v18 = vadd.f32 %v3617_v43, %v3616_v37 }
 0x213   :  { %v3604_v34 = vrot.slane %v3603_v59, 1 }
 0x214   :  { %3620 = vst [vmem:[%s5995_s6 + $0x1] sm:$0x1] %v3618_v18 }
 0x215   :  { %v3605_v19 = vadd.f32 %v3604_v34, %v3603_v59 }
 0x217   :  { %3619 = vst [vmem:[%s5995_s6] sm:$0x1] %v3605_v19 }

// kernel: cnn_forward.6
= control target key start
LH: loop header
LB: loop body
LE: loop exit
PB: predicated region body
PF: predicated region fallthrough
CT: control target
= control target key end

     0   :  { %v4710_v1 = vmov 0   ;;  %vm379_vm0 = vcmask 1043456   ;;  %vm380_vm1 = vsmask.f32 7938  ;;  %vm385_vm2 = vcmask 1040384   ;;  %s5834_s3 = inlined_call_operand.vmem [shape: bf16[9,128,128], index: 3, kind: input, shape index: {}]   ;;  %s5835_s0 = inlined_call_operand.vmem [shape: bf16[2,8,8,128], index: 0, kind: input, shape index: {}]   ;;  %s5836_s1 = inlined_call_operand.vmem [shape: f32[1,128], index: 1, kind: input, shape index: {}]   ;;  %s5837_s2 = inlined_call_operand.vmem [shape: f32[1,128], index: 2, kind: input, shape index: {}]   ;;  %s5838_s4 = inlined_call_operand.vmem [shape: f32[2,1,128], index: 4, kind: output, shape index: {0}]   ;;  %s5839_s5 = inlined_call_operand.vmem [shape: f32[2,1,128], index: 5, kind: output, shape index: {1}]  }
   0x1   :  { %v4598_v0 = vld [vmem:[%s5834_s3 + $0x40] sm:$0xff]   ;;  %20 = vst [vmem:[#allocation2] sm:$0xf] %v4710_v1  ;;  %21 = vst [vmem:[#allocation2 + $0x4] sm:$0x1] %v4710_v1  ;;  %v4600_v3 = vld [vmem:[%s5834_s3 + $0x48] sm:$0xff]  }
   0x2   :  { %22 = vst [vmem:[#allocation2 + $0x8] sm:$0xf] %v4710_v1  ;;  %23 = vst [vmem:[#allocation2 + $0xc] sm:$0x1] %v4710_v1  ;;  %v4599_v2 = vld [vmem:[%s5834_s3 + $0x100] sm:$0xff]   ;;  %4165 = vmatprep.subr.bf16.mxu1 %v4598_v0  ;;  %v4601_v4 = vld [vmem:[%s5834_s3 + $0x108] sm:$0xff]  }
   0x3   :  { %24 = vst [vmem:[#allocation2 + $0x10] sm:$0xf] %v4710_v1  ;;  %25 = vst [vmem:[#allocation2 + $0x14] sm:$0x1] %v4710_v1  ;;  %4293 = vmatprep.subr.bf16.mxu0 %v4599_v2  ;;  %4166 = vmatpush3.bf16.msra.mxu1 %v4598_v0  ;;  %v4602_v5 = vld [vmem:[%s5834_s3 + $0x50] sm:$0xff]   ;;  %v4604_v7 = vld [vmem:[%s5834_s3 + $0x58] sm:$0xff]  }
   0x4   :  { %26 = vst [vmem:[#allocation2 + $0x18] sm:$0xf] %v4710_v1  ;;  %27 = vst [vmem:[#allocation2 + $0x1c] sm:$0x1] %v4710_v1  ;;  %4294 = vmatpush3.bf16.msra.mxu0 %v4599_v2  ;;  %4167 = vmatprep.subr.bf16.mxu1 %v4600_v3  ;;  %v4603_v6 = vld [vmem:[%s5834_s3 + $0x110] sm:$0xff]   ;;  %v4605_v8 = vld [vmem:[%s5834_s3 + $0x118] sm:$0xff]  }
   0x5   :  { %28 = vst [vmem:[#allocation2 + $0x20] sm:$0xf] %v4710_v1  ;;  %29 = vst [vmem:[#allocation2 + $0x24] sm:$0x1] %v4710_v1  ;;  %4295 = vmatprep.subr.bf16.mxu0 %v4601_v4  ;;  %v4606_v9 = vld [vmem:[%s5834_s3 + $0x60] sm:$0xff]   ;;  %v4608_v11 = vld [vmem:[%s5834_s3 + $0x68] sm:$0xff]  }
   0x6   :  { %30 = vst [vmem:[#allocation2 + $0x28] sm:$0xf] %v4710_v1  ;;  %31 = vst [vmem:[#allocation2 + $0x2c] sm:$0x1] %v4710_v1  ;;  %v4607_v10 = vld [vmem:[%s5834_s3 + $0x120] sm:$0xff]   ;;  %v4609_v14 = vld [vmem:[%s5834_s3 + $0x128] sm:$0xff]  }
   0x7   :  { %32 = vst [vmem:[#allocation2 + $0x30] sm:$0xf] %v4710_v1  ;;  %33 = vst [vmem:[#allocation2 + $0x34] sm:$0x1] %v4710_v1  ;;  %4168 = vmatpush3.bf16.msra.mxu1 %v4600_v3  ;;  %v3983_v12 = vld [vmem:[%s5835_s0] sm:$0xff]   ;;  %v4610_v20 = vld [vmem:[%s5834_s3 + $0x70] sm:$0xff]  }
   0x8   :  { %34 = vst [vmem:[#allocation2 + $0x38] sm:$0xf] %v4710_v1  ;;  %35 = vst [vmem:[#allocation2 + $0x3c] sm:$0x1] %v4710_v1  ;;  %4296 = vmatpush3.bf16.msra.mxu0 %v4601_v4  ;;  %4169 = vmatprep.subr.bf16.mxu1 %v4602_v5  ;;  %v4780_v13 = vld [vmem:[%s5836_s1] ss:$0 sm:$0xff]  ;;  %v3984_v15 = vunpack.c.l.bf16 %v3983_v12  ;;  %v3985_v16 = vunpack.c.h.bf16 %v3983_v12 }
   0x9   :  { %36 = vst [vmem:[#allocation2 + $0x40] sm:$0xf] %v4710_v1  ;;  %37 = vst [vmem:[#allocation2 + $0x44] sm:$0x1] %v4710_v1  ;;  %4297 = vmatprep.subr.bf16.mxu0 %v4603_v6  ;;  %v4788_v17 = vld [vmem:[%s5837_s2] ss:$0 sm:$0xff] }
   0xa   :  { %38 = vst [vmem:[#allocation2 + $0x48] sm:$0xf] %v4710_v1  ;;  %39 = vst [vmem:[#allocation2 + $0x4c] sm:$0x1] %v4710_v1  ;;  %v481_v18 = vld [vmem:[#allocation2] sm:$0xf]  ;;  %v99_v19 = vmul.f32 %v3984_v15, %v4780_v13  ;;  %v100_v21 = vmul.f32 %v3985_v16, %v4780_v13 }
   0xb   :  { %40 = vst [vmem:[#allocation2 + $0x50] sm:$0xf] %v4710_v1  ;;  %41 = vst [vmem:[#allocation2 + $0x54] sm:$0x1] %v4710_v1  ;;  %4170 = vmatpush3.bf16.msra.mxu1 %v4602_v5  ;;  %v4611_v22 = vld [vmem:[%s5834_s3 + $0x130] sm:$0xff]   ;;  %v533_v25 = vshrl.u32 %v481_v18, 16 }
   0xc   :  { %42 = vst [vmem:[#allocation2 + $0x58] sm:$0xf] %v4710_v1  ;;  %43 = vst [vmem:[#allocation2 + $0x5c] sm:$0x1] %v4710_v1  ;;  %4298 = vmatpush3.bf16.msra.mxu0 %v4603_v6  ;;  %4171 = vmatprep.subr.bf16.mxu1 %v4604_v7  ;;  %v122_v23 = vadd.f32 %v4788_v17, %v99_v19  ;;  %v513_v24 = vld [vmem:[#allocation2 + $0x4] sm:$0x1]  ;;  %v123_v27 = vadd.f32 %v4788_v17, %v100_v21 }
   0xd   :  { %44 = vst [vmem:[#allocation2 + $0x60] sm:$0xf] %v4710_v1  ;;  %45 = vst [vmem:[#allocation2 + $0x64] sm:$0x1] %v4710_v1  ;;  %4299 = vmatprep.subr.bf16.mxu0 %v4605_v8  ;;  %v536_v26 = vshll.u32 %v481_v18, 16  ;;  %v4014_v29 = vld [vmem:[%s5835_s0 + $0x8] sm:$0xff]  }
   0xe   :  { %46 = vst [vmem:[#allocation2 + $0x68] sm:$0xf] %v4710_v1  ;;  %47 = vst [vmem:[#allocation2 + $0x6c] sm:$0x1] %v4710_v1  ;;  %v138_v28 = vmax.f32 %v122_v23, 0.0  ;;  %v4612_v30 = vld [vmem:[%s5834_s3 + $0x78] sm:$0xff]   ;;  %v3988_v33 = vunpack.c.l.bf16 %v4014_v29  ;;  %v3989_v34 = vunpack.c.h.bf16 %v4014_v29 }
   0xf   :  { %48 = vst [vmem:[#allocation2 + $0x70] sm:$0xf] %v4710_v1  ;;  %49 = vst [vmem:[#allocation2 + $0x74] sm:$0x1] %v4710_v1  ;;  %4172 = vmatpush3.bf16.msra.mxu1 %v4604_v7  ;;  %v4613_v31 = vld [vmem:[%s5834_s3 + $0x138] sm:$0xff]   ;;  %v139_v32 = vmax.f32 %v123_v27, 0.0 }
  0x10   :  { %50 = vst [vmem:[#allocation2 + $0x78] sm:$0xf] %v4710_v1  ;;  %51 = vst [vmem:[#allocation2 + $0x7c] sm:$0x1] %v4710_v1  ;;  %4300 = vmatpush3.bf16.msra.mxu0 %v4605_v8  ;;  %4173 = vmatprep.subr.bf16.mxu1 %v4606_v9  ;;  %vm386_vm3 = vsmask.f32 256  ;;  %v3966_v35 = vpack.c.bf16 %v138_v28, %v138_v28  ;;  %v101_v40 = vmul.f32 %v3988_v33, %v4780_v13 }
  0x11   :  { %52 = vst [vmem:[#allocation2 + $0x80] sm:$0xf] %v4710_v1  ;;  %53 = vst [vmem:[#allocation2 + $0x84] sm:$0x1] %v4710_v1  ;;  %4301 = vmatprep.subr.bf16.mxu0 %v4607_v10  ;;  %v4809_v36 = vrot.slane %v533_v25, 4  ;;  %v542_v37 = vshll.u32 %v513_v24, 16  ;;  %v3967_v39 = vpack.c.bf16 %v139_v32, %v139_v32  ;;  %v102_v41 = vmul.f32 %v3989_v34, %v4780_v13 }
  0x12   :  { %54 = vst [vmem:[#allocation2 + $0x88] sm:$0xf] %v4710_v1  ;;  %55 = vst [vmem:[#allocation2 + $0x8c] sm:$0x1] %v4710_v1  ;;  %vm529_vm4 = vsmask.f32 3328  ;;  %v124_v51 = vadd.f32 %v4788_v17, %v101_v40 }
  0x13   :  { %56 = vst [vmem:[#allocation2 + $0x90] sm:$0xf] %v4710_v1  ;;  %57 = vst [vmem:[#allocation2 + $0x94] sm:$0x1] %v4710_v1  ;;  %4174 = vmatpush3.bf16.msra.mxu1 %v4606_v9  ;;  %v538_v38 = vrot.slane %v536_v26, 5  ;;  %v4015_v42 = vld [vmem:[%s5835_s0 + $0x10] sm:$0xff]   ;;  %v125_v52 = vadd.f32 %v4788_v17, %v102_v41 }
  0x14   :  { %58 = vst [vmem:[#allocation2 + $0x98] sm:$0xf] %v4710_v1  ;;  %59 = vst [vmem:[#allocation2 + $0x9c] sm:$0x1] %v4710_v1  ;;  %4302 = vmatpush3.bf16.msra.mxu0 %v4607_v10  ;;  %4175 = vmatprep.subr.bf16.mxu1 %v4608_v11  ;;  %v219_v43 = vshrl.u32 %v3966_v35, 16  ;;  %v222_v44 = vshll.u32 %v3966_v35, 16  ;;  %v3992_v46 = vunpack.c.l.bf16 %v4015_v42  ;;  %v3993_v59 = vunpack.c.h.bf16 %v4015_v42 }
  0x15   :  { %4303 = vmatprep.subr.bf16.mxu0 %v4609_v14  ;;  %vm530_vm5 = vsmask.f32 7440  ;;  %v4819_v45 = vld [vmem:[%s5834_s3] sm:$0xff]   ;;  %v382_v47 = vld [vmem:[#allocation2 + $0x8] sm:$0xf]  ;;  %v227_v49 = vshrl.u32 %v3967_v39, 16  ;;  %vm4825_vm6 = vmand %vm379_vm0, %vm380_vm1  ;;  %v539_v61 = vor.u32 %v538_v38, %v4809_v36 }
  0x16   :  { %v388_v48 = vld [vmem:[#allocation2 + $0xc] sm:$0x1]  ;;  %v230_v50 = vshll.u32 %v3967_v39, 16  ;;  %v221_v53 = vrot.slane %v219_v43, 7  ;;  %v4829_v55 = vrot.slane %v542_v37, 5  ;;  %v4834_v57 = vld [vmem:[%s5834_s3 + $0x140] sm:$0xff]   ;;  %v103_v58 = vmul.f32 %v3992_v46, %v4780_v13  ;;  %vm4839_vm7 = vmand %vm385_vm2, %vm386_vm3 }
  0x17   :  { %4176 = vmatpush3.bf16.msra.mxu1 %v4608_v11  ;;  %v391_v56 = vld [vmem:[#allocation2 + $0x10] sm:$0xf]  ;;  %v229_v62 = vrot.slane %v227_v49, 7  ;;  %v140_v63 = vmax.f32 %v124_v51, 0.0  ;;  %v141_v0 = vmax.f32 %v125_v52, 0.0  ;;  %v104_v5 = vmul.f32 %v3993_v59, %v4780_v13  ;;  %v4016_v15 = vld [vmem:[%s5835_s0 + $0x18] sm:$0xff]   ;;  %vm4864_vm8 = vmor %vm529_vm4, %vm530_vm5 }
  0x18   :  { %4304 = vmatpush3.bf16.msra.mxu0 %v4609_v14  ;;  %4177 = vmatprep.subr.bf16.mxu1 %v4610_v20  ;;  %v224_v1 = vor.u32 %v222_v44, %v221_v53  ;;  %v225_v2 = vrot.slane %v221_v53, 4  ;;  %v394_v3 = vld [vmem:[#allocation2 + $0x14] sm:$0x1]  ;;  %v126_v4 = vadd.f32 %v4788_v17, %v103_v58  ;;  %v4860_v25 = vrot.slane %v539_v61, 4  ;;  %v397_v27 = vld [vmem:[#allocation2 + $0x18] sm:$0xf] }
  0x19   :  { %4305 = vmatprep.subr.bf16.mxu0 %v4611_v22  ;;  %v232_v6 = vor.u32 %v230_v50, %v229_v62  ;;  %v233_v7 = vrot.slane %v229_v62, 4  ;;  %v3968_v8 = vpack.c.bf16 %v140_v63, %v140_v63  ;;  %v3969_v9 = vpack.c.bf16 %v141_v0, %v141_v0  ;;  %v400_v28 = vld [vmem:[#allocation2 + $0x1c] sm:$0x1]  ;;  %v4871_v35 = vld [vmem:[%s5835_s0 + $0x20] sm:$0xff]  }
  0x1a   :  { %v383_v10 = vsel %vm4825_vm6, %v224_v1, %v382_v47  ;;  %v389_v11 = vsel %vm4839_vm7, %v225_v2, %v388_v48  ;;  %v142_v12 = vmax.f32 %v126_v4, 0.0  ;;  %v127_v14 = vadd.f32 %v4788_v17, %v104_v5  ;;  %v406_v38 = vld [vmem:[#allocation2 + $0x24] sm:$0x1]  ;;  %v409_v48 = vld [vmem:[#allocation2 + $0x28] sm:$0xf] }
  0x1b   :  { %4178 = vmatpush3.bf16.msra.mxu1 %v4610_v20  ;;  %384 = vst [vmem:[#allocation2 + $0x8] sm:$0xf] %v383_v10  ;;  %390 = vst [vmem:[#allocation2 + $0xc] sm:$0x1] %v389_v11  ;;  %v392_v16 = vsel %vm4825_vm6, %v232_v6, %v391_v56  ;;  %v395_v18 = vsel %vm4839_vm7, %v233_v7, %v394_v3  ;;  %v235_v19 = vshrl.u32 %v3968_v8, 16  ;;  %v238_v20 = vshll.u32 %v3968_v8, 16 }
  0x1c   :  { %4306 = vmatpush3.bf16.msra.mxu0 %v4611_v22  ;;  %4179 = vmatprep.subr.bf16.mxu1 %v4612_v30  ;;  %393 = vst [vmem:[#allocation2 + $0x10] sm:$0xf] %v392_v16  ;;  %396 = vst [vmem:[#allocation2 + $0x14] sm:$0x1] %v395_v18  ;;  %v243_v21 = vshrl.u32 %v3969_v9, 16  ;;  %v246_v22 = vshll.u32 %v3969_v9, 16  ;;  %v3970_v23 = vpack.c.bf16 %v142_v12, %v142_v12  ;;  %v3996_v34 = vunpack.c.l.bf16 %v4016_v15 }
  0x1d   :  { %4307 = vmatprep.subr.bf16.mxu0 %v4613_v31  ;;  %v143_v24 = vmax.f32 %v127_v14, 0.0  ;;  %v237_v26 = vrot.slane %v235_v19, 7  ;;  %v3997_v43 = vunpack.c.h.bf16 %v4016_v15  ;;  %v545_v44 = vsel %vm4864_vm8, %v4860_v25, %v4829_v55 }
  0x1e   :  { %v251_v32 = vshrl.u32 %v3970_v23, 16  ;;  %v254_v33 = vshll.u32 %v3970_v23, 16  ;;  %v4000_v49 = vunpack.c.l.bf16 %v4871_v35  ;;  %v105_v58 = vmul.f32 %v3996_v34, %v4780_v13 }
  0x1f   :  { %4180 = vmatpush3.bf16.msra.mxu1 %v4612_v30  ;;  %v245_v30 = vrot.slane %v243_v21, 7  ;;  %v240_v36 = vor.u32 %v238_v20, %v237_v26  ;;  %v241_v37 = vrot.slane %v237_v26, 4  ;;  %v4873_v39 = vpack.c.bf16 %v143_v24, %v143_v24 }
  0x20   :  { %4308 = vmatpush3.bf16.msra.mxu0 %v4613_v31  ;;  %4197 = vmatprep.subr.bf16.mxu1 %v4819_v45  ;;  %v403_v31 = vld [vmem:[#allocation2 + $0x20] sm:$0xf]  ;;  %v4875_v42 = vrot.slane %v251_v32, 7  ;;  %v106_v6 = vmul.f32 %v3997_v43, %v4780_v13  ;;  %v107_v32 = vmul.f32 %v4000_v49, %v4780_v13  ;;  %vm1191_vm9 = vcmask 1042432  }
  0x21   :  { %4325 = vmatprep.subr.bf16.mxu0 %v4834_v57  ;;  %v248_v40 = vor.u32 %v246_v22, %v245_v30  ;;  %v249_v41 = vrot.slane %v245_v30, 4  ;;  %v398_v46 = vsel %vm4825_vm6, %v240_v36, %v397_v27  ;;  %v401_v47 = vsel %vm4839_vm7, %v241_v37, %v400_v28 }
  0x22   :  { %v482_v50 = vld [vmem:[#allocation2 + $0x8] sm:$0xf]  ;;  %v514_v51 = vld [vmem:[#allocation2 + $0xc] sm:$0x1]  ;;  %399 = vst [vmem:[#allocation2 + $0x18] sm:$0xf] %v398_v46  ;;  %v256_v56 = vor.u32 %v254_v33, %v4875_v42  ;;  %v4906_v22 = vadd.f32 %v4788_v17, %v105_v58 }
  0x23   :  { %v1710_v52 = vld [vmem:[#allocation2 + $0x8] sm:$0xf]  ;;  %402 = vst [vmem:[#allocation2 + $0x1c] sm:$0x1] %v401_v47  ;;  %v404_v53 = vsel %vm4825_vm6, %v248_v40, %v403_v31  ;;  %v407_v55 = vsel %vm4839_vm7, %v249_v41, %v406_v38  ;;  %v547_v59 = vshrl.u32 %v482_v50, 16  ;;  %v550_v61 = vshll.u32 %v482_v50, 16 }
  0x24   :  { %v556_v62 = vshll.u32 %v514_v51, 16  ;;  %v4892_v63 = vld [vmem:[#allocation2 + $0xc] sm:$0x1]  ;;  %405 = vst [vmem:[#allocation2 + $0x20] sm:$0xf] %v404_v53  ;;  %v259_v0 = vshrl.u32 %v4873_v39, 16  ;;  %v410_v5 = vsel %vm4825_vm6, %v256_v56, %v409_v48  ;;  %v4911_v31 = vadd.f32 %v4788_v17, %v106_v6 }
  0x25   :  { %408 = vst [vmem:[#allocation2 + $0x24] sm:$0x1] %v407_v55  ;;  %v1712_v1 = vld [vmem:[#allocation2 + $0x10] sm:$0xf]  ;;  %v4895_v2 = vld [vmem:[#allocation2 + $0x14] sm:$0x1] }
  0x26   :  { %v1743_v3 = vshrl.u32 %v1710_v52, 16  ;;  %v1746_v4 = vshll.u32 %v1710_v52, 16  ;;  %v549_v7 = vrot.slane %v547_v59, 4  ;;  %v552_v8 = vrot.slane %v550_v61, 5  ;;  %411 = vst [vmem:[#allocation2 + $0x28] sm:$0xf] %v410_v5 }
  0x27   :  { %v1752_v9 = vshll.u32 %v4892_v63, 16  ;;  %v262_v10 = vshll.u32 %v4873_v39, 16  ;;  %v1757_v14 = vshrl.u32 %v1712_v1, 16  ;;  %v1760_v15 = vshll.u32 %v1712_v1, 16  ;;  %v4902_v16 = vld [vmem:[#allocation2 + $0x10] sm:$0xf] }
  0x28   :  { %v1745_v11 = vrot.slane %v1743_v3, 4  ;;  %v1748_v12 = vrot.slane %v1746_v4, 5  ;;  %v553_v18 = vor.u32 %v552_v8, %v549_v7  ;;  %v558_v19 = vrot.slane %v556_v62, 5  ;;  %v515_v21 = vld [vmem:[#allocation2 + $0x14] sm:$0x1] }
  0x29   :  { %v1766_v20 = vshll.u32 %v4895_v2, 16  ;;  %v1754_v24 = vrot.slane %v1752_v9, 5  ;;  %v1759_v25 = vrot.slane %v1757_v14, 4  ;;  %v1762_v26 = vrot.slane %v1760_v15, 5  ;;  %v4908_v30 = vld [vmem:[#allocation2 + $0x18] sm:$0xf] }
  0x2a   :  { %v1749_v23 = vor.u32 %v1748_v12, %v1745_v11  ;;  %v554_v27 = vrot.slane %v553_v18, 4  ;;  %v561_v36 = vshrl.u32 %v4902_v16, 16  ;;  %v564_v37 = vshll.u32 %v4902_v16, 16  ;;  %v516_v40 = vld [vmem:[#allocation2 + $0x1c] sm:$0x1] }
  0x2b   :  { %v1768_v28 = vrot.slane %v1766_v20, 5  ;;  %v1763_v34 = vor.u32 %v1762_v26, %v1759_v25  ;;  %v570_v41 = vshll.u32 %v515_v21, 16  ;;  %v575_v43 = vshrl.u32 %v4908_v30, 16  ;;  %v1714_v51 = vld [vmem:[#allocation2 + $0x18] sm:$0xf] }
  0x2c   :  { %v1750_v33 = vrot.slane %v1749_v23, 4  ;;  %v559_v38 = vsel %vm4864_vm8, %v554_v27, %v558_v19  ;;  %v578_v46 = vshll.u32 %v4908_v30, 16  ;;  %v563_v50 = vrot.slane %v561_v36, 4  ;;  %v4922_v52 = vld [vmem:[#allocation2 + $0x1c] sm:$0x1]  ;;  %v4616_v36 = vld [vmem:[%s5834_s3 + $0x8] sm:$0xff]  }
  0x2d   :  { %v3662_v47 = vcombine.low %v545_v44, %v559_v38  ;;  %v1764_v49 = vrot.slane %v1763_v34, 4  ;;  %v2226_v53 = vrot.slane %v4892_v63, 5  ;;  %v566_v55 = vrot.slane %v564_v37, 5  ;;  %v1716_v59 = vld [vmem:[#allocation2 + $0x20] sm:$0xf] }
  0x2e   :  { %v1755_v48 = vsel %vm4864_vm8, %v1750_v33, %v1754_v24  ;;  %v577_v56 = vrot.slane %v575_v43, 4  ;;  %v580_v58 = vrot.slane %v578_v46, 5  ;;  %v572_v62 = vrot.slane %v570_v41, 5  ;;  %v4928_v6 = vld [vmem:[#allocation2 + $0x24] sm:$0x1] }
  0x2f   :  { %4181 = vmatprep.mubr.bf16.mxu1 %v3662_v47  ;;  %v1769_v61 = vsel %vm4864_vm8, %v1764_v49, %v1768_v28  ;;  %v584_v1 = vshll.u32 %v516_v40, 16  ;;  %v567_v4 = vor.u32 %v566_v55, %v563_v50  ;;  %v1771_v7 = vshrl.u32 %v1714_v51, 16  ;;  %v4931_v20 = vld [vmem:[#allocation2 + $0x20] sm:$0xf]  ;;  %v412_v25 = vld [vmem:[#allocation2 + $0x2c] sm:$0x1] }
  0x30   :  { %v3790_v3 = vcombine.low %v1755_v48, %v1769_v61  ;;  %v581_v5 = vor.u32 %v580_v58, %v577_v56  ;;  %v1774_v9 = vshll.u32 %v1714_v51, 16  ;;  %v1780_v11 = vshll.u32 %v4922_v52, 16  ;;  %v4934_v26 = vld [vmem:[#allocation2 + $0x28] sm:$0xf]  ;;  %v517_v37 = vld [vmem:[#allocation2 + $0x24] sm:$0x1] }
  0x31   :  { %v586_v8 = vrot.slane %v584_v1, 5  ;;  %v1785_v12 = vshrl.u32 %v1716_v59, 16  ;;  %v568_v14 = vrot.slane %v567_v4, 4  ;;  %v1773_v18 = vrot.slane %v1771_v7, 4  ;;  %v1718_v58 = vld [vmem:[#allocation2 + $0x28] sm:$0xf] }
  0x32   :  { %4309 = vmatprep.mubr.bf16.mxu0 %v3790_v3  ;;  %v582_v15 = vrot.slane %v581_v5, 4  ;;  %v1788_v19 = vshll.u32 %v1716_v59, 16  ;;  %v1776_v21 = vrot.slane %v1774_v9, 5  ;;  %v1794_v24 = vshll.u32 %v4928_v6, 16  ;;  %v4617_v3 = vld [vmem:[%s5834_s3 + $0x148] sm:$0xff]  }
  0x33   :  { %v1787_v23 = vrot.slane %v1785_v12, 4  ;;  %v4937_v27 = vadd.f32 %v4788_v17, %v107_v32  ;;  %v573_v28 = vsel %vm4864_vm8, %v568_v14, %v572_v62  ;;  %v4001_v38 = vunpack.c.h.bf16 %v4871_v35  ;;  %v415_v12 = vld [vmem:[#allocation2 + $0x30] sm:$0xf]  ;;  %v472_v44 = vld [vmem:[#allocation2 + $0x8c] sm:$0x1] }
  0x34   :  { %v587_v33 = vsel %vm4864_vm8, %v582_v15, %v586_v8  ;;  %v1790_v34 = vrot.slane %v1788_v19, 5  ;;  %v1777_v41 = vor.u32 %v1776_v21, %v1773_v18  ;;  %v1782_v43 = vrot.slane %v1780_v11, 5  ;;  %v418_v19 = vld [vmem:[#allocation2 + $0x34] sm:$0x1]  ;;  %v3210_v29 = vld [vmem:[#allocation2 + $0x28] sm:$0xe] }
  0x35   :  { %v3663_v40 = vcombine.low %v573_v28, %v587_v33  ;;  %v1796_v46 = vrot.slane %v1794_v24, 5  ;;  %v257_v47 = vrot.slane %v4875_v42, 4  ;;  %v589_v48 = vshrl.u32 %v4931_v20, 16 }
  0x36   :  { %v1791_v32 = vor.u32 %v1790_v34, %v1787_v23  ;;  %v592_v49 = vshll.u32 %v4931_v20, 16  ;;  %v1778_v50 = vrot.slane %v1777_v41, 4  ;;  %v598_v51 = vshll.u32 %v517_v37, 16 }
  0x37   :  { %4182 = vmatmul.mubr.bf16.vlgmr.msra.gmra.mrb[0].mxu1 %v3663_v40  ;;  %v603_v55 = vshrl.u32 %v4934_v26, 16  ;;  %v606_v56 = vshll.u32 %v4934_v26, 16  ;;  %v413_v61 = vsel %vm4839_vm7, %v257_v47, %v412_v25  ;;  %v591_v62 = vrot.slane %v589_v48, 4 }
  0x38   :  { %4198 = vmatpush3.bf16.msra.mxu1 %v4819_v45  ;;  %v1792_v59 = vrot.slane %v1791_v32, 4  ;;  %v594_v42 = vrot.slane %v592_v49, 5  ;;  %v1783_v1 = vsel %vm4864_vm8, %v1778_v50, %v1782_v43  ;;  %414 = vst [vmem:[#allocation2 + $0x2c] sm:$0x1] %v413_v61  ;;  %v4960_v4 = vrot.slane %v598_v51, 5  ;;  %v4618_v45 = vld [vmem:[%s5834_s3 + $0x10] sm:$0xff]  }
  0x39   :  { %4199 = vmatprep.subr.bf16.mxu1 %v4616_v36  ;;  %v605_v5 = vrot.slane %v603_v55, 4  ;;  %v608_v7 = vrot.slane %v606_v56, 5  ;;  %v261_v11 = vrot.slane %v259_v0, 7  ;;  %v1799_v14 = vshrl.u32 %v1718_v58, 16  ;;  %v421_v51 = vld [vmem:[#allocation2 + $0x38] sm:$0xf] }
  0x3a   :  { %v1797_v8 = vsel %vm4864_vm8, %v1792_v59, %v1796_v46  ;;  %v595_v9 = vor.u32 %v594_v42, %v591_v62  ;;  %v1802_v21 = vshll.u32 %v1718_v58, 16  ;;  %v144_v23 = vmax.f32 %v4906_v22, 0.0  ;;  %v4620_v22 = vld [vmem:[%s5834_s3 + $0x18] sm:$0xff]   ;;  %v4619_v46 = vld [vmem:[%s5834_s3 + $0x150] sm:$0xff]   ;;  %v4622_v42 = vld [vmem:[%s5834_s3 + $0x20] sm:$0xff]  }
  0x3b   :  { %v3791_v15 = vcombine.low %v1783_v1, %v1797_v8  ;;  %v609_v18 = vor.u32 %v608_v7, %v605_v5  ;;  %v264_v25 = vor.u32 %v262_v10, %v261_v11  ;;  %v265_v28 = vrot.slane %v261_v11, 4 }
  0x3c   :  { %4200 = vmatpush3.bf16.msra.mxu1 %v4616_v36  ;;  %v4970_v24 = vrot.slane %v595_v9, 4  ;;  %v1801_v33 = vrot.slane %v1799_v14, 4  ;;  %v1804_v0 = vrot.slane %v1802_v21, 5  ;;  %v3972_v37 = vpack.c.bf16 %v144_v23, %v144_v23  ;;  %v489_v36 = vld [vmem:[#allocation2 + $0x50] sm:$0xf] }
  0x3d   :  { %4310 = vmatmul.mubr.bf16.vlgmr.msra.gmra.mrb[0].mxu0 %v3791_v15  ;;  %4201 = vmatprep.subr.bf16.mxu1 %v4618_v45  ;;  %v145_v40 = vmax.f32 %v4911_v31, 0.0  ;;  %v610_v41 = vrot.slane %v609_v18, 4  ;;  %v416_v39 = vsel %vm4825_vm6, %v264_v25, %v415_v12  ;;  %v419_v10 = vsel %vm4839_vm7, %v265_v28, %v418_v19  ;;  %v427_v14 = vld [vmem:[#allocation2 + $0x40] sm:$0xf]  ;;  %v4621_v15 = vld [vmem:[%s5834_s3 + $0x158] sm:$0xff]  }
  0x3e   :  { %4326 = vmatpush3.bf16.msra.mxu0 %v4834_v57  ;;  %v146_v43 = vmax.f32 %v4937_v27, 0.0  ;;  %417 = vst [vmem:[#allocation2 + $0x30] sm:$0xf] %v416_v39  ;;  %420 = vst [vmem:[#allocation2 + $0x34] sm:$0x1] %v419_v10  ;;  %v1805_v31 = vor.u32 %v1804_v0, %v1801_v33  ;;  %v267_v32 = vshrl.u32 %v3972_v37, 16  ;;  %v601_v49 = vsel %vm4864_vm8, %v4970_v24, %v4960_v4 }
  0x3f   :  { %4327 = vmatprep.subr.bf16.mxu0 %v4617_v3  ;;  %v270_v47 = vshll.u32 %v3972_v37, 16  ;;  %v3973_v57 = vpack.c.bf16 %v145_v40, %v145_v40  ;;  %v518_v48 = vld [vmem:[#allocation2 + $0x2c] sm:$0x1]  ;;  %v424_v27 = vld [vmem:[#allocation2 + $0x3c] sm:$0x1]  ;;  %v645_v56 = vshrl.u32 %v489_v36, 16  ;;  %v4998_v1 = vmul.f32 %v4001_v38, %v4780_v13 }
  0x40   :  { %v1719_v50 = vld [vmem:[#allocation2 + $0x2c] sm:$0x1]  ;;  %4202 = vmatpush3.bf16.msra.mxu1 %v4618_v45  ;;  %v3974_v55 = vpack.c.bf16 %v146_v43, %v146_v43  ;;  %v648_v58 = vshll.u32 %v489_v36, 16  ;;  %v612_v59 = vshll.u32 %v518_v48, 16  ;;  %v269_v62 = vrot.slane %v267_v32, 7  ;;  %v5018_v28 = vld [vmem:[%s5834_s3 + $0x160] sm:$0xff]  }
  0x41   :  { %v1808_v61 = vshll.u32 %v1719_v50, 16  ;;  %4203 = vmatprep.subr.bf16.mxu1 %v4620_v22  ;;  %v275_v4 = vshrl.u32 %v3973_v57, 16  ;;  %v278_v5 = vshll.u32 %v3973_v57, 16  ;;  %v5000_v9 = vrot.slane %v1805_v31, 4  ;;  %v430_v25 = vld [vmem:[#allocation2 + $0x44] sm:$0x1] }
  0x42   :  { %4328 = vmatpush3.bf16.msra.mxu0 %v4617_v3  ;;  %v283_v7 = vshrl.u32 %v3974_v55, 16  ;;  %v286_v45 = vshll.u32 %v3974_v55, 16  ;;  %v614_v8 = vrot.slane %v612_v59, 5  ;;  %v272_v11 = vor.u32 %v270_v47, %v269_v62  ;;  %v4624_v33 = vld [vmem:[%s5834_s3 + $0x28] sm:$0xff]   ;;  %v433_v39 = vld [vmem:[#allocation2 + $0x58] sm:$0xf] }
  0x43   :  { %4329 = vmatprep.subr.bf16.mxu0 %v4619_v46  ;;  %v273_v12 = vrot.slane %v269_v62, 4  ;;  %v277_v18 = vrot.slane %v275_v4, 7  ;;  %v647_v38 = vrot.slane %v645_v56, 4  ;;  %v650_v3 = vrot.slane %v648_v58, 5  ;;  %v521_v10 = vld [vmem:[#allocation2 + $0x54] sm:$0x1] }
  0x44   :  { %4204 = vmatpush3.bf16.msra.mxu1 %v4620_v22  ;;  %v5005_v35 = vrot.slane %v283_v7, 7  ;;  %v615_v19 = vsel %vm4864_vm8, %v610_v41, %v614_v8  ;;  %v5009_v21 = vrot.slane %v1808_v61, 5  ;;  %v422_v23 = vsel %vm4825_vm6, %v272_v11, %v421_v51  ;;  %v4626_v55 = vld [vmem:[%s5834_s3 + $0x30] sm:$0xff]  }
  0x45   :  { %v425_v24 = vsel %vm4839_vm7, %v273_v12, %v424_v27  ;;  %4205 = vmatprep.subr.bf16.mxu1 %v4622_v42  ;;  %v3664_v0 = vcombine.low %v601_v49, %v615_v19  ;;  %v1720_v37 = vld [vmem:[#allocation2 + $0x30] sm:$0xf]  ;;  %v5023_v40 = vld [vmem:[#allocation2 + $0x34] sm:$0x1]  ;;  %423 = vst [vmem:[#allocation2 + $0x38] sm:$0xf] %v422_v23  ;;  %v280_v36 = vor.u32 %v278_v5, %v277_v18 }
  0x46   :  { %426 = vst [vmem:[#allocation2 + $0x3c] sm:$0x1] %v425_v24  ;;  %v5025_v22 = vld [vmem:[#allocation2 + $0x30] sm:$0xf]  ;;  %4330 = vmatpush3.bf16.msra.mxu0 %v4619_v46  ;;  %v288_v41 = vor.u32 %v286_v45, %v5005_v35  ;;  %v651_v43 = vor.u32 %v650_v3, %v647_v38  ;;  %v1813_v31 = vshrl.u32 %v1720_v37, 16  ;;  %v1816_v32 = vshll.u32 %v1720_v37, 16 }
  0x47   :  { %v1822_v47 = vshll.u32 %v5023_v40, 16  ;;  %v519_v57 = vld [vmem:[#allocation2 + $0x34] sm:$0x1]  ;;  %v617_v48 = vshrl.u32 %v5025_v22, 16  ;;  %4331 = vmatprep.subr.bf16.mxu0 %v4621_v15  ;;  %v436_v49 = vld [vmem:[#allocation2 + $0x5c] sm:$0x1]  ;;  %4185 = vmatprep.mubr.bf16.mxu1 %v3664_v0  ;;  %v428_v46 = vsel %vm4825_vm6, %v280_v36, %v427_v14  ;;  %v5070_v19 = vadd.f32 %v4788_v17, %v4998_v1 }
  0x48   :  { %v620_v50 = vshll.u32 %v5025_v22, 16  ;;  %v626_v51 = vshll.u32 %v519_v57, 16  ;;  %v281_v27 = vrot.slane %v277_v18, 4  ;;  %4206 = vmatpush3.bf16.msra.mxu1 %v4622_v42  ;;  %v1815_v56 = vrot.slane %v1813_v31, 4  ;;  %429 = vst [vmem:[#allocation2 + $0x40] sm:$0xf] %v428_v46 }
  0x49   :  { %v1818_v58 = vrot.slane %v1816_v32, 5  ;;  %v1824_v59 = vrot.slane %v1822_v47, 5  ;;  %v619_v61 = vrot.slane %v617_v48, 4  ;;  %4207 = vmatprep.subr.bf16.mxu1 %v4624_v33  ;;  %v289_v7 = vrot.slane %v5005_v35, 4  ;;  %v5044_v42 = vld [vmem:[%s5835_s0 + $0x28] sm:$0xff]   ;;  %v4628_v18 = vld [vmem:[%s5834_s3 + $0x38] sm:$0xff]  }
  0x4a   :  { %v622_v62 = vrot.slane %v620_v50, 5  ;;  %v5036_v4 = vrot.slane %v626_v51, 5  ;;  %v431_v5 = vsel %vm4839_vm7, %v281_v27, %v430_v25  ;;  %4332 = vmatpush3.bf16.msra.mxu0 %v4621_v15  ;;  %v4625_v45 = vld [vmem:[%s5834_s3 + $0x168] sm:$0xff]   ;;  %v434_v11 = vsel %vm4825_vm6, %v288_v41, %v433_v39  ;;  %v5057_v15 = vld [vmem:[%s5835_s0 + $0x30] sm:$0xff]  }
  0x4b   :  { %v1819_v8 = vor.u32 %v1818_v58, %v1815_v56  ;;  %432 = vst [vmem:[#allocation2 + $0x44] sm:$0x1] %v431_v5  ;;  %v5051_v12 = vrot.slane %v651_v43, 4  ;;  %v654_v14 = vshll.u32 %v521_v10, 16  ;;  %4333 = vmatprep.subr.bf16.mxu0 %v5018_v28  ;;  %v1811_v35 = vsel %vm4864_vm8, %v5000_v9, %v5009_v21  ;;  %435 = vst [vmem:[#allocation2 + $0x58] sm:$0xf] %v434_v11 }
  0x4c   :  { %v623_v38 = vor.u32 %v622_v62, %v619_v61  ;;  %v437_v3 = vsel %vm4839_vm7, %v289_v7, %v436_v49  ;;  %4208 = vmatpush3.bf16.msra.mxu1 %v4624_v33  ;;  %v5072_v24 = vld [vmem:[#allocation2 + $0x38] sm:$0xf]  ;;  %v4004_v37 = vunpack.c.l.bf16 %v5044_v42  ;;  %v4005_v9 = vunpack.c.h.bf16 %v5044_v42  ;;  %v4627_v21 = vld [vmem:[%s5834_s3 + $0x170] sm:$0xff]   ;;  %v5096_v58 = vld [vmem:[%s5834_s3 + $0x80] sm:$0xff]  }
  0x4d   :  { %v1820_v23 = vrot.slane %v1819_v8, 4  ;;  %v520_v25 = vld [vmem:[#allocation2 + $0x3c] sm:$0x1]  ;;  %438 = vst [vmem:[#allocation2 + $0x5c] sm:$0x1] %v437_v3  ;;  %v5074_v0 = vrot.slane %v654_v14, 5  ;;  %4209 = vmatprep.subr.bf16.mxu1 %v4626_v55  ;;  %v4008_v47 = vunpack.c.l.bf16 %v5057_v15 }
  0x4e   :  { %v624_v36 = vrot.slane %v623_v38, 4  ;;  %v631_v1 = vshrl.u32 %v5072_v24, 16  ;;  %v634_v33 = vshll.u32 %v5072_v24, 16  ;;  %v640_v41 = vshll.u32 %v520_v25, 16  ;;  %v1722_v39 = vld [vmem:[#allocation2 + $0x38] sm:$0xf]  ;;  %4334 = vmatpush3.bf16.msra.mxu0 %v5018_v28 }
  0x4f   :  { %v1825_v10 = vsel %vm4864_vm8, %v1820_v23, %v1824_v59  ;;  %v5086_v43 = vld [vmem:[#allocation2 + $0x3c] sm:$0x1]  ;;  %v1827_v31 = vshrl.u32 %v1722_v39, 16  ;;  %v1830_v32 = vshll.u32 %v1722_v39, 16  ;;  %4335 = vmatprep.subr.bf16.mxu0 %v4625_v45  ;;  %v1724_v51 = vld [vmem:[#allocation2 + $0x40] sm:$0xf]  ;;  %v109_v14 = vmul.f32 %v4004_v37, %v4780_v13 }
  0x50   :  { %v3792_v57 = vcombine.low %v1811_v35, %v1825_v10  ;;  %v629_v48 = vsel %vm4864_vm8, %v624_v36, %v5036_v4  ;;  %v633_v49 = vrot.slane %v631_v1, 4  ;;  %v636_v50 = vrot.slane %v634_v33, 5  ;;  %4210 = vmatpush3.bf16.msra.mxu1 %v4626_v55  ;;  %v4629_v35 = vld [vmem:[%s5834_s3 + $0x178] sm:$0xff]  }
  0x51   :  { %v642_v28 = vrot.slane %v640_v41, 5  ;;  %v1829_v27 = vrot.slane %v1827_v31, 4  ;;  %v1832_v46 = vrot.slane %v1830_v32, 5  ;;  %v1836_v56 = vshll.u32 %v5086_v43, 16  ;;  %4211 = vmatprep.subr.bf16.mxu1 %v4628_v18  ;;  %v4020_v42 = vld [vmem:[%s5835_s0 + $0x38] sm:$0xff]  }
  0x52   :  { %4313 = vmatprep.mubr.bf16.mxu0 %v3792_v57  ;;  %v637_v59 = vor.u32 %v636_v50, %v633_v49  ;;  %v5098_v61 = vld [vmem:[#allocation2 + $0x44] sm:$0x1]  ;;  %v1841_v62 = vshrl.u32 %v1724_v51, 16  ;;  %v1844_v4 = vshll.u32 %v1724_v51, 16  ;;  %v147_v5 = vmax.f32 %v5070_v19, 0.0  ;;  %4336 = vmatpush3.bf16.msra.mxu0 %v4625_v45 }
  0x53   :  { %v1833_v55 = vor.u32 %v1832_v46, %v1829_v27  ;;  %v1838_v7 = vrot.slane %v1836_v56, 5  ;;  %v1850_v8 = vshll.u32 %v5098_v61, 16  ;;  %v5102_v11 = vld [vmem:[#allocation2 + $0x58] sm:$0xf]  ;;  %4337 = vmatprep.subr.bf16.mxu0 %v4627_v21  ;;  %v5124_v51 = vld [vmem:[%s5834_s3 + $0x180] sm:$0xff]   ;;  %vm1192_vm10 = vcmask 1046532  }
  0x54   :  { %v638_v38 = vrot.slane %v637_v59, 4  ;;  %v1843_v3 = vrot.slane %v1841_v62, 4  ;;  %v1846_v23 = vrot.slane %v1844_v4, 5  ;;  %v522_v25 = vld [vmem:[#allocation2 + $0x5c] sm:$0x1]  ;;  %v659_v19 = vshrl.u32 %v5102_v11, 16  ;;  %4212 = vmatpush3.bf16.msra.mxu1 %v4628_v18  ;;  %vm5261_vm11 = vmor %vm1191_vm9, %vm1192_vm10 }
  0x55   :  { %v1834_v45 = vrot.slane %v1833_v55, 4  ;;  %v1852_v36 = vrot.slane %v1850_v8, 5  ;;  %v662_v1 = vshll.u32 %v5102_v11, 16  ;;  %v668_v33 = vshll.u32 %v522_v25, 16  ;;  %v1726_v41 = vld [vmem:[#allocation2 + $0x58] sm:$0xf]  ;;  %4229 = vmatprep.subr.bf16.mxu1 %v5096_v58 }
  0x56   :  { %v643_v37 = vsel %vm4864_vm8, %v638_v38, %v642_v28  ;;  %v1847_v39 = vor.u32 %v1846_v23, %v1843_v3  ;;  %v661_v10 = vrot.slane %v659_v19, 4  ;;  %v3975_v31 = vpack.c.bf16 %v147_v5, %v147_v5  ;;  %4338 = vmatpush3.bf16.msra.mxu0 %v4627_v21  ;;  %v5119_v50 = vld [vmem:[#allocation2 + $0x5c] sm:$0x1]  ;;  %v439_v59 = vld [vmem:[#allocation2 + $0x60] sm:$0xf] }
  0x57   :  { %v3665_v32 = vcombine.low %v629_v48, %v643_v37  ;;  %v1839_v57 = vsel %vm4864_vm8, %v1834_v45, %v1838_v7  ;;  %v657_v18 = vsel %vm4864_vm8, %v5051_v12, %v5074_v0  ;;  %v664_v49 = vrot.slane %v662_v1, 5  ;;  %4339 = vmatprep.subr.bf16.mxu0 %v4629_v35  ;;  %v442_v62 = vld [vmem:[#allocation2 + $0x64] sm:$0x1] }
  0x58   :  { %v1848_v28 = vrot.slane %v1847_v39, 4  ;;  %v291_v21 = vshrl.u32 %v3975_v31, 16  ;;  %v294_v48 = vshll.u32 %v3975_v31, 16  ;;  %v1855_v27 = vshrl.u32 %v1726_v41, 16 }
  0x59   :  { %4186 = vmatmul.mubr.bf16.gmra.mrb[4].mxu1 %v3665_v32  ;;  %v665_v46 = vor.u32 %v664_v49, %v661_v10  ;;  %v670_v56 = vrot.slane %v668_v33, 5  ;;  %v1858_v4 = vshll.u32 %v1726_v41, 16  ;;  %v132_v12 = vadd.f32 %v4788_v17, %v109_v14  ;;  %v4694_v14 = vld [vmem:[%s5837_s2] ss:$0 sm:$0xff] }
  0x5a   :  { %v1853_v0 = vsel %vm4864_vm8, %v1848_v28, %v1852_v36  ;;  %v293_v5 = vrot.slane %v291_v21, 7  ;;  %v1864_v55 = vshll.u32 %v5119_v50, 16  ;;  %v110_v7 = vmul.f32 %v4005_v9, %v4780_v13  ;;  %4340 = vmatpush3.bf16.msra.mxu0 %v4629_v35  ;;  %v4695_v9 = vld [vmem:[%s5836_s1] ss:$0 sm:$0xff]  ;;  %v448_v21 = vld [vmem:[#allocation2 + $0x6c] sm:$0x1] }
  0x5b   :  { %v3793_v8 = vcombine.low %v1839_v57, %v1853_v0  ;;  %v666_v38 = vrot.slane %v665_v46, 4  ;;  %v1857_v3 = vrot.slane %v1855_v27, 4  ;;  %v1860_v23 = vrot.slane %v1858_v4, 5  ;;  %4357 = vmatprep.subr.bf16.mxu0 %v5124_v51 }
  0x5c   :  { %v296_v25 = vor.u32 %v294_v48, %v293_v5  ;;  %v297_v19 = vrot.slane %v293_v5, 4  ;;  %v148_v17 = vmax.f32 %v132_v12, 0.0  ;;  %v133_v45 = vadd.f32 %v4694_v14, %v110_v7 }
  0x5d   :  { %4314 = vmatmul.mubr.bf16.gmra.mrb[4].mxu0 %v3793_v8  ;;  %v671_v13 = vsel %vm4864_vm8, %v666_v38, %v670_v56  ;;  %v111_v35 = vmul.f32 %v4695_v9, %v4008_v47  ;;  %v4009_v36 = vunpack.c.h.bf16 %v5057_v15  ;;  %v1861_v39 = vor.u32 %v1860_v23, %v1857_v3  ;;  %v469_v15 = vld [vmem:[#allocation2 + $0x88] sm:$0xf] }
  0x5e   :  { %v3666_v1 = vcombine.low %v657_v18, %v671_v13  ;;  %v440_v33 = vsel %vm4825_vm6, %v296_v25, %v439_v59  ;;  %v443_v41 = vsel %vm4839_vm7, %v297_v19, %v442_v62  ;;  %v3976_v37 = vpack.c.bf16 %v148_v17, %v148_v17  ;;  %v445_v18 = vld [vmem:[#allocation2 + $0x68] sm:$0xf]  ;;  %v451_v19 = vld [vmem:[#allocation2 + $0x70] sm:$0xf]  ;;  %v454_v17 = vld [vmem:[#allocation2 + $0x74] sm:$0x1] }
  0x5f   :  { %441 = vst [vmem:[#allocation2 + $0x60] sm:$0xf] %v440_v33  ;;  %444 = vst [vmem:[#allocation2 + $0x64] sm:$0x1] %v443_v41  ;;  %v149_v10 = vmax.f32 %v133_v45, 0.0  ;;  %v134_v31 = vadd.f32 %v4694_v14, %v111_v35  ;;  %v112_v32 = vmul.f32 %v4695_v9, %v4009_v36  ;;  %v4012_v47 = vunpack.c.l.bf16 %v4020_v42 }
  0x60   :  { %4189 = vmatprep.mubr.bf16.mxu1 %v3666_v1  ;;  %v299_v57 = vshrl.u32 %v3976_v37, 16  ;;  %v302_v49 = vshll.u32 %v3976_v37, 16  ;;  %v4013_v28 = vunpack.c.h.bf16 %v4020_v42  ;;  %v5153_v56 = vrot.slane %v1864_v55, 5 }
  0x61   :  { %v3977_v48 = vpack.c.bf16 %v149_v10, %v149_v10  ;;  %v150_v27 = vmax.f32 %v134_v31, 0.0  ;;  %v135_v46 = vadd.f32 %v4694_v14, %v112_v32  ;;  %v113_v62 = vmul.f32 %v4695_v9, %v4012_v47 }
  0x62   :  { %v301_v59 = vrot.slane %v299_v57, 7  ;;  %v114_v4 = vmul.f32 %v4695_v9, %v4013_v28  ;;  %v5155_v12 = vrot.slane %v1861_v39, 4  ;;  %v5848_v63 = vrot.slane %v4895_v2, 5 }
  0x63   :  { %v307_v0 = vshrl.u32 %v3977_v48, 16  ;;  %v3978_v5 = vpack.c.bf16 %v150_v27, %v150_v27  ;;  %v151_v7 = vmax.f32 %v135_v46, 0.0  ;;  %v310_v3 = vshll.u32 %v3977_v48, 16 }
  0x64   :  { %v304_v8 = vor.u32 %v302_v49, %v301_v59  ;;  %v305_v38 = vrot.slane %v301_v59, 4  ;;  %v136_v23 = vadd.f32 %v4694_v14, %v113_v62  ;;  %v137_v55 = vadd.f32 %v4694_v14, %v114_v4 }
  0x65   :  { %v309_v25 = vrot.slane %v307_v0, 7  ;;  %v315_v45 = vshrl.u32 %v3978_v5, 16  ;;  %v5157_v42 = vpack.c.bf16 %v151_v7, %v151_v7  ;;  %v318_v48 = vshll.u32 %v3978_v5, 16 }
  0x66   :  { %v1728_v13 = vld [vmem:[#allocation2 + $0x60] sm:$0xf]  ;;  %v5159_v35 = vld [vmem:[#allocation2 + $0x64] sm:$0x1]  ;;  %v446_v9 = vsel %vm4825_vm6, %v304_v8, %v445_v18  ;;  %v449_v36 = vsel %vm4839_vm7, %v305_v38, %v448_v21  ;;  %v1867_v27 = vsel %vm4864_vm8, %v5155_v12, %v5153_v56 }
  0x67   :  { %v5165_v1 = vld [vmem:[#allocation2 + $0x60] sm:$0xf]  ;;  %v1869_v37 = vshrl.u32 %v1728_v13, 16  ;;  %v1872_v39 = vshll.u32 %v1728_v13, 16  ;;  %v1878_v14 = vshll.u32 %v5159_v35, 16  ;;  %v312_v49 = vor.u32 %v310_v3, %v309_v25 }
  0x68   :  { %447 = vst [vmem:[#allocation2 + $0x68] sm:$0xf] %v446_v9  ;;  %450 = vst [vmem:[#allocation2 + $0x6c] sm:$0x1] %v449_v36  ;;  %v5172_v10 = vld [vmem:[#allocation2 + $0x64] sm:$0x1] }
  0x69   :  { %v673_v31 = vshrl.u32 %v5165_v1, 16  ;;  %v676_v32 = vshll.u32 %v5165_v1, 16  ;;  %v682_v57 = vshll.u32 %v5172_v10, 16  ;;  %v313_v47 = vrot.slane %v309_v25, 4  ;;  %v457_v9 = vld [vmem:[#allocation2 + $0x78] sm:$0xf] }
  0x6a   :  { %v1871_v28 = vrot.slane %v1869_v37, 4  ;;  %v1874_v18 = vrot.slane %v1872_v39, 5  ;;  %v452_v59 = vsel %vm4825_vm6, %v312_v49, %v451_v19  ;;  %v1880_v0 = vrot.slane %v1878_v14, 5  ;;  %v460_v19 = vld [vmem:[#allocation2 + $0x7c] sm:$0x1] }
  0x6b   :  { %v675_v21 = vrot.slane %v673_v31, 4  ;;  %v678_v46 = vrot.slane %v676_v32, 5  ;;  %v455_v62 = vsel %vm4839_vm7, %v313_v47, %v454_v17  ;;  %453 = vst [vmem:[#allocation2 + $0x70] sm:$0xf] %v452_v59  ;;  %v317_v7 = vrot.slane %v315_v45, 7 }
  0x6c   :  { %v1875_v4 = vor.u32 %v1874_v18, %v1871_v28  ;;  %456 = vst [vmem:[#allocation2 + $0x74] sm:$0x1] %v455_v62  ;;  %v323_v8 = vshrl.u32 %v5157_v42, 16  ;;  %v5186_v38 = vrot.slane %v682_v57, 5  ;;  %v152_v3 = vmax.f32 %v136_v23, 0.0 }
  0x6d   :  { %v679_v5 = vor.u32 %v678_v46, %v675_v21  ;;  %v153_v25 = vmax.f32 %v137_v55, 0.0  ;;  %v320_v12 = vor.u32 %v318_v48, %v317_v7  ;;  %v321_v13 = vrot.slane %v317_v7, 4 }
  0x6e   :  { %v1876_v56 = vrot.slane %v1875_v4, 4  ;;  %v326_v36 = vshll.u32 %v5157_v42, 16  ;;  %v5193_v45 = vrot.slane %v323_v8, 7  ;;  %v5195_v14 = vpack.c.bf16 %v152_v3, %v152_v3 }
  0x6f   :  { %v5189_v17 = vld [vmem:[#allocation2 + $0x68] sm:$0xf]  ;;  %v5191_v37 = vld [vmem:[#allocation2 + $0x6c] sm:$0x1]  ;;  %v680_v39 = vrot.slane %v679_v5, 4  ;;  %v5197_v31 = vpack.c.bf16 %v153_v25, %v153_v25  ;;  %v461_v5 = vsel %vm4839_vm7, %v321_v13, %v460_v19 }
  0x70   :  { %v1881_v23 = vsel %vm4864_vm8, %v1876_v56, %v1880_v0  ;;  %v687_v55 = vshrl.u32 %v5189_v17, 16  ;;  %v690_v32 = vshll.u32 %v5189_v17, 16  ;;  %v696_v42 = vshll.u32 %v5191_v37, 16  ;;  %v1730_v57 = vld [vmem:[#allocation2 + $0x68] sm:$0xf] }
  0x71   :  { %v3794_v49 = vcombine.low %v1867_v27, %v1881_v23  ;;  %v685_v47 = vsel %vm4864_vm8, %v680_v39, %v5186_v38  ;;  %v5207_v28 = vld [vmem:[#allocation2 + $0x6c] sm:$0x1]  ;;  %v1883_v18 = vshrl.u32 %v1730_v57, 16  ;;  %v1886_v21 = vshll.u32 %v1730_v57, 16  ;;  %462 = vst [vmem:[#allocation2 + $0x7c] sm:$0x1] %v461_v5 }
  0x72   :  { %v689_v48 = vrot.slane %v687_v55, 4  ;;  %v692_v46 = vrot.slane %v690_v32, 5  ;;  %v698_v59 = vrot.slane %v696_v42, 5  ;;  %v1892_v62 = vshll.u32 %v5207_v28, 16  ;;  %v1732_v4 = vld [vmem:[#allocation2 + $0x70] sm:$0xf] }
  0x73   :  { %4317 = vmatprep.mubr.bf16.mxu0 %v3794_v49  ;;  %v5210_v0 = vld [vmem:[#allocation2 + $0x74] sm:$0x1]  ;;  %v1885_v7 = vrot.slane %v1883_v18, 4  ;;  %v1888_v8 = vrot.slane %v1886_v21, 5  ;;  %v458_v27 = vsel %vm4825_vm6, %v320_v12, %v457_v9  ;;  %v1897_v25 = vshrl.u32 %v1732_v4, 16 }
  0x74   :  { %v693_v38 = vor.u32 %v692_v46, %v689_v48  ;;  %v1894_v3 = vrot.slane %v1892_v62, 5  ;;  %v1900_v56 = vshll.u32 %v1732_v4, 16  ;;  %459 = vst [vmem:[#allocation2 + $0x78] sm:$0xf] %v458_v27  ;;  %v5216_v39 = vld [vmem:[#allocation2 + $0x70] sm:$0xf] }
  0x75   :  { %v1889_v23 = vor.u32 %v1888_v8, %v1885_v7  ;;  %v1906_v55 = vshll.u32 %v5210_v0, 16  ;;  %v5219_v32 = vld [vmem:[#allocation2 + $0x74] sm:$0x1]  ;;  %v701_v42 = vshrl.u32 %v5216_v39, 16  ;;  %v704_v12 = vshll.u32 %v5216_v39, 16 }
  0x76   :  { %v694_v9 = vrot.slane %v693_v38, 4  ;;  %v1899_v57 = vrot.slane %v1897_v25, 4  ;;  %v1902_v13 = vrot.slane %v1900_v56, 5  ;;  %v710_v19 = vshll.u32 %v5219_v32, 16  ;;  %v463_v49 = vld [vmem:[#allocation2 + $0x80] sm:$0xf] }
  0x77   :  { %v1890_v18 = vrot.slane %v1889_v23, 4  ;;  %v703_v21 = vrot.slane %v701_v42, 4  ;;  %v706_v48 = vrot.slane %v704_v12, 5  ;;  %v466_v46 = vld [vmem:[#allocation2 + $0x84] sm:$0x1]  ;;  %v1908_v7 = vrot.slane %v1906_v55, 5 }
  0x78   :  { %v699_v62 = vsel %vm4864_vm8, %v694_v9, %v698_v59  ;;  %v1903_v4 = vor.u32 %v1902_v13, %v1899_v57  ;;  %v328_v8 = vor.u32 %v326_v36, %v5193_v45  ;;  %v5227_v38 = vrot.slane %v710_v19, 5  ;;  %v5237_v55 = vld [vmem:[#allocation2 + $0x7c] sm:$0x1] }
  0x79   :  { %v3667_v27 = vcombine.low %v685_v47, %v699_v62  ;;  %v707_v5 = vor.u32 %v706_v48, %v703_v21  ;;  %v329_v25 = vrot.slane %v5193_v45, 4  ;;  %v1895_v56 = vsel %vm4864_vm8, %v1890_v18, %v1894_v3  ;;  %v2176_v3 = vld [vmem:[#allocation2 + $0x8] sm:$0xe] }
  0x7a   :  { %v1904_v23 = vrot.slane %v1903_v4, 4  ;;  %v464_v42 = vsel %vm4825_vm6, %v328_v8, %v463_v49  ;;  %v331_v12 = vshrl.u32 %v5195_v14, 16  ;;  %v334_v45 = vshll.u32 %v5195_v14, 16  ;;  %v5250_v14 = vld [vmem:[#allocation2 + $0x7c] sm:$0x1] }
  0x7b   :  { %4190 = vmatmul.mubr.bf16.gmra.mrb[8].mxu1 %v3667_v27  ;;  %v5235_v59 = vld [vmem:[#allocation2 + $0x78] sm:$0xf]  ;;  %465 = vst [vmem:[#allocation2 + $0x80] sm:$0xf] %v464_v42  ;;  %v467_v36 = vsel %vm4839_vm7, %v329_v25, %v466_v46  ;;  %v339_v47 = vshrl.u32 %v5197_v31, 16  ;;  %v724_v49 = vshll.u32 %v5237_v55, 16 }
  0x7c   :  { %v1909_v57 = vsel %vm4864_vm8, %v1904_v23, %v1908_v7  ;;  %v715_v13 = vshrl.u32 %v5235_v59, 16  ;;  %v718_v19 = vshll.u32 %v5235_v59, 16  ;;  %468 = vst [vmem:[#allocation2 + $0x84] sm:$0x1] %v467_v36  ;;  %v1734_v18 = vld [vmem:[#allocation2 + $0x78] sm:$0xf] }
  0x7d   :  { %v3795_v21 = vcombine.low %v1895_v56, %v1909_v57  ;;  %v708_v48 = vrot.slane %v707_v5, 4  ;;  %v1911_v46 = vshrl.u32 %v1734_v18, 16  ;;  %v1914_v62 = vshll.u32 %v1734_v18, 16  ;;  %v2177_v4 = vld [vmem:[#allocation2 + $0x10] sm:$0xe] }
  0x7e   :  { %v717_v8 = vrot.slane %v715_v13, 4  ;;  %v720_v27 = vrot.slane %v718_v19, 5  ;;  %v726_v25 = vrot.slane %v724_v49, 5  ;;  %v1920_v7 = vshll.u32 %v5250_v14, 16 }
  0x7f   :  { %4318 = vmatmul.mubr.bf16.gmra.mrb[8].mxu0 %v3795_v21  ;;  %v1913_v23 = vrot.slane %v1911_v46, 4  ;;  %v1916_v42 = vrot.slane %v1914_v62, 5  ;;  %v333_v9 = vrot.slane %v331_v12, 7  ;;  %v341_v41 = vrot.slane %v339_v47, 7  ;;  %v475_v47 = vld [vmem:[#allocation2 + $0x90] sm:$0xf] }
  0x80   :  { %v721_v33 = vor.u32 %v720_v27, %v717_v8  ;;  %v1922_v36 = vrot.slane %v1920_v7, 5  ;;  %v342_v5 = vshll.u32 %v5197_v31, 16  ;;  %v3806_v56 = vrot.slane %v2176_v3, 9  ;;  %v478_v62 = vld [vmem:[#allocation2 + $0x94] sm:$0x1] }
  0x81   :  { %v1917_v57 = vor.u32 %v1916_v42, %v1913_v23  ;;  %v336_v34 = vor.u32 %v334_v45, %v333_v9  ;;  %v337_v18 = vrot.slane %v333_v9, 4  ;;  %v345_v13 = vrot.slane %v341_v41, 4  ;;  %v2179_v42 = vld [vmem:[#allocation2 + $0x20] sm:$0xe] }
  0x82   :  { %v713_v19 = vsel %vm4864_vm8, %v708_v48, %v5227_v38  ;;  %v722_v49 = vrot.slane %v721_v33, 4  ;;  %v1736_v21 = vld [vmem:[#allocation2 + $0x80] sm:$0xf]  ;;  %v344_v12 = vor.u32 %v342_v5, %v341_v41  ;;  %v3807_v45 = vrot.slane %v2177_v4, 9  ;;  %v2178_v38 = vld [vmem:[#allocation2 + $0x18] sm:$0xe] }
  0x83   :  { %v5257_v46 = vld [vmem:[#allocation2 + $0x80] sm:$0xf]  ;;  %v5265_v3 = vld [vmem:[#allocation2 + $0x84] sm:$0x1]  ;;  %v1918_v9 = vrot.slane %v1917_v57, 4  ;;  %v1925_v8 = vshrl.u32 %v1736_v21, 16  ;;  %v470_v33 = vsel %vm4825_vm6, %v336_v34, %v469_v15  ;;  %v473_v7 = vsel %vm4839_vm7, %v337_v18, %v472_v44 }
  0x84   :  { %v1928_v27 = vshll.u32 %v1736_v21, 16  ;;  %v727_v41 = vsel %vm4864_vm8, %v722_v49, %v726_v25  ;;  %v1934_v48 = vshll.u32 %v5265_v3, 16  ;;  %471 = vst [vmem:[#allocation2 + $0x88] sm:$0xf] %v470_v33  ;;  %v5274_v23 = vld [vmem:[#allocation2 + $0x84] sm:$0x1]  ;;  %v5281_v34 = vsel %vm5261_vm11, %v3806_v56, %v2226_v53 }
  0x85   :  { %v729_v4 = vshrl.u32 %v5257_v46, 16  ;;  %v3668_v5 = vcombine.low %v713_v19, %v727_v41  ;;  %v1927_v57 = vrot.slane %v1925_v8, 4  ;;  %474 = vst [vmem:[#allocation2 + $0x8c] sm:$0x1] %v473_v7  ;;  %v732_v49 = vshll.u32 %v5257_v46, 16 }
  0x86   :  { %v1930_v21 = vrot.slane %v1928_v27, 5  ;;  %v1936_v15 = vrot.slane %v1934_v48, 5  ;;  %v738_v44 = vshll.u32 %v5274_v23, 16  ;;  %v476_v19 = vsel %vm4825_vm6, %v344_v12, %v475_v47 }
  0x87   :  { %v731_v25 = vrot.slane %v729_v4, 4  ;;  %4193 = vmatprep.mubr.bf16.mxu1 %v3668_v5  ;;  %v479_v8 = vsel %vm4839_vm7, %v345_v13, %v478_v62  ;;  %v5293_v53 = vsel %vm5261_vm11, %v3807_v45, %v5848_v63  ;;  %v734_v56 = vrot.slane %v732_v49, 5  ;;  %477 = vst [vmem:[#allocation2 + $0x90] sm:$0xf] %v476_v19  ;;  %v2182_v62 = vld [vmem:[#allocation2 + $0x38] sm:$0xe] }
  0x88   :  { %v1931_v18 = vor.u32 %v1930_v21, %v1927_v57  ;;  %480 = vst [vmem:[#allocation2 + $0x94] sm:$0x1] %v479_v8  ;;  %v3838_v27 = vcombine.low %v5281_v34, %v5293_v53  ;;  %v3808_v33 = vrot.slane %v2178_v38, 9  ;;  %v1923_v54 = vsel %vm4864_vm8, %v1918_v9, %v1922_v36  ;;  %v5364_v53 = vld [vmem:[#allocation2 + $0x70] sm:$0xe] }
  0x89   :  { %v3809_v47 = vrot.slane %v2179_v42, 9  ;;  %v735_v60 = vor.u32 %v734_v56, %v731_v25  ;;  %v5849_v13 = vrot.slane %v4922_v52, 5  ;;  %v740_v48 = vrot.slane %v738_v44, 5 }
  0x8a   :  { %v1932_v12 = vrot.slane %v1931_v18, 4  ;;  %v5850_v7 = vrot.slane %v4928_v6, 5  ;;  %v2183_v18 = vld [vmem:[#allocation2 + $0x40] sm:$0xe]  ;;  %v3812_v19 = vrot.slane %v2182_v62, 9 }
  0x8b   :  { %v5303_v2 = vsel %vm5261_vm11, %v3808_v33, %v5849_v13  ;;  %v5307_v41 = vld [vmem:[#allocation2 + $0x88] sm:$0xf]  ;;  %v736_v4 = vrot.slane %v735_v60, 4 }
  0x8c   :  { %v1937_v45 = vsel %vm4864_vm8, %v1932_v12, %v1936_v15  ;;  %v1738_v38 = vld [vmem:[#allocation2 + $0x88] sm:$0xf]  ;;  %v5313_v36 = vsel %vm5261_vm11, %v3809_v47, %v5850_v7  ;;  %v5315_v52 = vld [vmem:[#allocation2 + $0x8c] sm:$0x1]  ;;  %v743_v42 = vshrl.u32 %v5307_v41, 16  ;;  %v746_v5 = vshll.u32 %v5307_v41, 16 }
  0x8d   :  { %v3796_v9 = vcombine.low %v1923_v54, %v1937_v45  ;;  %v752_v57 = vshll.u32 %v5315_v52, 16  ;;  %v5320_v21 = vld [vmem:[#allocation2 + $0x8c] sm:$0x1]  ;;  %v1939_v15 = vshrl.u32 %v1738_v38, 16  ;;  %v1942_v25 = vshll.u32 %v1738_v38, 16 }
  0x8e   :  { %v745_v49 = vrot.slane %v743_v42, 4  ;;  %v748_v44 = vrot.slane %v746_v5, 5  ;;  %v1740_v8 = vld [vmem:[#allocation2 + $0x90] sm:$0xf]  ;;  %v1948_v33 = vshll.u32 %v5320_v21, 16  ;;  %v741_v13 = vsel %vm4864_vm8, %v736_v4, %v740_v48 }
  0x8f   :  { %4321 = vmatprep.mubr.bf16.mxu0 %v3796_v9  ;;  %v5324_v63 = vld [vmem:[#allocation2 + $0x94] sm:$0x1]  ;;  %v1941_v56 = vrot.slane %v1939_v15, 4  ;;  %v754_v12 = vrot.slane %v752_v57, 5  ;;  %v1944_v47 = vrot.slane %v1942_v25, 5  ;;  %v1953_v60 = vshrl.u32 %v1740_v8, 16 }
  0x90   :  { %v749_v54 = vor.u32 %v748_v44, %v745_v49  ;;  %v1956_v45 = vshll.u32 %v1740_v8, 16  ;;  %v1962_v38 = vshll.u32 %v5324_v63, 16  ;;  %v2250_v7 = vrot.slane %v5086_v43, 5  ;;  %v4696_v25 = vld [vmem:[#allocation2] sm:$0xf] }
  0x91   :  { %v1945_v62 = vor.u32 %v1944_v47, %v1941_v56  ;;  %v1955_v42 = vrot.slane %v1953_v60, 4  ;;  %v3813_v5 = vrot.slane %v2183_v18, 9  ;;  %v1950_v6 = vrot.slane %v1948_v33, 5  ;;  %v4697_v44 = vld [vmem:[#allocation2 + $0x8] sm:$0xf] }
  0x92   :  { %v750_v9 = vrot.slane %v749_v54, 4  ;;  %v1958_v15 = vrot.slane %v1956_v45, 5  ;;  %v5333_v49 = vsel %vm5261_vm11, %v3812_v19, %v2250_v7  ;;  %v2254_v57 = vrot.slane %v5098_v61, 5  ;;  %v4698_v33 = vld [vmem:[#allocation2 + $0x4] sm:$0x1] }
  0x93   :  { %v1946_v4 = vrot.slane %v1945_v62, 4  ;;  %v3678_v8 = vcombine.low %v4696_v25, %v4697_v44  ;;  %v1964_v56 = vrot.slane %v1962_v38, 5  ;;  %v1196_v47 = vrot.slane %v4698_v33, 5  ;;  %v4699_v19 = vld [vmem:[#allocation2 + $0xc] sm:$0x1] }
  0x94   :  { %v755_v48 = vsel %vm4864_vm8, %v750_v9, %v754_v12  ;;  %v1959_v54 = vor.u32 %v1958_v15, %v1955_v42  ;;  %v5340_v18 = vsel %vm5261_vm11, %v3813_v5, %v2254_v57  ;;  %v1200_v60 = vrot.slane %v4699_v19, 5  ;;  %v4700_v45 = vld [vmem:[#allocation2 + $0x14] sm:$0x1]  ;;  %v4701_v7 = vld [vmem:[#allocation2 + $0x1c] sm:$0x1] }
  0x95   :  { %v3669_v43 = vcombine.low %v741_v13, %v755_v48  ;;  %v1204_v61 = vrot.slane %v4700_v45, 5  ;;  %v3841_v12 = vcombine.low %v5333_v49, %v5340_v18  ;;  %v1208_v9 = vrot.slane %v4701_v7, 5  ;;  %v2180_v62 = vld [vmem:[#allocation2 + $0x28] sm:$0xe]  ;;  %v2181_v42 = vld [vmem:[#allocation2 + $0x30] sm:$0xe] }
  0x96   :  { %v1951_v13 = vsel %vm4864_vm8, %v1946_v4, %v1950_v6  ;;  %v1960_v38 = vrot.slane %v1959_v54, 4  ;;  %v1143_v15 = vld [vmem:[#allocation2] sm:$0xe]  ;;  %v1144_v57 = vld [vmem:[#allocation2 + $0x8] sm:$0xe]  ;;  %v3810_v25 = vrot.slane %v2180_v62, 9 }
  0x97   :  { %4194 = vmatmul.mubr.bf16.gmra.mrb[12].mxu1 %v3669_v43  ;;  %v4702_v44 = vld [vmem:[#allocation2 + $0x2c] sm:$0x1]  ;;  %v1145_v19 = vld [vmem:[#allocation2 + $0x10] sm:$0xe]  ;;  %v3811_v45 = vrot.slane %v2181_v42, 9  ;;  %v2246_v43 = vrot.slane %v5023_v40, 5  ;;  %v5851_v42 = vcombine.low %v4902_v16, %v4908_v30  ;;  %v5852_v30 = vcombine.low %v4931_v20, %v4934_v26 }
  0x98   :  { %4213 = vmatprep.mubr.bf16.mxu1 %v3678_v8  ;;  %v1965_v5 = vsel %vm4864_vm8, %v1960_v38, %v1964_v56  ;;  %v2242_v33 = vrot.slane %v4702_v44, 5  ;;  %v1146_v7 = vld [vmem:[#allocation2 + $0x18] sm:$0xe]  ;;  %v2185_v4 = vld [vmem:[#allocation2 + $0x60] sm:$0xe]  ;;  %v4634_v8 = vld [vmem:[%s5834_s3 + $0x88] sm:$0xff]  }
  0x99   :  { %v3797_v48 = vcombine.low %v1951_v13, %v1965_v5  ;;  %v2184_v6 = vld [vmem:[#allocation2 + $0x58] sm:$0xe]  ;;  %v5355_v54 = vld [vmem:[#allocation2 + $0x68] sm:$0xe]  ;;  %v3694_v56 = vrot.slane %v1143_v15, 9  ;;  %v3695_v13 = vrot.slane %v1144_v57, 9  ;;  %v2247_v34 = vsel %vm5261_vm11, %v3811_v45, %v2246_v43 }
  0x9a   :  { %v3696_v38 = vrot.slane %v1145_v19, 9  ;;  %v2243_v40 = vsel %vm5261_vm11, %v3810_v25, %v2242_v33  ;;  %v3697_v62 = vrot.slane %v1146_v7, 9  ;;  %v4635_v16 = vld [vmem:[%s5834_s3 + $0x188] sm:$0xff]   ;;  %v2258_v57 = vrot.slane %v5119_v50, 5  ;;  %v4640_v45 = vld [vmem:[%s5834_s3 + $0x98] sm:$0xff]  }
  0x9b   :  { %4322 = vmatmul.mubr.bf16.gmra.mrb[12].mxu0 %v3797_v48  ;;  %v5372_v5 = vsel %vm5261_vm11, %v3695_v13, %v1200_v60  ;;  %v5386_v48 = vld [vmem:[#allocation2 + $0x78] sm:$0xe]  ;;  %v3815_v25 = vrot.slane %v2185_v4, 9  ;;  %v2262_v20 = vrot.slane %v5159_v35, 5  ;;  %v3816_v26 = vrot.slane %v5355_v54, 9 }
  0x9c   :  { %4341 = vmatprep.mubr.bf16.mxu0 %v3838_v27  ;;  %v5368_v27 = vsel %vm5261_vm11, %v3694_v56, %v1196_v47  ;;  %v5376_v15 = vsel %vm5261_vm11, %v3696_v38, %v1204_v61  ;;  %v3814_v47 = vrot.slane %v2184_v6, 9  ;;  %v5392_v61 = vsel %vm5261_vm11, %v3697_v62, %v1208_v9  ;;  %v1153_v9 = vld [vmem:[#allocation2 + $0x60] sm:$0xe]  ;;  %v1154_v43 = vld [vmem:[#allocation2 + $0x68] sm:$0xe]  ;;  %v4638_v6 = vld [vmem:[%s5834_s3 + $0x190] sm:$0xff]  }
  0x9d   :  { %v3726_v60 = vcombine.low %v5368_v27, %v5372_v5  ;;  %v3727_v50 = vcombine.low %v5376_v15, %v5392_v61  ;;  %v3840_v44 = vcombine.low %v2243_v40, %v2247_v34  ;;  %v2266_v33 = vrot.slane %v5207_v28, 5  ;;  %v1155_v7 = vld [vmem:[#allocation2 + $0x70] sm:$0xe]  ;;  %v1156_v38 = vld [vmem:[#allocation2 + $0x78] sm:$0xe]  ;;  %v4658_v5 = vld [vmem:[%s5834_s3 + $0xc8] sm:$0xff]  }
  0x9e   :  { %v3817_v19 = vrot.slane %v5364_v53, 9  ;;  %v5853_v35 = vcombine.low %v5303_v2, %v5313_v36  ;;  %v4703_v4 = vld [vmem:[#allocation2 + $0x50] sm:$0xf]  ;;  %v2270_v56 = vrot.slane %v5210_v0, 5  ;;  %v3818_v13 = vrot.slane %v5386_v48, 9 }
  0x9f   :  { %4214 = vmatmul.mubr.bf16.vlgmr.msra.gmra.mrb[0].mxu1 %v5851_v42  ;;  %v3682_v28 = vcombine.low %v4703_v4, %v5102_v11  ;;  %v2259_v2 = vsel %vm5261_vm11, %v3814_v47, %v2258_v57  ;;  %v3683_v36 = vcombine.low %v5165_v1, %v5189_v17  ;;  %v1236_v40 = vrot.slane %v5172_v10, 5  ;;  %v1157_v62 = vld [vmem:[#allocation2 + $0x80] sm:$0xe]  ;;  %v2190_v49 = vld [vmem:[#allocation2 + $0x88] sm:$0xe] }
  0xa0   :  { %4230 = vmatpush3.bf16.msra.mxu1 %v5096_v58  ;;  %4217 = vmatprep.mubr.bf16.mxu1 %v5852_v30  ;;  %v4637_v58 = vld [vmem:[%s5834_s3 + $0x90] sm:$0xff]   ;;  %v2274_v11 = vrot.slane %v5250_v14, 5  ;;  %v3705_v0 = vrot.slane %v1154_v43, 9  ;;  %v1240_v42 = vrot.slane %v5191_v37, 5  ;;  %v3706_v34 = vrot.slane %v1155_v7, 9  ;;  %v4641_v37 = vld [vmem:[%s5834_s3 + $0x198] sm:$0xff]  }
  0xa1   :  { %4231 = vmatprep.subr.bf16.mxu1 %v4634_v8  ;;  %v5854_v53 = vcombine.low %v5025_v22, %v5072_v24  ;;  %v2263_v1 = vsel %vm5261_vm11, %v3815_v25, %v2262_v20  ;;  %v1244_v17 = vrot.slane %v5219_v32, 5  ;;  %v3707_v30 = vrot.slane %v1156_v38, 9  ;;  %v4643_v22 = vld [vmem:[%s5834_s3 + $0xa0] sm:$0xff]   ;;  %v2191_v18 = vld [vmem:[#allocation2 + $0x90] sm:$0xe] }
  0xa2   :  { %v2189_v24 = vld [vmem:[#allocation2 + $0x80] sm:$0xe]  ;;  %v5441_v14 = vsel %vm5261_vm11, %v3705_v0, %v1240_v42  ;;  %v1248_v47 = vrot.slane %v5237_v55, 5  ;;  %v3708_v57 = vrot.slane %v1157_v62, 9  ;;  %v1252_v32 = vrot.slane %v5274_v23, 5 }
  0xa3   :  { %4342 = vmatmul.mubr.bf16.vlgmr.msra.gmra.mrb[0].mxu0 %v5853_v35  ;;  %v1256_v20 = vrot.slane %v5315_v52, 5  ;;  %v3684_v55 = vcombine.low %v5216_v39, %v5235_v59  ;;  %v2278_v43 = vrot.slane %v5265_v3, 5  ;;  %v2267_v39 = vsel %vm5261_vm11, %v3816_v26, %v2266_v33  ;;  %v4646_v3 = vld [vmem:[%s5834_s3 + $0xa8] sm:$0xff]   ;;  %v1147_v38 = vld [vmem:[#allocation2 + $0x20] sm:$0xe] }
  0xa4   :  { %4232 = vmatpush3.bf16.msra.mxu1 %v4634_v8  ;;  %4358 = vmatpush3.bf16.msra.mxu0 %v5124_v51  ;;  %v3704_v8 = vrot.slane %v1153_v9, 9  ;;  %v1158_v51 = vld [vmem:[#allocation2 + $0x88] sm:$0xe]  ;;  %v5456_v23 = vsel %vm5261_vm11, %v3707_v30, %v1248_v47  ;;  %v3819_v9 = vrot.slane %v2189_v24, 9  ;;  %v2271_v59 = vsel %vm5261_vm11, %v3817_v19, %v2270_v56  ;;  %v4649_v56 = vld [vmem:[%s5834_s3 + $0xb0] sm:$0xff]  }
  0xa5   :  { %4233 = vmatprep.subr.bf16.mxu1 %v4637_v58  ;;  %4359 = vmatprep.subr.bf16.mxu0 %v4635_v16  ;;  %v3709_v25 = vrot.slane %v1158_v51, 9  ;;  %v3843_v54 = vcombine.low %v2267_v39, %v2271_v59  ;;  %v2275_v26 = vsel %vm5261_vm11, %v3818_v13, %v2274_v11  ;;  %v3820_v19 = vrot.slane %v2190_v49, 9  ;;  %v4704_v62 = vld [vmem:[#allocation2 + $0x24] sm:$0x1]  ;;  %v4705_v42 = vld [vmem:[#allocation2 + $0x2c] sm:$0x1] }
  0xa6   :  { %4345 = vmatprep.mubr.bf16.mxu0 %v3840_v44  ;;  %v5430_v10 = vsel %vm5261_vm11, %v3704_v8, %v1236_v40  ;;  %v3842_v44 = vcombine.low %v2259_v2, %v2263_v1  ;;  %v2279_v33 = vsel %vm5261_vm11, %v3819_v9, %v2278_v43  ;;  %v2286_v4 = vrot.slane %v5324_v63, 5  ;;  %v1148_v2 = vld [vmem:[#allocation2 + $0x28] sm:$0xe]  ;;  %v4652_v8 = vld [vmem:[%s5834_s3 + $0xb8] sm:$0xff]   ;;  %v1149_v1 = vld [vmem:[#allocation2 + $0x30] sm:$0xe] }
  0xa7   :  { %4218 = vmatmul.mubr.bf16.gmra.mrb[4].mxu1 %v5854_v53  ;;  %v3731_v48 = vcombine.low %v5430_v10, %v5441_v14  ;;  %v5467_v52 = vsel %vm5261_vm11, %v3709_v25, %v1256_v20  ;;  %v3844_v13 = vcombine.low %v2275_v26, %v2279_v33  ;;  %v3698_v40 = vrot.slane %v1147_v38, 9  ;;  %v4653_v51 = vld [vmem:[%s5834_s3 + $0x1b8] sm:$0xff]   ;;  %v4654_v53 = vld [vmem:[%s5834_s3 + $0xc0] sm:$0xff]   ;;  %v1151_v24 = vld [vmem:[#allocation2 + $0x50] sm:$0xe] }
  0xa8   :  { %4234 = vmatpush3.bf16.msra.mxu1 %v4637_v58  ;;  %4221 = vmatprep.mubr.bf16.mxu1 %v3682_v28  ;;  %v5449_v58 = vsel %vm5261_vm11, %v3706_v34, %v1244_v17  ;;  %v4647_v28 = vld [vmem:[%s5834_s3 + $0x1a8] sm:$0xff]   ;;  %v1212_v11 = vrot.slane %v4704_v62, 5  ;;  %v3699_v0 = vrot.slane %v1148_v2, 9  ;;  %v4655_v17 = vld [vmem:[#allocation2 + $0x10] ss:$8 sps:$4 sm:$0xff]   ;;  %v3700_v27 = vrot.slane %v1149_v1, 9 }
  0xa9   :  { %4360 = vmatpush3.bf16.msra.mxu0 %v4635_v16  ;;  %4235 = vmatprep.subr.bf16.mxu1 %v4640_v45  ;;  %v5460_v16 = vsel %vm5261_vm11, %v3708_v57, %v1252_v32  ;;  %v3732_v7 = vcombine.low %v5449_v58, %v5456_v23  ;;  %v1152_v47 = vld [vmem:[#allocation2 + $0x58] sm:$0xe]  ;;  %v4706_v57 = vld [vmem:[#allocation2 + $0x34] sm:$0x1]  ;;  %v4707_v20 = vld [vmem:[#allocation2 + $0x3c] sm:$0x1] }
  0xaa   :  { %4361 = vmatprep.subr.bf16.mxu0 %v4638_v6  ;;  %v3733_v35 = vcombine.low %v5460_v16, %v5467_v52  ;;  %v1213_v30 = vsel %vm5261_vm11, %v3698_v40, %v1212_v11  ;;  %v1220_v32 = vrot.slane %v4706_v57, 5  ;;  %v4708_v9 = vld [vmem:[#allocation2 + $0x54] sm:$0x1]  ;;  %v3703_v39 = vrot.slane %v1152_v47, 9  ;;  %v4709_v59 = vld [vmem:[#allocation2 + $0x5c] sm:$0x1] }
  0xab   :  { %4346 = vmatmul.mubr.bf16.gmra.mrb[4].mxu0 %v3841_v12  ;;  %v4644_v12 = vld [vmem:[%s5834_s3 + $0x1a0] sm:$0xff]   ;;  %v1228_v43 = vrot.slane %v4708_v9, 5  ;;  %v2741_v49 = vld [vmem:[#allocation2 + $0x10] sm:$0xf]  ;;  %v5546_v38 = vld [vmem:[#allocation2 + $0x14] sm:$0x1] }
  0xac   :  { %4236 = vmatpush3.bf16.msra.mxu1 %v4640_v45  ;;  %4349 = vmatprep.mubr.bf16.mxu0 %v3842_v44  ;;  %v2282_v45 = vrot.slane %v5320_v21, 5  ;;  %v3685_v21 = vcombine.low %v5257_v46, %v5307_v41  ;;  %v1216_v46 = vrot.slane %v4705_v42, 5  ;;  %v4650_v41 = vld [vmem:[%s5834_s3 + $0x1b0] sm:$0xff]   ;;  %v1224_v44 = vrot.slane %v4707_v20, 5  ;;  %v4664_v40 = vld [vmem:[%s5834_s3 + $0xd8] sm:$0xff]   ;;  %v4671_v58 = vld [vmem:[%s5834_s3 + $0x1e8] sm:$0xff]  }
  0xad   :  { %4362 = vmatpush3.bf16.msra.mxu0 %v4638_v6  ;;  %4237 = vmatprep.subr.bf16.mxu1 %v4643_v22  ;;  %v3821_v6 = vrot.slane %v2191_v18, 9  ;;  %v4656_v18 = vld [vmem:[%s5834_s3 + $0x1c0] sm:$0xff]   ;;  %v1221_v26 = vsel %vm5261_vm11, %v3700_v27, %v1220_v32 }
  0xae   :  { %4363 = vmatprep.subr.bf16.mxu0 %v4641_v37  ;;  %v2283_v63 = vsel %vm5261_vm11, %v3820_v19, %v2282_v45  ;;  %v2774_v19 = vshrl.u32 %v2741_v49, 16  ;;  %v2777_v45 = vshll.u32 %v2741_v49, 16  ;;  %v5556_v42 = vld [vmem:[#allocation2 + $0x24] sm:$0x1] }
  0xaf   :  { %4222 = vmatmul.mubr.bf16.gmra.mrb[8].mxu1 %v3683_v36  ;;  %v2287_v36 = vsel %vm5261_vm11, %v3821_v6, %v2286_v4  ;;  %v4660_v6 = vld [vmem:[%s5834_s3 + $0xd0] sm:$0xff]  }
  0xb0   :  { %4238 = vmatpush3.bf16.msra.mxu1 %v4643_v22  ;;  %4225 = vmatprep.mubr.bf16.mxu1 %v3684_v55  ;;  %v3845_v34 = vcombine.low %v2283_v63, %v2287_v36  ;;  %v1150_v22 = vld [vmem:[#allocation2 + $0x38] sm:$0xe]  ;;  %v3702_v55 = vrot.slane %v1151_v24, 9  ;;  %v2776_v63 = vrot.slane %v2774_v19, 4  ;;  %v2779_v36 = vrot.slane %v2777_v45, 5 }
  0xb1   :  { %4364 = vmatpush3.bf16.msra.mxu0 %v4641_v37  ;;  %4239 = vmatprep.subr.bf16.mxu1 %v4646_v3  ;;  %v1217_v37 = vsel %vm5261_vm11, %v3699_v0, %v1216_v46  ;;  %v3701_v25 = vrot.slane %v1150_v22, 9  ;;  %v2745_v0 = vld [vmem:[#allocation2 + $0x20] sm:$0xf]  ;;  %v4669_v19 = vld [vmem:[#allocation2 + $0x70] ss:$8 sps:$4 sm:$0xff]  }
  0xb2   :  { %4365 = vmatprep.subr.bf16.mxu0 %v4644_v12  ;;  %v1229_v15 = vsel %vm5261_vm11, %v3702_v55, %v1228_v43  ;;  %v4663_v46 = vld [vmem:[#allocation2 + $0x40] ss:$8 sps:$4 sm:$0xff]   ;;  %v2780_v1 = vor.u32 %v2779_v36, %v2776_v63  ;;  %v2802_v47 = vshrl.u32 %v2745_v0, 16  ;;  %v2805_v27 = vshll.u32 %v2745_v0, 16  ;;  %v5597_v63 = vld [vmem:[#allocation2 + $0x3c] sm:$0x1] }
  0xb3   :  { %4350 = vmatmul.mubr.bf16.gmra.mrb[8].mxu0 %v3843_v54  ;;  %v4657_v54 = vld [vmem:[#allocation2 + $0x20] ss:$8 sps:$4 sm:$0xff]   ;;  %v1225_v33 = vsel %vm5261_vm11, %v3701_v25, %v1224_v44 }
  0xb4   :  { %4240 = vmatpush3.bf16.msra.mxu1 %v4646_v3  ;;  %4353 = vmatprep.mubr.bf16.mxu0 %v3844_v13  ;;  %v1232_v3 = vrot.slane %v4709_v59, 5  ;;  %v3729_v13 = vcombine.low %v1221_v26, %v1225_v33  ;;  %v4666_v22 = vld [vmem:[%s5834_s3 + $0xe0] sm:$0xff]   ;;  %v4670_v25 = vld [vmem:[%s5834_s3 + $0xe8] sm:$0xff]  }
  0xb5   :  { %4366 = vmatpush3.bf16.msra.mxu0 %v4644_v12  ;;  %4241 = vmatprep.subr.bf16.mxu1 %v4649_v56  ;;  %v2743_v12 = vld [vmem:[#allocation2 + $0x18] sm:$0xf]  ;;  %v4668_v43 = vld [vmem:[%s5834_s3 + $0x1e0] sm:$0xff]   ;;  %v2759_v0 = vld [vmem:[#allocation2 + $0x68] sm:$0xf] }
  0xb6   :  { %4367 = vmatprep.subr.bf16.mxu0 %v4647_v28  ;;  %v1233_v61 = vsel %vm5261_vm11, %v3703_v39, %v1232_v3  ;;  %v2791_v4 = vshll.u32 %v2743_v12, 16  ;;  %v5575_v39 = vrot.slane %v2780_v1, 4  ;;  %v2753_v33 = vld [vmem:[#allocation2 + $0x40] sm:$0xf]  ;;  %v5617_v1 = vld [vmem:[#allocation2 + $0x44] sm:$0x1] }
  0xb7   :  { %4226 = vmatmul.mubr.bf16.gmra.mrb[12].mxu1 %v3685_v21  ;;  %v3730_v2 = vcombine.low %v1229_v15, %v1233_v61  ;;  %v5548_v21 = vld [vmem:[#allocation2 + $0x1c] sm:$0x1]  ;;  %v5586_v15 = vld [vmem:[#allocation2 + $0x34] sm:$0x1]  ;;  %v2755_v61 = vld [vmem:[#allocation2 + $0x48] sm:$0xf] }
  0xb8   :  { %4242 = vmatpush3.bf16.msra.mxu1 %v4649_v56  ;;  %4245 = vmatprep.mubr.bf16.mxu1 %v3726_v60  ;;  %v3728_v60 = vcombine.low %v1213_v30, %v1217_v37  ;;  %v4661_v56 = vld [vmem:[#allocation2 + $0x30] ss:$8 sps:$4 sm:$0xff]   ;;  %v2793_v11 = vrot.slane %v2791_v4, 5  ;;  %v2858_v36 = vshrl.u32 %v2753_v33, 16  ;;  %v2872_v14 = vshrl.u32 %v2755_v61, 16 }
  0xb9   :  { %4368 = vmatpush3.bf16.msra.mxu0 %v4647_v28  ;;  %4243 = vmatprep.subr.bf16.mxu1 %v4652_v8  ;;  %v4659_v28 = vld [vmem:[%s5834_s3 + $0x1c8] sm:$0xff]   ;;  %v2749_v30 = vld [vmem:[#allocation2 + $0x30] sm:$0xf]  ;;  %v2751_v37 = vld [vmem:[#allocation2 + $0x38] sm:$0xf] }
  0xba   :  { %4369 = vmatprep.subr.bf16.mxu0 %v4650_v41  ;;  %v2830_v20 = vshrl.u32 %v2749_v30, 16  ;;  %v2833_v44 = vshll.u32 %v2749_v30, 16  ;;  %v2844_v55 = vshrl.u32 %v2751_v37, 16  ;;  %v2847_v9 = vshll.u32 %v2751_v37, 16  ;;  %v5619_v30 = vld [vmem:[#allocation2 + $0x4c] sm:$0x1] }
  0xbb   :  { %4354 = vmatmul.mubr.bf16.gmra.mrb[12].mxu0 %v3845_v34  ;;  %v2797_v34 = vshll.u32 %v5548_v21, 16  ;;  %v4674_v37 = vld [vmem:[%s5834_s3 + $0x1f0] sm:$0xff]  }
  0xbc   :  { %4244 = vmatpush3.bf16.msra.mxu1 %v4652_v8  ;;  %4373 = vmatprep.mubr.bf16.mxu0 %v4655_v17  ;;  %v4662_v8 = vld [vmem:[%s5834_s3 + $0x1d0] sm:$0xff]   ;;  %v5563_v17 = vld [vmem:[#allocation2 + $0x2c] sm:$0x1]  ;;  %v2832_v4 = vrot.slane %v2830_v20, 4  ;;  %v2903_v20 = vshll.u32 %v2759_v0, 16 }
  0xbd   :  { %4370 = vmatpush3.bf16.msra.mxu0 %v4650_v41  ;;  %4261 = vmatprep.subr.bf16.mxu1 %v4654_v53  ;;  %v2783_v41 = vshll.u32 %v5546_v38, 16  ;;  %v5579_v3 = vrot.slane %v2797_v34, 5  ;;  %v2825_v49 = vshll.u32 %v5563_v17, 16  ;;  %v2839_v34 = vshll.u32 %v5586_v15, 16 }
  0xbe   :  { %4371 = vmatprep.subr.bf16.mxu0 %v4653_v51 }
  0xbf   :  { %4246 = vmatmul.mubr.bf16.vlgmr.msra.gmra.mrb[0].mxu1 %v3727_v50  ;;  %v2788_v50 = vshrl.u32 %v2743_v12, 16  ;;  %v5577_v59 = vrot.slane %v2783_v41, 5  ;;  %v2804_v12 = vrot.slane %v2802_v47, 4 }
  0xc0   :  { %4262 = vmatpush3.bf16.msra.mxu1 %v4654_v53  ;;  %4249 = vmatprep.mubr.bf16.mxu1 %v3728_v60  ;;  %v4665_v53 = vld [vmem:[%s5834_s3 + $0x1d8] sm:$0xff]   ;;  %v4667_v60 = vld [vmem:[#allocation2 + $0x60] ss:$8 sps:$4 sm:$0xff]  }
  0xc1   :  { %4372 = vmatpush3.bf16.msra.mxu0 %v4653_v51  ;;  %4263 = vmatprep.subr.bf16.mxu1 %v4658_v5  ;;  %v2790_v62 = vrot.slane %v2788_v50, 4  ;;  %v2747_v51 = vld [vmem:[#allocation2 + $0x28] sm:$0xf]  ;;  %v4672_v50 = vld [vmem:[%s5834_s3 + $0xf0] sm:$0xff]   ;;  %v2786_v10 = vsel %vm4864_vm8, %v5575_v39, %v5577_v59 }
  0xc2   :  { %4389 = vmatprep.subr.bf16.mxu0 %v4656_v18  ;;  %v2816_v57 = vshrl.u32 %v2747_v51, 16  ;;  %v2819_v32 = vshll.u32 %v2747_v51, 16  ;;  %v4675_v39 = vld [vmem:[#allocation2 + $0x90] ss:$8 sps:$4 sm:$0xff]  }
  0xc3   :  { %v2794_v24 = vor.u32 %v2793_v11, %v2790_v62  ;;  %v5610_v11 = vrot.slane %v2825_v49, 5 }
  0xc4   :  { %4374 = vmatmul.mubr.bf16.vlgmr.msra.gmra.mrb[0].mxu0 %v4657_v54  ;;  %4264 = vmatpush3.bf16.msra.mxu1 %v4658_v5  ;;  %v2811_v5 = vshll.u32 %v5556_v42, 16  ;;  %v2807_v54 = vrot.slane %v2805_v27, 5  ;;  %v2818_v45 = vrot.slane %v2816_v57, 4 }
  0xc5   :  { %4390 = vmatpush3.bf16.msra.mxu0 %v4656_v18  ;;  %4265 = vmatprep.subr.bf16.mxu1 %v4660_v6  ;;  %v5582_v18 = vrot.slane %v2794_v24, 4  ;;  %v2860_v24 = vrot.slane %v2858_v36, 4 }
  0xc6   :  { %4391 = vmatprep.subr.bf16.mxu0 %v4659_v28  ;;  %4377 = vmatprep.mubr.bf16.mxu0 %v4661_v56  ;;  %v5584_v26 = vrot.slane %v2811_v5, 5  ;;  %v2846_v56 = vrot.slane %v2844_v55, 4 }
  0xc7   :  { %4250 = vmatmul.mubr.bf16.gmra.mrb[4].mxu1 %v3729_v13  ;;  %v2849_v13 = vrot.slane %v2847_v9, 5  ;;  %v2800_v23 = vsel %vm4864_vm8, %v5582_v18, %v5579_v3  ;;  %v2881_v9 = vshll.u32 %v5619_v30, 16 }
  0xc8   :  { %4266 = vmatpush3.bf16.msra.mxu1 %v4660_v6  ;;  %4253 = vmatprep.mubr.bf16.mxu1 %v3730_v2  ;;  %v2821_v6 = vrot.slane %v2819_v32, 5  ;;  %v4673_v2 = vld [vmem:[#allocation2 + $0x80] ss:$8 sps:$4 sm:$0xff]   ;;  %v2900_v32 = vshrl.u32 %v2759_v0, 16  ;;  %v3902_v18 = vcombine.low %v2786_v10, %v2800_v23 }
  0xc9   :  { %4392 = vmatpush3.bf16.msra.mxu0 %v4659_v28  ;;  %4267 = vmatprep.subr.bf16.mxu1 %v4664_v40  ;;  %v2835_v28 = vrot.slane %v2833_v44, 5  ;;  %v2850_v51 = vor.u32 %v2849_v13, %v2846_v56  ;;  %v5653_v36 = vrot.slane %v2881_v9, 5  ;;  %v5664_v0 = vld [vmem:[%s5834_s3 + $0x208] sm:$0xff]  }
  0xca   :  { %4393 = vmatprep.subr.bf16.mxu0 %v4662_v8  ;;  %v2822_v62 = vor.u32 %v2821_v6, %v2818_v45  ;;  %v2905_v45 = vrot.slane %v2903_v20, 5  ;;  %v2761_v6 = vld [vmem:[#allocation2 + $0x70] sm:$0xf] }
  0xcb   :  { %v2836_v41 = vor.u32 %v2835_v28, %v2832_v4  ;;  %v2851_v3 = vrot.slane %v2850_v51, 4  ;;  %v5643_v4 = vld [vmem:[%s5834_s3 + $0x200] sm:$0xff]   ;;  %v2914_v23 = vshrl.u32 %v2761_v6, 16  ;;  %v5681_v20 = vld [vmem:[%s5834_s3 + $0x210] sm:$0xff]  }
  0xcc   :  { %4378 = vmatmul.mubr.bf16.gmra.mrb[4].mxu0 %v4663_v46  ;;  %4268 = vmatpush3.bf16.msra.mxu1 %v4664_v40  ;;  %v2757_v40 = vld [vmem:[#allocation2 + $0x60] sm:$0xf]  ;;  %v4676_v46 = vld [vmem:[%s5834_s3 + $0xf8] sm:$0xff]   ;;  %v2823_v55 = vrot.slane %v2822_v62, 4 }
  0xcd   :  { %4394 = vmatpush3.bf16.msra.mxu0 %v4662_v8  ;;  %4269 = vmatprep.subr.bf16.mxu1 %v4666_v22  ;;  %v2861_v8 = vshll.u32 %v2753_v33, 16  ;;  %v2886_v27 = vshrl.u32 %v2757_v40, 16  ;;  %v2889_v5 = vshll.u32 %v2757_v40, 16  ;;  %v2837_v59 = vrot.slane %v2836_v41, 4  ;;  %v4680_v28 = vld [vmem:[#allocation2 + $0x18] ss:$8 sps:$4 sm:$0xff]  }
  0xce   :  { %4395 = vmatprep.subr.bf16.mxu0 %v4665_v53  ;;  %4381 = vmatprep.mubr.bf16.mxu0 %v4667_v60  ;;  %v2874_v60 = vrot.slane %v2872_v14, 4  ;;  %v2828_v13 = vsel %vm4864_vm8, %v2823_v55, %v5610_v11  ;;  %v2765_v40 = vld [vmem:[#allocation2 + $0x80] sm:$0xf] }
  0xcf   :  { %4254 = vmatmul.mubr.bf16.gmra.mrb[8].mxu1 %v3731_v48  ;;  %v2875_v48 = vshll.u32 %v2755_v61, 16  ;;  %v2863_v47 = vrot.slane %v2861_v8, 5  ;;  %v5633_v33 = vrot.slane %v2886_v27, 4  ;;  %v2763_v61 = vld [vmem:[#allocation2 + $0x78] sm:$0xf] }
  0xd0   :  { %4270 = vmatpush3.bf16.msra.mxu1 %v4666_v22  ;;  %4257 = vmatprep.mubr.bf16.mxu1 %v3732_v7  ;;  %v2808_v7 = vor.u32 %v2807_v54, %v2804_v12  ;;  %v4678_v22 = vld [vmem:[#allocation2 + $0x8] ss:$8 sps:$4 sm:$0xff]   ;;  %v5629_v12 = vld [vmem:[#allocation2 + $0x64] sm:$0x1]  ;;  %v5631_v54 = vld [vmem:[#allocation2 + $0x6c] sm:$0x1] }
  0xd1   :  { %4396 = vmatpush3.bf16.msra.mxu0 %v4665_v53  ;;  %4271 = vmatprep.subr.bf16.mxu1 %v4670_v25  ;;  %v2853_v53 = vshll.u32 %v5597_v63, 16  ;;  %v2877_v57 = vrot.slane %v2875_v48, 5  ;;  %v2864_v16 = vor.u32 %v2863_v47, %v2860_v24  ;;  %v2895_v14 = vshll.u32 %v5629_v12, 16 }
  0xd2   :  { %4397 = vmatprep.subr.bf16.mxu0 %v4668_v43  ;;  %v2809_v44 = vrot.slane %v2808_v7, 4  ;;  %v2909_v48 = vshll.u32 %v5631_v54, 16  ;;  %v2917_v7 = vshll.u32 %v2761_v6, 16  ;;  %v2928_v62 = vshrl.u32 %v2763_v61, 16  ;;  %v4684_v6 = vld [vmem:[#allocation2 + $0x38] ss:$8 sps:$4 sm:$0xff]  }
  0xd3   :  { %v2855_v49 = vrot.slane %v2853_v53, 5  ;;  %v2878_v52 = vor.u32 %v2877_v57, %v2874_v60  ;;  %v2931_v11 = vshll.u32 %v2763_v61, 16  ;;  %v2865_v41 = vrot.slane %v2864_v16, 4  ;;  %v5673_v57 = vld [vmem:[#allocation2 + $0x74] sm:$0x1] }
  0xd4   :  { %4382 = vmatmul.mubr.bf16.gmra.mrb[8].mxu0 %v4669_v19  ;;  %4272 = vmatpush3.bf16.msra.mxu1 %v4670_v25  ;;  %v2867_v25 = vshll.u32 %v5617_v1, 16  ;;  %v5635_v19 = vrot.slane %v2889_v5, 5  ;;  %v2814_v56 = vsel %vm4864_vm8, %v2809_v44, %v5584_v26  ;;  %v2767_v26 = vld [vmem:[#allocation2 + $0x88] sm:$0xf]  ;;  %v5669_v5 = vrot.slane %v2895_v14, 5 }
  0xd5   :  { %4398 = vmatpush3.bf16.msra.mxu0 %v4668_v43  ;;  %4273 = vmatprep.subr.bf16.mxu1 %v4672_v50  ;;  %v2841_v43 = vrot.slane %v2839_v34, 5  ;;  %v2856_v10 = vsel %vm4864_vm8, %v2851_v3, %v2855_v49  ;;  %v2879_v34 = vrot.slane %v2878_v52, 4  ;;  %v2956_v24 = vshrl.u32 %v2767_v26, 16 }
  0xd6   :  { %4399 = vmatprep.subr.bf16.mxu0 %v4671_v58  ;;  %4385 = vmatprep.mubr.bf16.mxu0 %v4673_v2  ;;  %v5651_v2 = vrot.slane %v2867_v25, 5  ;;  %v2892_v51 = vor.u32 %v5635_v19, %v5633_v33  ;;  %v2959_v47 = vshll.u32 %v2767_v26, 16  ;;  %v5671_v60 = vrot.slane %v2909_v48, 5  ;;  %v2771_v33 = vld [vmem:[#allocation2 + $0x98] sm:$0xf] }
  0xd7   :  { %4258 = vmatmul.mubr.bf16.gmra.mrb[12].mxu1 %v3733_v35  ;;  %v2902_v35 = vrot.slane %v2900_v32, 4  ;;  %v2842_v8 = vsel %vm4864_vm8, %v2837_v59, %v2841_v43  ;;  %v5675_v32 = vld [vmem:[#allocation2 + $0x7c] sm:$0x1]  ;;  %v2916_v44 = vrot.slane %v2914_v23, 4  ;;  %v2919_v55 = vrot.slane %v2917_v7, 5 }
  0xd8   :  { %4274 = vmatpush3.bf16.msra.mxu1 %v4672_v50  ;;  %4277 = vmatprep.mubr.bf16.mxu1 %v4678_v22  ;;  %v4677_v50 = vld [vmem:[%s5834_s3 + $0x1f8] sm:$0xff]   ;;  %v2945_v22 = vshll.u32 %v2765_v40, 16  ;;  %v3904_v27 = vcombine.low %v2842_v8, %v2856_v10  ;;  %v2930_v25 = vrot.slane %v2928_v62, 4  ;;  %v2933_v9 = vrot.slane %v2931_v11, 5  ;;  %v5693_v19 = vld [vmem:[#allocation2 + $0x8c] sm:$0x1] }
  0xd9   :  { %4400 = vmatpush3.bf16.msra.mxu0 %v4671_v58  ;;  %4275 = vmatprep.subr.bf16.mxu1 %v4676_v46  ;;  %v4682_v58 = vld [vmem:[#allocation2 + $0x28] ss:$8 sps:$4 sm:$0xff]   ;;  %v2906_v53 = vor.u32 %v2905_v45, %v2902_v35  ;;  %v2870_v59 = vsel %vm4864_vm8, %v2865_v41, %v5651_v2  ;;  %v2884_v43 = vsel %vm4864_vm8, %v2879_v34, %v5653_v36  ;;  %v2893_v3 = vrot.slane %v2892_v51, 4  ;;  %v5702_v48 = vld [vmem:[%s5834_s3 + $0x218] sm:$0xff]  }
  0xda   :  { %4401 = vmatprep.subr.bf16.mxu0 %v4674_v37  ;;  %v2947_v52 = vrot.slane %v2945_v22, 5  ;;  %v2958_v35 = vrot.slane %v2956_v24, 4  ;;  %v2961_v45 = vrot.slane %v2959_v47, 5  ;;  %v2923_v61 = vshll.u32 %v5673_v57, 16 }
  0xdb   :  { %v2907_v49 = vrot.slane %v2906_v53, 4  ;;  %v2920_v2 = vor.u32 %v2919_v55, %v2916_v44  ;;  %v2934_v36 = vor.u32 %v2933_v9, %v2930_v25  ;;  %v2984_v8 = vshrl.u32 %v2771_v33, 16  ;;  %v3215_v25 = vld [vmem:[#allocation2 + $0x60] sm:$0xe]  ;;  %v3216_v9 = vld [vmem:[#allocation2 + $0x68] sm:$0xe] }
  0xdc   :  { %4386 = vmatmul.mubr.bf16.gmra.mrb[12].mxu0 %v4675_v39  ;;  %4276 = vmatpush3.bf16.msra.mxu1 %v4676_v46  ;;  %v2942_v46 = vshrl.u32 %v2765_v40, 16  ;;  %v2769_v39 = vld [vmem:[#allocation2 + $0x90] sm:$0xf]  ;;  %v2987_v10 = vshll.u32 %v2771_v33, 16  ;;  %v3905_v14 = vcombine.low %v2870_v59, %v2884_v43  ;;  %v2898_v40 = vsel %vm4864_vm8, %v2893_v3, %v5669_v5 }
  0xdd   :  { %4402 = vmatpush3.bf16.msra.mxu0 %v4674_v37  ;;  %4405 = vmatprep.mubr.bf16.mxu0 %v3902_v18  ;;  %v3903_v37 = vcombine.low %v2814_v56, %v2828_v13  ;;  %v5690_v18 = vld [vmem:[#allocation2 + $0x84] sm:$0x1]  ;;  %v2973_v56 = vshll.u32 %v2769_v39, 16  ;;  %v4686_v13 = vld [vmem:[#allocation2 + $0x58] ss:$8 sps:$4 sm:$0xff]   ;;  %v2962_v7 = vor.u32 %v2961_v45, %v2958_v35  ;;  %v2925_v62 = vrot.slane %v2923_v61, 5 }
  0xde   :  { %4403 = vmatprep.subr.bf16.mxu0 %v4677_v50  ;;  %4453 = vmatprep.subr.bf16.mxu1 %v5643_v4  ;;  %v2944_v16 = vrot.slane %v2942_v46, 4  ;;  %v2951_v26 = vshll.u32 %v5690_v18, 16  ;;  %v2921_v51 = vrot.slane %v2920_v2, 4  ;;  %v2935_v53 = vrot.slane %v2934_v36, 4  ;;  %v5715_v46 = vld [vmem:[#allocation2 + $0x94] sm:$0x1] }
  0xdf   :  { %4278 = vmatmul.mubr.bf16.vlgmr.msra.gmra.mrb[0].mxu1 %v4680_v28  ;;  %v2970_v28 = vshrl.u32 %v2769_v39, 16  ;;  %v2975_v34 = vrot.slane %v2973_v56, 5  ;;  %v2986_v22 = vrot.slane %v2984_v8, 4  ;;  %v2989_v24 = vrot.slane %v2987_v10, 5  ;;  %v4688_v39 = vld [vmem:[#allocation2 + $0x68] ss:$8 sps:$4 sm:$0xff]  }
  0xe0   :  { %4461 = vmatpush3.bf16.msra.mxu1 %v5643_v4  ;;  %4281 = vmatprep.mubr.bf16.mxu1 %v4682_v58  ;;  %v2965_v58 = vshll.u32 %v5693_v19, 16  ;;  %v2948_v23 = vor.u32 %v2947_v52, %v2944_v16  ;;  %v2963_v55 = vrot.slane %v2962_v7, 4  ;;  %v2979_v43 = vshll.u32 %v5715_v46, 16  ;;  %v3207_v52 = vld [vmem:[#allocation2 + $0x10] sm:$0xe]  ;;  %v5738_v45 = vld [vmem:[%s5834_s3 + $0x228] sm:$0xff]  }
  0xe1   :  { %4404 = vmatpush3.bf16.msra.mxu0 %v4677_v50  ;;  %4454 = vmatprep.subr.bf16.mxu1 %v5664_v0  ;;  %v2937_v50 = vshll.u32 %v5675_v32, 16  ;;  %v2972_v41 = vrot.slane %v2970_v28, 4  ;;  %v2926_v3 = vsel %vm4864_vm8, %v2921_v51, %v2925_v62  ;;  %v2990_v33 = vor.u32 %v2989_v24, %v2986_v22  ;;  %v3208_v35 = vld [vmem:[#allocation2 + $0x18] sm:$0xe]  ;;  %v4691_v7 = vld [vmem:[%s5834_s3 + $0x230] sm:$0xff]  }
  0xe2   :  { %4421 = vmatprep.subr.bf16.mxu0 %v5643_v4  ;;  %v2967_v5 = vrot.slane %v2965_v58, 5  ;;  %v2949_v44 = vrot.slane %v2948_v23, 4  ;;  %v3289_v61 = vrot.slane %v5629_v12, 5  ;;  %v3293_v28 = vrot.slane %v5631_v54, 5  ;;  %v3217_v58 = vld [vmem:[#allocation2 + $0x70] sm:$0xe] }
  0xe3   :  { %v2939_v11 = vrot.slane %v2937_v50, 5  ;;  %v2976_v59 = vor.u32 %v2975_v34, %v2972_v41  ;;  %v3927_v50 = vrot.slane %v3216_v9, 9  ;;  %v3261_v2 = vrot.slane %v5548_v21, 5  ;;  %v3220_v62 = vld [vmem:[#allocation2 + $0x88] sm:$0xe] }
  0xe4   :  { %4406 = vmatmul.mubr.bf16.vlgmr.msra.gmra.mrb[0].mxu0 %v3903_v37  ;;  %4462 = vmatpush3.bf16.msra.mxu1 %v5664_v0  ;;  %v5722_v37 = vld [vmem:[%s5834_s3 + $0x220] sm:$0xff]   ;;  %v2981_v12 = vrot.slane %v2979_v43, 5  ;;  %v3918_v8 = vrot.slane %v3207_v52, 9  ;;  %v3919_v10 = vrot.slane %v3208_v35, 9  ;;  %v3297_v23 = vrot.slane %v5673_v57, 5 }
  0xe5   :  { %4422 = vmatpush3.bf16.msra.mxu0 %v5643_v4  ;;  %4409 = vmatprep.mubr.bf16.mxu0 %v3904_v27  ;;  %v2912_v4 = vsel %vm4864_vm8, %v2907_v49, %v5671_v60  ;;  %v2953_v27 = vrot.slane %v2951_v26, 5  ;;  %v5724_v60 = vld [vmem:[#allocation2 + $0x9c] sm:$0x1]  ;;  %v2940_v49 = vsel %vm4864_vm8, %v2935_v53, %v2939_v11  ;;  %v2977_v36 = vrot.slane %v2976_v59, 4  ;;  %v4692_v41 = vld [vmem:[#allocation2 + $0x88] ss:$8 sps:$4 sm:$0xff]  }
  0xe6   :  { %4423 = vmatprep.subr.bf16.mxu0 %v5664_v0  ;;  %4455 = vmatprep.subr.bf16.mxu1 %v5681_v20  ;;  %v3906_v47 = vcombine.low %v2898_v40, %v2912_v4  ;;  %v2993_v16 = vshll.u32 %v5724_v60, 16  ;;  %v3907_v54 = vcombine.low %v2926_v3, %v2940_v49  ;;  %v3294_v21 = vsel %vm5261_vm11, %v3927_v50, %v3293_v28  ;;  %v3218_v4 = vld [vmem:[#allocation2 + $0x78] sm:$0xe]  ;;  %v3209_v24 = vld [vmem:[#allocation2 + $0x20] sm:$0xe] }
  0xe7   :  { %4282 = vmatmul.mubr.bf16.gmra.mrb[4].mxu1 %v4684_v6  ;;  %v3926_v6 = vrot.slane %v3215_v25, 9  ;;  %v2954_v56 = vsel %vm4864_vm8, %v2949_v44, %v2953_v27  ;;  %v3301_v11 = vrot.slane %v5675_v32, 5  ;;  %v2982_v34 = vsel %vm4864_vm8, %v2977_v36, %v2981_v12  ;;  %v4693_v27 = vld [vmem:[%s5834_s3 + $0x238] sm:$0xff]   ;;  %v3221_v3 = vld [vmem:[#allocation2 + $0x90] sm:$0xe] }
  0xe8   :  { %4463 = vmatpush3.bf16.msra.mxu1 %v5681_v20  ;;  %4285 = vmatprep.mubr.bf16.mxu1 %v4686_v13  ;;  %v3257_v13 = vrot.slane %v5546_v38, 5  ;;  %v2995_v40 = vrot.slane %v2993_v16, 5  ;;  %v3262_v53 = vsel %vm5261_vm11, %v3919_v10, %v3261_v2  ;;  %v3929_v32 = vrot.slane %v3218_v4, 9  ;;  %v3213_v36 = vld [vmem:[#allocation2 + $0x40] sm:$0xe] }
  0xe9   :  { %4424 = vmatpush3.bf16.msra.mxu0 %v5664_v0  ;;  %4456 = vmatprep.subr.bf16.mxu1 %v5702_v48  ;;  %v4690_v0 = vld [vmem:[#allocation2 + $0x78] ss:$8 sps:$4 sm:$0xff]   ;;  %v3290_v38 = vsel %vm5261_vm11, %v3926_v6, %v3289_v61  ;;  %v3305_v44 = vrot.slane %v5690_v18, 5  ;;  %v3309_v25 = vrot.slane %v5693_v19, 5  ;;  %v3265_v43 = vrot.slane %v5556_v42, 5 }
  0xea   :  { %4425 = vmatprep.subr.bf16.mxu0 %v5681_v20  ;;  %v3258_v51 = vsel %vm5261_vm11, %v3918_v8, %v3257_v13  ;;  %v3954_v22 = vcombine.low %v3290_v38, %v3294_v21  ;;  %v3302_v19 = vsel %vm5261_vm11, %v3929_v32, %v3301_v11  ;;  %v3921_v49 = vrot.slane %v3210_v29, 9  ;;  %v3222_v42 = vld [vmem:[#allocation2 + $0x98] sm:$0xe] }
  0xeb   :  { %v3950_v9 = vcombine.low %v3258_v51, %v3262_v53  ;;  %v3273_v6 = vrot.slane %v5586_v15, 5  ;;  %v3277_v50 = vrot.slane %v5597_v63, 5  ;;  %v3317_v13 = vrot.slane %v5724_v60, 5 }
  0xec   :  { %4410 = vmatmul.mubr.bf16.gmra.mrb[4].mxu0 %v3905_v14  ;;  %4464 = vmatpush3.bf16.msra.mxu1 %v5702_v48  ;;  %v2991_v14 = vrot.slane %v2990_v33, 4  ;;  %v3269_v33 = vrot.slane %v5563_v17, 5  ;;  %v3313_v17 = vrot.slane %v5715_v46, 5  ;;  %v3214_v46 = vld [vmem:[#allocation2 + $0x48] sm:$0xe]  ;;  %v3924_v60 = vrot.slane %v3213_v36, 9 }
  0xed   :  { %4426 = vmatpush3.bf16.msra.mxu0 %v5681_v20  ;;  %4413 = vmatprep.mubr.bf16.mxu0 %v3906_v47  ;;  %v2968_v20 = vsel %vm4864_vm8, %v2963_v55, %v2967_v5  ;;  %v3928_v47 = vrot.slane %v3217_v58, 9  ;;  %v3931_v55 = vrot.slane %v3220_v62, 9  ;;  %v3285_v38 = vrot.slane %v5619_v30, 5 }
  0xee   :  { %4427 = vmatprep.subr.bf16.mxu0 %v5702_v48  ;;  %4457 = vmatprep.subr.bf16.mxu1 %v5722_v37  ;;  %v3908_v26 = vcombine.low %v2954_v56, %v2968_v20  ;;  %v2996_v57 = vsel %vm4864_vm8, %v2991_v14, %v2995_v40  ;;  %v3933_v20 = vrot.slane %v3222_v42, 9  ;;  %v3270_v15 = vsel %vm5261_vm11, %v3921_v49, %v3269_v33 }
  0xef   :  { %4286 = vmatmul.mubr.bf16.gmra.mrb[8].mxu1 %v4688_v39  ;;  %v3920_v39 = vrot.slane %v3209_v24, 9  ;;  %v3909_v59 = vcombine.low %v2982_v34, %v2996_v57  ;;  %v3298_v18 = vsel %vm5261_vm11, %v3928_v47, %v3297_v23  ;;  %v3310_v52 = vsel %vm5261_vm11, %v3931_v55, %v3309_v25 }
  0xf0   :  { %4465 = vmatpush3.bf16.msra.mxu1 %v5722_v37  ;;  %4289 = vmatprep.mubr.bf16.mxu1 %v4690_v0  ;;  %v3211_v0 = vld [vmem:[#allocation2 + $0x30] sm:$0xe]  ;;  %v3955_v28 = vcombine.low %v3298_v18, %v3302_v19  ;;  %v3281_v40 = vrot.slane %v5617_v1, 5 }
  0xf1   :  { %4428 = vmatpush3.bf16.msra.mxu0 %v5702_v48  ;;  %4458 = vmatprep.subr.bf16.mxu1 %v5738_v45  ;;  %v3219_v48 = vld [vmem:[#allocation2 + $0x80] sm:$0xe]  ;;  %v3922_v35 = vrot.slane %v3211_v0, 9  ;;  %v3266_v2 = vsel %vm5261_vm11, %v3920_v39, %v3265_v43 }
  0xf2   :  { %4429 = vmatprep.subr.bf16.mxu0 %v5722_v37  ;;  %v3930_v5 = vrot.slane %v3219_v48, 9  ;;  %v3951_v8 = vcombine.low %v3266_v2, %v3270_v15  ;;  %v3282_v58 = vsel %vm5261_vm11, %v3924_v60, %v3281_v40 }
  0xf3   :  { %v3274_v63 = vsel %vm5261_vm11, %v3922_v35, %v3273_v6 }
  0xf4   :  { %4414 = vmatmul.mubr.bf16.gmra.mrb[8].mxu0 %v3907_v54  ;;  %4466 = vmatpush3.bf16.msra.mxu1 %v5738_v45  ;;  %v3306_v16 = vsel %vm5261_vm11, %v3930_v5, %v3305_v44  ;;  %v3318_v54 = vsel %vm5261_vm11, %v3933_v20, %v3317_v13 }
  0xf5   :  { %4430 = vmatpush3.bf16.msra.mxu0 %v5722_v37  ;;  %4417 = vmatprep.mubr.bf16.mxu0 %v3908_v26  ;;  %v3212_v37 = vld [vmem:[#allocation2 + $0x38] sm:$0xe]  ;;  %v3956_v56 = vcombine.low %v3306_v16, %v3310_v52  ;;  %v3925_v26 = vrot.slane %v3214_v46, 9 }
  0xf6   :  { %4431 = vmatprep.subr.bf16.mxu0 %v5738_v45  ;;  %4459 = vmatprep.subr.bf16.mxu1 %v4691_v7  ;;  %v3923_v61 = vrot.slane %v3212_v37, 9 }
  0xf7   :  { %4290 = vmatmul.mubr.bf16.gmra.mrb[12].mxu1 %v4692_v41  ;;  %v3286_v4 = vsel %vm5261_vm11, %v3925_v26, %v3285_v38 }
  0xf8   :  { %4467 = vmatpush3.bf16.msra.mxu1 %v4691_v7  ;;  %4445 = vmatprep.mubr.bf16.mxu1 %v3954_v22  ;;  %v3278_v12 = vsel %vm5261_vm11, %v3923_v61, %v3277_v50  ;;  %v3953_v23 = vcombine.low %v3282_v58, %v3286_v4 }
  0xf9   :  { %4432 = vmatpush3.bf16.msra.mxu0 %v5738_v45  ;;  %4460 = vmatprep.subr.bf16.mxu1 %v4693_v27  ;;  %v3932_v45 = vrot.slane %v3221_v3, 9  ;;  %v3952_v14 = vcombine.low %v3274_v63, %v3278_v12 }
  0xfa   :  { %4433 = vmatprep.subr.bf16.mxu0 %v4691_v7 }
  0xfb   :  { %v3314_v10 = vsel %vm5261_vm11, %v3932_v45, %v3313_v17 }
  0xfc   :  { %4418 = vmatmul.mubr.bf16.gmra.mrb[12].mxu0 %v3909_v59  ;;  %4468 = vmatpush3.bf16.msra.mxu1 %v4693_v27  ;;  %v3957_v21 = vcombine.low %v3314_v10, %v3318_v54 }
  0xfd   :  { %4434 = vmatpush3.bf16.msra.mxu0 %v4691_v7  ;;  %4437 = vmatprep.mubr.bf16.mxu0 %v3950_v9 }
  0xfe   :  { %4435 = vmatprep.subr.bf16.mxu0 %v4693_v27 }
  0xff   :  { %4446 = vmatmul.mubr.bf16.vlgmr.msra.gmra.mrb[16].mxu1 %v3955_v28 }
 0x100   :  { %4449 = vmatprep.mubr.bf16.mxu1 %v3956_v56 }
 0x101   :  { %4436 = vmatpush3.bf16.msra.mxu0 %v4693_v27 }
 0x104   :  { %4438 = vmatmul.mubr.bf16.vlgmr.msra.gmra.mrb[0].mxu0 %v3951_v8 }
 0x105   :  { %4441 = vmatprep.mubr.bf16.mxu0 %v3952_v14 }
 0x107   :  { %4450 = vmatmul.mubr.bf16.gmra.mrb[20].mxu1 %v3957_v21 }
 0x10c   :  { %4442 = vmatmul.mubr.bf16.gmra.mrb[4].mxu0 %v3953_v23 }
 0x1b2   :  { %v4279_v7 = vpop.f32.mrb[0].mxu1 }
 0x1b3   :  { %v1631_v48 = vpop.f32.mrb[1].mxu1 }
 0x1b4   :  { %v4280_v62 = vpop.f32.mrb[2].mxu1 }
 0x1b5   :  { %v1634_v11 = vpop.f32.mrb[3].mxu1 }
 0x1ba   :  { %v4283_v1 = vpop.f32.mrb[4].mxu1 }
 0x1bb   :  { %v1647_v41 = vpop.f32.mrb[5].mxu1 }
 0x1bc   :  { %v5812_v34 = vpop.f32.mrb[6].mxu1 }
 0x1bd   :  { %v5814_v30 = vpop.f32.mrb[7].mxu1 }
 0x1c2   :  { %v4287_v51 = vpop.f32.mrb[8].mxu1 }
 0x1c3   :  { %v1663_v53 = vpop.f32.mrb[9].mxu1 }
 0x1c4   :  { %v4288_v57 = vpop.f32.mrb[10].mxu1 }
 0x1c5   :  { %v1666_v22 = vpop.f32.mrb[11].mxu1 }
 0x1c7   :  { %v4415_v24 = vpop.f32.mrb[8].mxu0 }
 0x1c8   :  { %v4477_v31 = vadd.f32 %v4415_v24, %v4287_v51  ;;  %v3160_v47 = vpop.f32.mrb[9].mxu0 }
 0x1c9   :  { %v4479_v32 = vadd.f32 %v3160_v47, %v1663_v53  ;;  %v4416_v27 = vpop.f32.mrb[10].mxu0 }
 0x1ca   :  { %v4481_v5 = vadd.f32 %v4416_v27, %v4288_v57  ;;  %v3163_v44 = vpop.f32.mrb[11].mxu0  ;;  %v4291_v55 = vpop.f32.mrb[12].mxu1 }
 0x1cb   :  { %v4483_v25 = vadd.f32 %v3163_v44, %v1666_v22  ;;  %v1679_v29 = vpop.f32.mrb[13].mxu1 }
 0x1cc   :  { %v4292_v9 = vpop.f32.mrb[14].mxu1 }
 0x1cd   :  { %v1682_v39 = vpop.f32.mrb[15].mxu1 }
 0x1cf   :  { %v4419_v0 = vpop.f32.mrb[12].mxu0 }
 0x1d0   :  { %v4485_v37 = vadd.f32 %v4419_v0, %v4291_v55  ;;  %v3176_v59 = vpop.f32.mrb[13].mxu0 }
 0x1d1   :  { %v4487_v43 = vadd.f32 %v3176_v59, %v1679_v29  ;;  %v4420_v18 = vpop.f32.mrb[14].mxu0 }
 0x1d2   :  { %v4489_v19 = vadd.f32 %v4420_v18, %v4292_v9  ;;  %v3179_v3 = vpop.f32.mrb[15].mxu0  ;;  %v4447_v49 = vpop.f32.mrb[16].mxu1 }
 0x1d3   :  { %v4491_v33 = vadd.f32 %v3179_v3, %v1682_v39  ;;  %v4478_v16 = vadd.f32 %v4477_v31, %v4447_v49  ;;  %v3482_v52 = vpop.f32.mrb[17].mxu1 }
 0x1d4   :  { %v4480_v42 = vadd.f32 %v4479_v32, %v3482_v52  ;;  %v4448_v35 = vpop.f32.mrb[18].mxu1 }
 0x1d5   :  { %v4482_v6 = vadd.f32 %v4481_v5, %v4448_v35  ;;  %v3485_v61 = vpop.f32.mrb[19].mxu1 }
 0x1d6   :  { %v4484_v50 = vadd.f32 %v4483_v25, %v3485_v61 }
 0x1d7   :  { %v4439_v28 = vpop.f32.mrb[0].mxu0 }
 0x1d8   :  { %v5816_v45 = vadd.f32 %v4439_v28, %v4279_v7  ;;  %v3450_v56 = vpop.f32.mrb[1].mxu0  ;;  %v3542_v17 = vadd.f32 %v4484_v50, %v4480_v42 }
 0x1d9   :  { %v4470_v20 = vadd.f32 %v3450_v56, %v1631_v48  ;;  %v4440_v13 = vpop.f32.mrb[2].mxu0 }
 0x1da   :  { %v4471_v2 = vadd.f32 %v4440_v13, %v4280_v62  ;;  %v3453_v15 = vpop.f32.mrb[3].mxu0  ;;  %v3543_v36 = vadd.f32 %v4478_v16, %v3542_v17  ;;  %v4451_v63 = vpop.f32.mrb[20].mxu1 }
 0x1db   :  { %v4472_v12 = vadd.f32 %v3453_v15, %v1634_v11  ;;  %v4486_v46 = vadd.f32 %v4485_v37, %v4451_v63  ;;  %v3498_v8 = vpop.f32.mrb[21].mxu1 }
 0x1dc   :  { %v4488_v60 = vadd.f32 %v4487_v43, %v3498_v8  ;;  %v3544_v10 = vadd.f32 %v4482_v6, %v3543_v36  ;;  %v4452_v54 = vpop.f32.mrb[22].mxu1 }
 0x1dd   :  { %v3529_v14 = vadd.f32 %v4472_v12, %v4470_v20  ;;  %v4490_v40 = vadd.f32 %v4489_v19, %v4452_v54  ;;  %v3501_v26 = vpop.f32.mrb[23].mxu1 }
 0x1de   :  { %v3545_v38 = vadd.f32 %v4488_v60, %v3544_v10  ;;  %v4492_v21 = vadd.f32 %v4491_v33, %v3501_v26 }
 0x1df   :  { %v3530_v58 = vadd.f32 %v5816_v45, %v3529_v14  ;;  %v4443_v4 = vpop.f32.mrb[4].mxu0 }
 0x1e0   :  { %v4473_v23 = vadd.f32 %v4443_v4, %v4283_v1  ;;  %v3466_v7 = vpop.f32.mrb[5].mxu0  ;;  %v3546_v48 = vadd.f32 %v4492_v21, %v3545_v38 }
 0x1e1   :  { %v4474_v62 = vadd.f32 %v3466_v7, %v1647_v41  ;;  %v3531_v51 = vadd.f32 %v4471_v2, %v3530_v58  ;;  %v4444_v53 = vpop.f32.mrb[6].mxu0 }
 0x1e2   :  { %v4475_v11 = vadd.f32 %v4444_v53, %v5812_v34  ;;  %v3469_v57 = vpop.f32.mrb[7].mxu0  ;;  %v3547_v22 = vadd.f32 %v4486_v46, %v3546_v48 }
 0x1e3   :  { %v3532_v24 = vadd.f32 %v4474_v62, %v3531_v51  ;;  %v4476_v31 = vadd.f32 %v3469_v57, %v5814_v30 }
 0x1e4   :  { %v3548_v47 = vadd.f32 %v4490_v40, %v3547_v22 }
 0x1e5   :  { %v3533_v32 = vadd.f32 %v4476_v31, %v3532_v24 }
 0x1e6   :  { %v3549_v27 = vrot.slane %v3548_v47, 4 }
 0x1e7   :  { %v3534_v5 = vadd.f32 %v4473_v23, %v3533_v32 }
 0x1e8   :  { %v3550_v44 = vadd.f32 %v3549_v27, %v3548_v47 }
 0x1e9   :  { %v3535_v55 = vadd.f32 %v4475_v11, %v3534_v5 }
 0x1ea   :  { %v3551_v25 = vrot.slane %v3550_v44, 2 }
 0x1eb   :  { %v3536_v1 = vrot.slane %v3535_v55, 4 }
 0x1ec   :  { %v3552_v29 = vadd.f32 %v3551_v25, %v3550_v44 }
 0x1ed   :  { %v3537_v9 = vadd.f32 %v3536_v1, %v3535_v55 }
 0x1ee   :  { %v3553_v41 = vrot.slane %v3552_v29, 1 }
 0x1ef   :  { %v3538_v39 = vrot.slane %v3537_v9, 2 }
 0x1f0   :  { %v3554_v0 = vadd.f32 %v3553_v41, %v3552_v29 }
 0x1f1   :  { %v3539_v37 = vadd.f32 %v3538_v39, %v3537_v9 }
 0x1f2   :  { %v3557_v34 = vmul.f32 0.015625, %v3554_v0 }
 0x1f3   :  { %v3540_v59 = vrot.slane %v3539_v37, 1 }
 0x1f4   :  { %v3566_v43 = vsub.f32 %v4480_v42, %v3557_v34  ;;  %v3567_v18 = vsub.f32 %v4484_v50, %v3557_v34  ;;  %v3568_v19 = vsub.f32 %v4478_v16, %v3557_v34  ;;  %v3569_v30 = vsub.f32 %v4482_v6, %v3557_v34  ;;  %3575 = vst [vmem:[%s5838_s4 + $0x1] sm:$0x1] %v3557_v34 }
 0x1f5   :  { %v3541_v3 = vadd.f32 %v3540_v59, %v3539_v37  ;;  %v3570_v49 = vsub.f32 %v4488_v60, %v3557_v34  ;;  %v3571_v33 = vsub.f32 %v4492_v21, %v3557_v34  ;;  %v3572_v52 = vsub.f32 %v4486_v46, %v3557_v34 }
 0x1f6   :  { %v3573_v35 = vsub.f32 %v4490_v40, %v3557_v34  ;;  %v3584_v61 = vmul.f32 %v3566_v43, %v3566_v43  ;;  %v3585_v28 = vmul.f32 %v3567_v18, %v3567_v18  ;;  %v3586_v60 = vmul.f32 %v3568_v19, %v3568_v19 }
 0x1f7   :  { %v3556_v56 = vmul.f32 0.015625, %v3541_v3  ;;  %v3587_v14 = vmul.f32 %v3569_v30, %v3569_v30  ;;  %v3588_v26 = vmul.f32 %v3570_v49, %v3570_v49  ;;  %v3589_v21 = vmul.f32 %v3571_v33, %v3571_v33 }
 0x1f8   :  { %v3605_v17 = vadd.f32 %v3585_v28, %v3584_v61  ;;  %v3590_v48 = vmul.f32 %v3572_v52, %v3572_v52  ;;  %v3591_v53 = vmul.f32 %v3573_v35, %v3573_v35 }
 0x1f9   :  { %v3558_v13 = vsub.f32 %v4470_v20, %v3556_v56  ;;  %v3559_v15 = vsub.f32 %v4472_v12, %v3556_v56  ;;  %v3560_v42 = vsub.f32 %v5816_v45, %v3556_v56  ;;  %v3561_v50 = vsub.f32 %v4471_v2, %v3556_v56  ;;  %3574 = vst [vmem:[%s5838_s4] sm:$0x1] %v3556_v56 }
 0x1fa   :  { %v3562_v16 = vsub.f32 %v4474_v62, %v3556_v56  ;;  %v3563_v6 = vsub.f32 %v4476_v31, %v3556_v56  ;;  %v3564_v36 = vsub.f32 %v4473_v23, %v3556_v56  ;;  %v3565_v63 = vsub.f32 %v4475_v11, %v3556_v56 }
 0x1fb   :  { %v3576_v8 = vmul.f32 %v3558_v13, %v3558_v13  ;;  %v3577_v46 = vmul.f32 %v3559_v15, %v3559_v15  ;;  %v3578_v10 = vmul.f32 %v3560_v42, %v3560_v42  ;;  %v3606_v40 = vadd.f32 %v3605_v17, %v3586_v60 }
 0x1fc   :  { %v3579_v20 = vmul.f32 %v3561_v50, %v3561_v50  ;;  %v3580_v2 = vmul.f32 %v3562_v16, %v3562_v16  ;;  %v3581_v4 = vmul.f32 %v3563_v6, %v3563_v6  ;;  %v3582_v62 = vmul.f32 %v3564_v36, %v3564_v36 }
 0x1fd   :  { %v3592_v54 = vadd.f32 %v3577_v46, %v3576_v8  ;;  %v3607_v45 = vadd.f32 %v3606_v40, %v3587_v14  ;;  %v3583_v57 = vmul.f32 %v3565_v63, %v3565_v63 }
 0x1ff   :  { %v3593_v12 = vadd.f32 %v3592_v54, %v3578_v10  ;;  %v3608_v58 = vadd.f32 %v3607_v45, %v3588_v26 }
 0x201   :  { %v3594_v38 = vadd.f32 %v3593_v12, %v3579_v20  ;;  %v3609_v23 = vadd.f32 %v3608_v58, %v3589_v21 }
 0x203   :  { %v3595_v7 = vadd.f32 %v3594_v38, %v3580_v2  ;;  %v3610_v11 = vadd.f32 %v3609_v23, %v3590_v48 }
 0x205   :  { %v3596_v51 = vadd.f32 %v3595_v7, %v3581_v4  ;;  %v3611_v24 = vadd.f32 %v3610_v11, %v3591_v53 }
 0x207   :  { %v3597_v22 = vadd.f32 %v3596_v51, %v3582_v62  ;;  %v3612_v47 = vrot.slane %v3611_v24, 4 }
 0x209   :  { %v3598_v31 = vadd.f32 %v3597_v22, %v3583_v57  ;;  %v3613_v27 = vadd.f32 %v3612_v47, %v3611_v24 }
 0x20b   :  { %v3599_v32 = vrot.slane %v3598_v31, 4  ;;  %v3614_v44 = vrot.slane %v3613_v27, 2 }
 0x20d   :  { %v3600_v5 = vadd.f32 %v3599_v32, %v3598_v31  ;;  %v3615_v25 = vadd.f32 %v3614_v44, %v3613_v27 }
 0x20f   :  { %v3601_v55 = vrot.slane %v3600_v5, 2  ;;  %v3616_v29 = vrot.slane %v3615_v25, 1 }
 0x211   :  { %v3602_v1 = vadd.f32 %v3601_v55, %v3600_v5  ;;  %v3617_v41 = vadd.f32 %v3616_v29, %v3615_v25 }
 0x213   :  { %v3603_v9 = vrot.slane %v3602_v1, 1  ;;  %3619 = vst [vmem:[%s5839_s5 + $0x1] sm:$0x1] %v3617_v41 }
 0x215   :  { %v3604_v39 = vadd.f32 %v3603_v9, %v3602_v1 }
 0x217   :  { %3618 = vst [vmem:[%s5839_s5] sm:$0x1] %v3604_v39 }

</bundles_post_ra>
